<compile_context>
chip_gen: v7x
topology: tpu7x:2x2x1
jax: 0.10.0
libtpu: 0.0.40
codegen_flags: <defaults>
</compile_context>

<pallas_src>
import functools

import jax
import jax.numpy as jnp
from jax import lax
from jax.experimental import pallas as pl
from jax.experimental.pallas import tpu as pltpu


def _round_up(x, m):
    return ((x + m - 1) // m) * m


def _cdiv(a, b):
    return -(-a // b)


def _silu(x):
    # sigmoid(x) = 0.5 * tanh(0.5 x) + 0.5 : one EUP transcendental, no f32 divide.
    return x * (0.5 * jnp.tanh(0.5 * x) + 0.5)


def _softplus(x):
    # numerically stable softplus, elementwise-only ops
    return jnp.maximum(x, 0.0) + jnp.log1p(jnp.exp(-jnp.abs(x)))


def _dynamics_kernel(
    x_ref,        # (E_blk, TB, D_in_p)
    w_in_ref,     # (E_blk, D_in_p, H_p)
    w_hid_ref,    # (E_blk, n_hidden, H_p, H_p)
    w_head_ref,   # (E_blk, H_p, D_head)   mu in [0:d_half), log_var in [d_half:)
    b_hid_ref,    # (E_blk, n_hidden+1, 1, H_p)   row 0 = input layer bias
    b_head_ref,   # (E_blk, 1, D_head)
    bounds_ref,   # (2, D_head)  row 0 = min_logvar, row 1 = max_logvar (lv lanes)
    out_ref,      # (E_blk, TB, D_head)    [mu-half || var-half]
    *, e_blk, n_hidden, d_half,
):
    tb = out_ref.shape[1]
    d_head = out_ref.shape[2]
    wdt = w_in_ref.dtype

    # Hoisted broadcasts (JAX does not CSE broadcast_in_dim inside the member loop).
    min_lv = jnp.broadcast_to(bounds_ref[0:1, :], (tb, d_head))
    max_lv = jnp.broadcast_to(bounds_ref[1:2, :], (tb, d_head))
    lane = lax.broadcasted_iota(jnp.int32, (tb, d_head), 1)
    is_mu = lane < d_half

    for e in range(e_blk):
        # input layer + SiLU (contracts over the true, sublane-rounded D_in)
        h = jnp.dot(x_ref[e], w_in_ref[e],
                    preferred_element_type=jnp.float32) + b_hid_ref[e, 0]
        h = _silu(h)

        # hidden layers + SiLU (static, unrolled)
        for l in range(n_hidden):
            h = jnp.dot(h.astype(wdt), w_hid_ref[e, l],
                        preferred_element_type=jnp.float32) + b_hid_ref[e, l + 1]
            h = _silu(h)

        # fused mu / log_var head (single matmul over one lane-dense slab)
        head = jnp.dot(h.astype(wdt), w_head_ref[e],
                       preferred_element_type=jnp.float32) + b_head_ref[e]

        # softplus log-var clamping (same order as the torch module); applied to the
        # full slab, then the mu half is restored by a lane select -> one full-width,
        # unmasked store per member (no concat, no masked vst).
        lv = max_lv - _softplus(max_lv - head)
        lv = min_lv + _softplus(lv - min_lv)
        out_ref[e] = jnp.where(is_mu, head, jnp.exp(lv)).astype(out_ref.dtype)


def prepare_params(params, *, compute_dtype=jnp.float32, e_blk=None):
    """One-time packing/padding of the ensemble parameters (call once, reuse).

    Returns (arrays, meta): `arrays` is a dict of padded/stacked device arrays,
    `meta` is a dict of static Python ints describing the packing.
    Use compute_dtype=jnp.bfloat16 on v6e/v7x for bf16 weights with f32 accumulation.
    """
    w_in_raw = params["w_in"]
    E, D_in, H = w_in_raw.shape
    D_out = params["w_mu"].shape[-1]

    n_hidden = 0
    while f"w_h{n_hidden + 1}" in params:
        n_hidden += 1

    # ensemble block: several members per grid step, but keep >= 2 ensemble grid
    # steps so a 2-TensorCore chip (v7x) can shard the ensemble axis too.
    if e_blk is None:
        e_blk = min(E, 4)
        if E > 1 and _cdiv(E, e_blk) < 2:
            e_blk = max(1, (E + 1) // 2)
    E_pad = _round_up(E, e_blk)

    sub = 16 if compute_dtype == jnp.bfloat16 else 8
    D_in_p = _round_up(D_in, sub)          # sublane-rounded only (not 128!)
    H_p = _round_up(H, 128)

    # single 128-lane head when 2*D_out fits, otherwise two 128-multiples
    d_half = 64 if 2 * D_out <= 128 else _round_up(D_out, 128)
    D_head = 2 * d_half

    cd = compute_dtype

    def pad_to(a, shape):
        return jnp.pad(a, [(0, s - d) for d, s in zip(a.shape, shape)])

    w_in = pad_to(w_in_raw, (E_pad, D_in_p, H_p)).astype(cd)

    w_hid = jnp.stack([params[f"w_h{i + 1}"] for i in range(n_hidden)], axis=1)
    w_hid = pad_to(w_hid, (E_pad, n_hidden, H_p, H_p)).astype(cd)

    w_head = jnp.zeros((E, H, D_head), jnp.float32)
    w_head = w_head.at[:, :, :D_out].set(params["w_mu"])
    w_head = w_head.at[:, :, d_half:d_half + D_out].set(params["w_lv"])
    w_head = pad_to(w_head, (E_pad, H_p, D_head)).astype(cd)

    b_hid = jnp.stack([params["b_in"]] +
                      [params[f"b_h{i + 1}"] for i in range(n_hidden)], axis=1)
    b_hid = pad_to(b_hid, (E_pad, n_hidden + 1, 1, H_p)).astype(jnp.float32)

    b_head = jnp.zeros((E, 1, D_head), jnp.float32)
    b_head = b_head.at[:, :, :D_out].set(params["b_mu"])
    b_head = b_head.at[:, :, d_half:d_half + D_out].set(params["b_lv"])
    b_head = pad_to(b_head, (E_pad, 1, D_head))

    bounds = jnp.zeros((2, D_head), jnp.float32)
    bounds = bounds.at[0, d_half:d_half + D_out].set(params["min_logvar"][0])
    bounds = bounds.at[1, d_half:d_half + D_out].set(params["max_logvar"][0])

    arrays = {"w_in": w_in, "w_hid": w_hid, "w_head": w_head,
              "b_hid": b_hid, "b_head": b_head, "bounds": bounds}
    meta = {"ensemble": E, "e_pad": E_pad, "e_blk": e_blk, "n_hidden": n_hidden,
            "d_in": D_in, "d_in_p": D_in_p, "h_p": H_p,
            "d_out": D_out, "d_half": d_half, "d_head": D_head,
            "compute_dtype": cd}
    return arrays, meta


def dynamics_forward(x, packed, meta, *, batch_tile=None, out_dtype=jnp.float32,
                     vmem_budget_bytes=40 * 1024 * 1024):
    """x: (E, B, state+action) float32.  packed/meta: from prepare_params().

    Returns (mu, var), each (E, B, state+1) in out_dtype.
    """
    E, B, D_in = x.shape
    assert E == meta["ensemble"] and D_in == meta["d_in"]

    cd = meta["compute_dtype"]
    e_blk, E_pad = meta["e_blk"], meta["e_pad"]
    n_hidden = meta["n_hidden"]
    D_in_p, H_p = meta["d_in_p"], meta["h_p"]
    D_head, d_half, D_out = meta["d_head"], meta["d_half"], meta["d_out"]

    sub = 16 if cd == jnp.bfloat16 else 8

    # Large batch tile (amortize per-step overhead), but avoid a mostly-padding
    # last tile: tile ~= round_up(B / ceil(B/512), sublane).
    if batch_tile is None:
        n_tiles = _cdiv(B, 512)
        batch_tile = _round_up(_cdiv(B, n_tiles), sub)
    batch_tile = max(sub, _round_up(batch_tile, sub))

    # VMEM budget (conservative so it also fits v7x's 64 MiB physical VMEM):
    # double-buffered weight/bias blocks + double-buffered x/out blocks + f32 temps.
    csz = jnp.dtype(cd).itemsize
    osz = jnp.dtype(out_dtype).itemsize
    w_bytes = (2 * e_blk * csz * (D_in_p * H_p + n_hidden * H_p * H_p + H_p * D_head)
               + 2 * e_blk * 4 * ((n_hidden + 1) * H_p + D_head)
               + 2 * 2 * D_head * 4)

    def vmem_bytes(tb):
        act = 2 * e_blk * tb * (D_in_p * csz + D_head * osz)
        interm = 4 * tb * max(H_p, D_head) * 4
        return w_bytes + act + interm

    while batch_tile > sub and vmem_bytes(batch_tile) > vmem_budget_bytes:
        batch_tile = max(sub, _round_up(batch_tile // 2, sub))

    B_p = _round_up(B, batch_tile)

    # Only the activation is padded per call (feature dim only to a sublane multiple);
    # all weight padding happened once in prepare_params().
    xp = jnp.pad(x, ((0, E_pad - E), (0, B_p - B), (0, D_in_p - D_in))).astype(cd)

    grid = (E_pad // e_blk, B_p // batch_tile)

    in_specs = [
        pl.BlockSpec((e_blk, batch_tile, D_in_p), lambda e, b: (e, b, 0)),       # x
        pl.BlockSpec((e_blk, D_in_p, H_p), lambda e, b: (e, 0, 0)),              # w_in
        pl.BlockSpec((e_blk, n_hidden, H_p, H_p), lambda e, b: (e, 0, 0, 0)),    # w_hid
        pl.BlockSpec((e_blk, H_p, D_head), lambda e, b: (e, 0, 0)),              # w_head
        pl.BlockSpec((e_blk, n_hidden + 1, 1, H_p), lambda e, b: (e, 0, 0, 0)),  # b_hid
        pl.BlockSpec((e_blk, 1, D_head), lambda e, b: (e, 0, 0)),                # b_head
        pl.BlockSpec((2, D_head), lambda e, b: (0, 0)),                          # bounds
    ]
    out_specs = pl.BlockSpec((e_blk, batch_tile, D_head), lambda e, b: (e, b, 0))

    # Both grid axes write disjoint output tiles -> both can be megacore-sharded.
    cp_kwargs = dict(dimension_semantics=("parallel", "parallel"))
    est = vmem_bytes(batch_tile)
    if est > 12 * 1024 * 1024:
        # raise the scoped VMEM limit only when needed; cap below v7x physical VMEM
        cp_kwargs["vmem_limit_bytes"] = min(int(est * 1.5), 48 * 1024 * 1024)

    kernel = functools.partial(_dynamics_kernel, e_blk=e_blk,
                               n_hidden=n_hidden, d_half=d_half)

    out = pl.pallas_call(
        kernel,
        out_shape=jax.ShapeDtypeStruct((E_pad, B_p, D_head), out_dtype),
        grid_spec=pltpu.PrefetchScalarGridSpec(
            num_scalar_prefetch=0,
            grid=grid,
            in_specs=in_specs,
            out_specs=out_specs,
        ),
        compiler_params=pltpu.CompilerParams(**cp_kwargs),
    )(xp, packed["w_in"], packed["w_hid"], packed["w_head"],
      packed["b_hid"], packed["b_head"], packed["bounds"])

    mu = out[:E, :B, :D_out]
    var = out[:E, :B, d_half:d_half + D_out]
    return mu, var


def init_params(key, state_size, action_size, ensemble_size, hidden_size):
    """Deterministic xavier-uniform-style init (matches module shapes)."""
    D_in = state_size + action_size
    D_out = state_size + 1
    E, H = ensemble_size, hidden_size

    def xavier(key, din, dout):
        bound = jnp.sqrt(6.0 / (din + dout))
        return jax.random.uniform(key, (E, din, dout), jnp.float32, -bound, bound)

    ks = jax.random.split(key, 6)
    params = {
        "w_in": xavier(ks[0], D_in, H), "b_in": jnp.zeros((E, 1, H), jnp.float32),
        "w_h1": xavier(ks[1], H, H),    "b_h1": jnp.zeros((E, 1, H), jnp.float32),
        "w_h2": xavier(ks[2], H, H),    "b_h2": jnp.zeros((E, 1, H), jnp.float32),
        "w_h3": xavier(ks[3], H, H),    "b_h3": jnp.zeros((E, 1, H), jnp.float32),
        "w_mu": xavier(ks[4], H, D_out), "b_mu": jnp.zeros((E, 1, D_out), jnp.float32),
        "w_lv": xavier(ks[5], H, D_out), "b_lv": jnp.zeros((E, 1, D_out), jnp.float32),
        "min_logvar": -jnp.ones((1, D_out), jnp.float32) * 10.0,
        "max_logvar": jnp.ones((1, D_out), jnp.float32) / 2.0,
    }
    return params


def reference_forward(x, params):
    """Pure-JAX reference mirroring the PyTorch forward."""
    def fc(h, w, b):
        return jnp.einsum("ebi,eio->ebo", h, w) + b

    silu = lambda v: v * jax.nn.sigmoid(v)
    h = silu(fc(x, params["w_in"], params["b_in"]))
    h = silu(fc(h, params["w_h1"], params["b_h1"]))
    h = silu(fc(h, params["w_h2"], params["b_h2"]))
    h = silu(fc(h, params["w_h3"], params["b_h3"]))
    mu = fc(h, params["w_mu"], params["b_mu"])
    lv = fc(h, params["w_lv"], params["b_lv"])
    max_lv, min_lv = params["max_logvar"], params["min_logvar"]
    lv = max_lv - jax.nn.softplus(max_lv - lv)
    lv = min_lv + jax.nn.softplus(lv - min_lv)
    return mu, jnp.exp(lv)


# TODO(synk): calc_loss / optimize (Adam training step) are host-side training
# utilities, not part of the forward pass, and are not implemented here.

if __name__ == "__main__":
    # small, module-consistent shapes
    state_size, action_size = 5, 3
    ensemble_size, hidden_size = 7, 32
    batch = 8

    key = jax.random.PRNGKey(0)
    kx, kp = jax.random.split(key)
    x = jax.random.normal(
        kx, (ensemble_size, batch, state_size + action_size), jnp.float32)
    params = init_params(kp, state_size, action_size, ensemble_size, hidden_size)

    mu_ref, var_ref = reference_forward(x, params)

    # f32 path: one-time packing, then the steady-state forward (tight tolerance)
    packed, meta = prepare_params(params)
    mu, var = dynamics_forward(x, packed, meta)
    jax.block_until_ready((mu, var))
    assert mu.shape == mu_ref.shape and var.shape == var_ref.shape
    assert jnp.allclose(mu, mu_ref, atol=1e-4, rtol=1e-4)
    assert jnp.allclose(var, var_ref, atol=1e-4, rtol=1e-4)

    # bf16 weights/activations with f32 MXU accumulation (v6e/v7x fast path),
    # checked with a loose tolerance against the f32 reference.
    packed_bf, meta_bf = prepare_params(params, compute_dtype=jnp.bfloat16)
    mu_b, var_b = dynamics_forward(x, packed_bf, meta_bf)
    jax.block_until_ready((mu_b, var_b))
    assert jnp.allclose(mu_b, mu_ref, atol=1e-1, rtol=1e-1)
    assert jnp.allclose(var_b, var_ref, atol=1e-1, rtol=1e-1)

    print("KERNEL_OK")
</pallas_src>

<mosaic_0001>
module attributes {stable_mosaic.version = 11 : i64} {
  func.func @_dynamics_kernel(%arg0: i32, %arg1: i32, %arg2: memref<4x8x8xf32, #tpu.memory_space<vmem>>, %arg3: memref<4x8x128xf32, #tpu.memory_space<vmem>>, %arg4: memref<4x3x128x128xf32, #tpu.memory_space<vmem>>, %arg5: memref<4x128x128xf32, #tpu.memory_space<vmem>>, %arg6: memref<4x4x1x128xf32, #tpu.memory_space<vmem>>, %arg7: memref<4x1x128xf32, #tpu.memory_space<vmem>>, %arg8: memref<2x128xf32, #tpu.memory_space<vmem>>, %arg9: memref<4x8x128xf32, #tpu.memory_space<vmem>>) attributes {dimension_semantics = [#tpu.dimension_semantics<parallel>, #tpu.dimension_semantics<parallel>], iteration_bounds = array<i64: 2, 1>, scalar_prefetch = 0 : i64, scratch_operands = 0 : i64, tpu.core_type = #tpu.core_type<tc>, window_params = [{transform_indices = @transform_0, window_bounds = array<i64: 4, 8, 8>}, {transform_indices = @transform_1, window_bounds = array<i64: 4, 8, 128>}, {transform_indices = @transform_2, window_bounds = array<i64: 4, 3, 128, 128>}, {transform_indices = @transform_3, window_bounds = array<i64: 4, 128, 128>}, {transform_indices = @transform_4, window_bounds = array<i64: 4, 4, 1, 128>}, {transform_indices = @transform_5, window_bounds = array<i64: 4, 1, 128>}, {pipeline_mode = #tpu.pipeline_mode<synchronous>, transform_indices = @transform_6, window_bounds = array<i64: 2, 128>}, {transform_indices = @transform_7, window_bounds = array<i64: 4, 8, 128>}]} {
    %c0 = arith.constant 0 : index
    %c0_0 = arith.constant 0 : index
    %0 = vector.load %arg8[%c0, %c0_0] : memref<2x128xf32, #tpu.memory_space<vmem>>, vector<1x128xf32>
    %1 = vector.shape_cast %0 : vector<1x128xf32> to vector<1x128xf32>
    %2 = vector.broadcast %1 : vector<1x128xf32> to vector<8x128xf32>
    %c1 = arith.constant 1 : index
    %c0_1 = arith.constant 0 : index
    %3 = vector.load %arg8[%c1, %c0_1] : memref<2x128xf32, #tpu.memory_space<vmem>>, vector<1x128xf32>
    %4 = vector.shape_cast %3 : vector<1x128xf32> to vector<1x128xf32>
    %5 = vector.broadcast %4 : vector<1x128xf32> to vector<8x128xf32>
    %6 = tpu.iota {dimensions = array<i32: 1>} : vector<8x128xi32>
    %c64_i32 = arith.constant 64 : i32
    %7 = vector.broadcast %c64_i32 : i32 to vector<8x128xi32>
    %8 = arith.cmpi slt, %6, %7 : vector<8x128xi32>
    %c0_2 = arith.constant 0 : index
    %c0_3 = arith.constant 0 : index
    %c0_4 = arith.constant 0 : index
    %9 = vector.load %arg2[%c0_2, %c0_3, %c0_4] : memref<4x8x8xf32, #tpu.memory_space<vmem>>, vector<1x8x8xf32>
    %10 = vector.shape_cast %9 : vector<1x8x8xf32> to vector<8x8xf32>
    %c0_5 = arith.constant 0 : index
    %c0_6 = arith.constant 0 : index
    %c0_7 = arith.constant 0 : index
    %11 = vector.load %arg3[%c0_5, %c0_6, %c0_7] : memref<4x8x128xf32, #tpu.memory_space<vmem>>, vector<1x8x128xf32>
    %12 = vector.shape_cast %11 : vector<1x8x128xf32> to vector<8x128xf32>
    %cst = arith.constant dense<0.000000e+00> : vector<8x128xf32>
    %13 = tpu.matmul %10, %12, %cst {dimension_numbers = #tpu.dot_dimension_numbers<[1], [0], [0], [1], [0, 0, 1, 1], [], []>} : vector<8x8xf32>, vector<8x128xf32>, vector<8x128xf32> -> vector<8x128xf32>
    %c0_8 = arith.constant 0 : index
    %c0_9 = arith.constant 0 : index
    %c0_10 = arith.constant 0 : index
    %c0_11 = arith.constant 0 : index
    %14 = vector.load %arg6[%c0_8, %c0_9, %c0_10, %c0_11] : memref<4x4x1x128xf32, #tpu.memory_space<vmem>>, vector<1x1x1x128xf32>
    %15 = vector.shape_cast %14 : vector<1x1x1x128xf32> to vector<1x128xf32>
    %16 = vector.broadcast %15 : vector<1x128xf32> to vector<8x128xf32>
    %17 = arith.addf %13, %16 : vector<8x128xf32>
    %cst_12 = arith.constant 5.000000e-01 : f32
    %18 = vector.broadcast %cst_12 : f32 to vector<8x128xf32>
    %19 = arith.mulf %18, %17 : vector<8x128xf32>
    %20 = math.tanh %19 : vector<8x128xf32>
    %cst_13 = arith.constant 5.000000e-01 : f32
    %21 = vector.broadcast %cst_13 : f32 to vector<8x128xf32>
    %22 = arith.mulf %21, %20 : vector<8x128xf32>
    %cst_14 = arith.constant 5.000000e-01 : f32
    %23 = vector.broadcast %cst_14 : f32 to vector<8x128xf32>
    %24 = arith.addf %22, %23 : vector<8x128xf32>
    %25 = arith.mulf %17, %24 : vector<8x128xf32>
    %c0_15 = arith.constant 0 : index
    %c0_16 = arith.constant 0 : index
    %c0_17 = arith.constant 0 : index
    %c0_18 = arith.constant 0 : index
    %26 = vector.load %arg4[%c0_15, %c0_16, %c0_17, %c0_18] : memref<4x3x128x128xf32, #tpu.memory_space<vmem>>, vector<1x1x128x128xf32>
    %27 = vector.shape_cast %26 : vector<1x1x128x128xf32> to vector<128x128xf32>
    %cst_19 = arith.constant dense<0.000000e+00> : vector<8x128xf32>
    %28 = tpu.matmul %25, %27, %cst_19 {dimension_numbers = #tpu.dot_dimension_numbers<[1], [0], [0], [1], [0, 0, 1, 1], [], []>} : vector<8x128xf32>, vector<128x128xf32>, vector<8x128xf32> -> vector<8x128xf32>
    %c0_20 = arith.constant 0 : index
    %c1_21 = arith.constant 1 : index
    %c0_22 = arith.constant 0 : index
    %c0_23 = arith.constant 0 : index
    %29 = vector.load %arg6[%c0_20, %c1_21, %c0_22, %c0_23] : memref<4x4x1x128xf32, #tpu.memory_space<vmem>>, vector<1x1x1x128xf32>
    %30 = vector.shape_cast %29 : vector<1x1x1x128xf32> to vector<1x128xf32>
    %31 = vector.broadcast %30 : vector<1x128xf32> to vector<8x128xf32>
    %32 = arith.addf %28, %31 : vector<8x128xf32>
    %cst_24 = arith.constant 5.000000e-01 : f32
    %33 = vector.broadcast %cst_24 : f32 to vector<8x128xf32>
    %34 = arith.mulf %33, %32 : vector<8x128xf32>
    %35 = math.tanh %34 : vector<8x128xf32>
    %cst_25 = arith.constant 5.000000e-01 : f32
    %36 = vector.broadcast %cst_25 : f32 to vector<8x128xf32>
    %37 = arith.mulf %36, %35 : vector<8x128xf32>
    %cst_26 = arith.constant 5.000000e-01 : f32
    %38 = vector.broadcast %cst_26 : f32 to vector<8x128xf32>
    %39 = arith.addf %37, %38 : vector<8x128xf32>
    %40 = arith.mulf %32, %39 : vector<8x128xf32>
    %c0_27 = arith.constant 0 : index
    %c1_28 = arith.constant 1 : index
    %c0_29 = arith.constant 0 : index
    %c0_30 = arith.constant 0 : index
    %41 = vector.load %arg4[%c0_27, %c1_28, %c0_29, %c0_30] : memref<4x3x128x128xf32, #tpu.memory_space<vmem>>, vector<1x1x128x128xf32>
    %42 = vector.shape_cast %41 : vector<1x1x128x128xf32> to vector<128x128xf32>
    %cst_31 = arith.constant dense<0.000000e+00> : vector<8x128xf32>
    %43 = tpu.matmul %40, %42, %cst_31 {dimension_numbers = #tpu.dot_dimension_numbers<[1], [0], [0], [1], [0, 0, 1, 1], [], []>} : vector<8x128xf32>, vector<128x128xf32>, vector<8x128xf32> -> vector<8x128xf32>
    %c0_32 = arith.constant 0 : index
    %c2 = arith.constant 2 : index
    %c0_33 = arith.constant 0 : index
    %c0_34 = arith.constant 0 : index
    %44 = vector.load %arg6[%c0_32, %c2, %c0_33, %c0_34] : memref<4x4x1x128xf32, #tpu.memory_space<vmem>>, vector<1x1x1x128xf32>
    %45 = vector.shape_cast %44 : vector<1x1x1x128xf32> to vector<1x128xf32>
    %46 = vector.broadcast %45 : vector<1x128xf32> to vector<8x128xf32>
    %47 = arith.addf %43, %46 : vector<8x128xf32>
    %cst_35 = arith.constant 5.000000e-01 : f32
    %48 = vector.broadcast %cst_35 : f32 to vector<8x128xf32>
    %49 = arith.mulf %48, %47 : vector<8x128xf32>
    %50 = math.tanh %49 : vector<8x128xf32>
    %cst_36 = arith.constant 5.000000e-01 : f32
    %51 = vector.broadcast %cst_36 : f32 to vector<8x128xf32>
    %52 = arith.mulf %51, %50 : vector<8x128xf32>
    %cst_37 = arith.constant 5.000000e-01 : f32
    %53 = vector.broadcast %cst_37 : f32 to vector<8x128xf32>
    %54 = arith.addf %52, %53 : vector<8x128xf32>
    %55 = arith.mulf %47, %54 : vector<8x128xf32>
    %c0_38 = arith.constant 0 : index
    %c2_39 = arith.constant 2 : index
    %c0_40 = arith.constant 0 : index
    %c0_41 = arith.constant 0 : index
    %56 = vector.load %arg4[%c0_38, %c2_39, %c0_40, %c0_41] : memref<4x3x128x128xf32, #tpu.memory_space<vmem>>, vector<1x1x128x128xf32>
    %57 = vector.shape_cast %56 : vector<1x1x128x128xf32> to vector<128x128xf32>
    %cst_42 = arith.constant dense<0.000000e+00> : vector<8x128xf32>
    %58 = tpu.matmul %55, %57, %cst_42 {dimension_numbers = #tpu.dot_dimension_numbers<[1], [0], [0], [1], [0, 0, 1, 1], [], []>} : vector<8x128xf32>, vector<128x128xf32>, vector<8x128xf32> -> vector<8x128xf32>
    %c0_43 = arith.constant 0 : index
    %c3 = arith.constant 3 : index
    %c0_44 = arith.constant 0 : index
    %c0_45 = arith.constant 0 : index
    %59 = vector.load %arg6[%c0_43, %c3, %c0_44, %c0_45] : memref<4x4x1x128xf32, #tpu.memory_space<vmem>>, vector<1x1x1x128xf32>
    %60 = vector.shape_cast %59 : vector<1x1x1x128xf32> to vector<1x128xf32>
    %61 = vector.broadcast %60 : vector<1x128xf32> to vector<8x128xf32>
    %62 = arith.addf %58, %61 : vector<8x128xf32>
    %cst_46 = arith.constant 5.000000e-01 : f32
    %63 = vector.broadcast %cst_46 : f32 to vector<8x128xf32>
    %64 = arith.mulf %63, %62 : vector<8x128xf32>
    %65 = math.tanh %64 : vector<8x128xf32>
    %cst_47 = arith.constant 5.000000e-01 : f32
    %66 = vector.broadcast %cst_47 : f32 to vector<8x128xf32>
    %67 = arith.mulf %66, %65 : vector<8x128xf32>
    %cst_48 = arith.constant 5.000000e-01 : f32
    %68 = vector.broadcast %cst_48 : f32 to vector<8x128xf32>
    %69 = arith.addf %67, %68 : vector<8x128xf32>
    %70 = arith.mulf %62, %69 : vector<8x128xf32>
    %c0_49 = arith.constant 0 : index
    %c0_50 = arith.constant 0 : index
    %c0_51 = arith.constant 0 : index
    %71 = vector.load %arg5[%c0_49, %c0_50, %c0_51] : memref<4x128x128xf32, #tpu.memory_space<vmem>>, vector<1x128x128xf32>
    %72 = vector.shape_cast %71 : vector<1x128x128xf32> to vector<128x128xf32>
    %cst_52 = arith.constant dense<0.000000e+00> : vector<8x128xf32>
    %73 = tpu.matmul %70, %72, %cst_52 {dimension_numbers = #tpu.dot_dimension_numbers<[1], [0], [0], [1], [0, 0, 1, 1], [], []>} : vector<8x128xf32>, vector<128x128xf32>, vector<8x128xf32> -> vector<8x128xf32>
    %c0_53 = arith.constant 0 : index
    %c0_54 = arith.constant 0 : index
    %c0_55 = arith.constant 0 : index
    %74 = vector.load %arg7[%c0_53, %c0_54, %c0_55] : memref<4x1x128xf32, #tpu.memory_space<vmem>>, vector<1x1x128xf32>
    %75 = vector.shape_cast %74 : vector<1x1x128xf32> to vector<1x128xf32>
    %76 = vector.broadcast %75 : vector<1x128xf32> to vector<8x128xf32>
    %77 = arith.addf %73, %76 : vector<8x128xf32>
    %78 = arith.subf %5, %77 : vector<8x128xf32>
    %cst_56 = arith.constant 0.000000e+00 : f32
    %79 = vector.broadcast %cst_56 : f32 to vector<8x128xf32>
    %80 = arith.maximumf %78, %79 : vector<8x128xf32>
    %81 = math.absf %78 : vector<8x128xf32>
    %cst_57 = arith.constant 0.000000e+00 : f32
    %82 = vector.broadcast %cst_57 : f32 to vector<8x128xf32>
    %83 = arith.subf %82, %81 : vector<8x128xf32>
    %84 = math.exp %83 : vector<8x128xf32>
    %85 = math.log1p %84 : vector<8x128xf32>
    %86 = arith.addf %80, %85 : vector<8x128xf32>
    %87 = arith.subf %5, %86 : vector<8x128xf32>
    %88 = arith.subf %87, %2 : vector<8x128xf32>
    %cst_58 = arith.constant 0.000000e+00 : f32
    %89 = vector.broadcast %cst_58 : f32 to vector<8x128xf32>
    %90 = arith.maximumf %88, %89 : vector<8x128xf32>
    %91 = math.absf %88 : vector<8x128xf32>
    %cst_59 = arith.constant 0.000000e+00 : f32
    %92 = vector.broadcast %cst_59 : f32 to vector<8x128xf32>
    %93 = arith.subf %92, %91 : vector<8x128xf32>
    %94 = math.exp %93 : vector<8x128xf32>
    %95 = math.log1p %94 : vector<8x128xf32>
    %96 = arith.addf %90, %95 : vector<8x128xf32>
    %97 = arith.addf %2, %96 : vector<8x128xf32>
    %98 = math.exp %97 : vector<8x128xf32>
    %99 = arith.select %8, %77, %98 : vector<8x128xi1>, vector<8x128xf32>
    %c0_60 = arith.constant 0 : index
    %c0_61 = arith.constant 0 : index
    %c0_62 = arith.constant 0 : index
    %100 = vector.load %arg9[%c0_60, %c0_61, %c0_62] : memref<4x8x128xf32, #tpu.memory_space<vmem>>, vector<1x8x128xf32>
    %101 = vector.shape_cast %100 : vector<1x8x128xf32> to vector<8x128xf32>
    %102 = vector.shape_cast %99 : vector<8x128xf32> to vector<1x8x128xf32>
    tpu.vector_store %arg9[%c0_60, %c0_61, %c0_62], %102 {strides = array<i32>} : memref<4x8x128xf32, #tpu.memory_space<vmem>>, vector<1x8x128xf32>,
    %c1_63 = arith.constant 1 : index
    %c0_64 = arith.constant 0 : index
    %c0_65 = arith.constant 0 : index
    %103 = vector.load %arg2[%c1_63, %c0_64, %c0_65] : memref<4x8x8xf32, #tpu.memory_space<vmem>>, vector<1x8x8xf32>
    %104 = vector.shape_cast %103 : vector<1x8x8xf32> to vector<8x8xf32>
    %c1_66 = arith.constant 1 : index
    %c0_67 = arith.constant 0 : index
    %c0_68 = arith.constant 0 : index
    %105 = vector.load %arg3[%c1_66, %c0_67, %c0_68] : memref<4x8x128xf32, #tpu.memory_space<vmem>>, vector<1x8x128xf32>
    %106 = vector.shape_cast %105 : vector<1x8x128xf32> to vector<8x128xf32>
    %cst_69 = arith.constant dense<0.000000e+00> : vector<8x128xf32>
    %107 = tpu.matmul %104, %106, %cst_69 {dimension_numbers = #tpu.dot_dimension_numbers<[1], [0], [0], [1], [0, 0, 1, 1], [], []>} : vector<8x8xf32>, vector<8x128xf32>, vector<8x128xf32> -> vector<8x128xf32>
    %c1_70 = arith.constant 1 : index
    %c0_71 = arith.constant 0 : index
    %c0_72 = arith.constant 0 : index
    %c0_73 = arith.constant 0 : index
    %108 = vector.load %arg6[%c1_70, %c0_71, %c0_72, %c0_73] : memref<4x4x1x128xf32, #tpu.memory_space<vmem>>, vector<1x1x1x128xf32>
    %109 = vector.shape_cast %108 : vector<1x1x1x128xf32> to vector<1x128xf32>
    %110 = vector.broadcast %109 : vector<1x128xf32> to vector<8x128xf32>
    %111 = arith.addf %107, %110 : vector<8x128xf32>
    %cst_74 = arith.constant 5.000000e-01 : f32
    %112 = vector.broadcast %cst_74 : f32 to vector<8x128xf32>
    %113 = arith.mulf %112, %111 : vector<8x128xf32>
    %114 = math.tanh %113 : vector<8x128xf32>
    %cst_75 = arith.constant 5.000000e-01 : f32
    %115 = vector.broadcast %cst_75 : f32 to vector<8x128xf32>
    %116 = arith.mulf %115, %114 : vector<8x128xf32>
    %cst_76 = arith.constant 5.000000e-01 : f32
    %117 = vector.broadcast %cst_76 : f32 to vector<8x128xf32>
    %118 = arith.addf %116, %117 : vector<8x128xf32>
    %119 = arith.mulf %111, %118 : vector<8x128xf32>
    %c1_77 = arith.constant 1 : index
    %c0_78 = arith.constant 0 : index
    %c0_79 = arith.constant 0 : index
    %c0_80 = arith.constant 0 : index
    %120 = vector.load %arg4[%c1_77, %c0_78, %c0_79, %c0_80] : memref<4x3x128x128xf32, #tpu.memory_space<vmem>>, vector<1x1x128x128xf32>
    %121 = vector.shape_cast %120 : vector<1x1x128x128xf32> to vector<128x128xf32>
    %cst_81 = arith.constant dense<0.000000e+00> : vector<8x128xf32>
    %122 = tpu.matmul %119, %121, %cst_81 {dimension_numbers = #tpu.dot_dimension_numbers<[1], [0], [0], [1], [0, 0, 1, 1], [], []>} : vector<8x128xf32>, vector<128x128xf32>, vector<8x128xf32> -> vector<8x128xf32>
    %c1_82 = arith.constant 1 : index
    %c1_83 = arith.constant 1 : index
    %c0_84 = arith.constant 0 : index
    %c0_85 = arith.constant 0 : index
    %123 = vector.load %arg6[%c1_82, %c1_83, %c0_84, %c0_85] : memref<4x4x1x128xf32, #tpu.memory_space<vmem>>, vector<1x1x1x128xf32>
    %124 = vector.shape_cast %123 : vector<1x1x1x128xf32> to vector<1x128xf32>
    %125 = vector.broadcast %124 : vector<1x128xf32> to vector<8x128xf32>
    %126 = arith.addf %122, %125 : vector<8x128xf32>
    %cst_86 = arith.constant 5.000000e-01 : f32
    %127 = vector.broadcast %cst_86 : f32 to vector<8x128xf32>
    %128 = arith.mulf %127, %126 : vector<8x128xf32>
    %129 = math.tanh %128 : vector<8x128xf32>
    %cst_87 = arith.constant 5.000000e-01 : f32
    %130 = vector.broadcast %cst_87 : f32 to vector<8x128xf32>
    %131 = arith.mulf %130, %129 : vector<8x128xf32>
    %cst_88 = arith.constant 5.000000e-01 : f32
    %132 = vector.broadcast %cst_88 : f32 to vector<8x128xf32>
    %133 = arith.addf %131, %132 : vector<8x128xf32>
    %134 = arith.mulf %126, %133 : vector<8x128xf32>
    %c1_89 = arith.constant 1 : index
    %c1_90 = arith.constant 1 : index
    %c0_91 = arith.constant 0 : index
    %c0_92 = arith.constant 0 : index
    %135 = vector.load %arg4[%c1_89, %c1_90, %c0_91, %c0_92] : memref<4x3x128x128xf32, #tpu.memory_space<vmem>>, vector<1x1x128x128xf32>
    %136 = vector.shape_cast %135 : vector<1x1x128x128xf32> to vector<128x128xf32>
    %cst_93 = arith.constant dense<0.000000e+00> : vector<8x128xf32>
    %137 = tpu.matmul %134, %136, %cst_93 {dimension_numbers = #tpu.dot_dimension_numbers<[1], [0], [0], [1], [0, 0, 1, 1], [], []>} : vector<8x128xf32>, vector<128x128xf32>, vector<8x128xf32> -> vector<8x128xf32>
    %c1_94 = arith.constant 1 : index
    %c2_95 = arith.constant 2 : index
    %c0_96 = arith.constant 0 : index
    %c0_97 = arith.constant 0 : index
    %138 = vector.load %arg6[%c1_94, %c2_95, %c0_96, %c0_97] : memref<4x4x1x128xf32, #tpu.memory_space<vmem>>, vector<1x1x1x128xf32>
    %139 = vector.shape_cast %138 : vector<1x1x1x128xf32> to vector<1x128xf32>
    %140 = vector.broadcast %139 : vector<1x128xf32> to vector<8x128xf32>
    %141 = arith.addf %137, %140 : vector<8x128xf32>
    %cst_98 = arith.constant 5.000000e-01 : f32
    %142 = vector.broadcast %cst_98 : f32 to vector<8x128xf32>
    %143 = arith.mulf %142, %141 : vector<8x128xf32>
    %144 = math.tanh %143 : vector<8x128xf32>
    %cst_99 = arith.constant 5.000000e-01 : f32
    %145 = vector.broadcast %cst_99 : f32 to vector<8x128xf32>
    %146 = arith.mulf %145, %144 : vector<8x128xf32>
    %cst_100 = arith.constant 5.000000e-01 : f32
    %147 = vector.broadcast %cst_100 : f32 to vector<8x128xf32>
    %148 = arith.addf %146, %147 : vector<8x128xf32>
    %149 = arith.mulf %141, %148 : vector<8x128xf32>
    %c1_101 = arith.constant 1 : index
    %c2_102 = arith.constant 2 : index
    %c0_103 = arith.constant 0 : index
    %c0_104 = arith.constant 0 : index
    %150 = vector.load %arg4[%c1_101, %c2_102, %c0_103, %c0_104] : memref<4x3x128x128xf32, #tpu.memory_space<vmem>>, vector<1x1x128x128xf32>
    %151 = vector.shape_cast %150 : vector<1x1x128x128xf32> to vector<128x128xf32>
    %cst_105 = arith.constant dense<0.000000e+00> : vector<8x128xf32>
    %152 = tpu.matmul %149, %151, %cst_105 {dimension_numbers = #tpu.dot_dimension_numbers<[1], [0], [0], [1], [0, 0, 1, 1], [], []>} : vector<8x128xf32>, vector<128x128xf32>, vector<8x128xf32> -> vector<8x128xf32>
    %c1_106 = arith.constant 1 : index
    %c3_107 = arith.constant 3 : index
    %c0_108 = arith.constant 0 : index
    %c0_109 = arith.constant 0 : index
    %153 = vector.load %arg6[%c1_106, %c3_107, %c0_108, %c0_109] : memref<4x4x1x128xf32, #tpu.memory_space<vmem>>, vector<1x1x1x128xf32>
    %154 = vector.shape_cast %153 : vector<1x1x1x128xf32> to vector<1x128xf32>
    %155 = vector.broadcast %154 : vector<1x128xf32> to vector<8x128xf32>
    %156 = arith.addf %152, %155 : vector<8x128xf32>
    %cst_110 = arith.constant 5.000000e-01 : f32
    %157 = vector.broadcast %cst_110 : f32 to vector<8x128xf32>
    %158 = arith.mulf %157, %156 : vector<8x128xf32>
    %159 = math.tanh %158 : vector<8x128xf32>
    %cst_111 = arith.constant 5.000000e-01 : f32
    %160 = vector.broadcast %cst_111 : f32 to vector<8x128xf32>
    %161 = arith.mulf %160, %159 : vector<8x128xf32>
    %cst_112 = arith.constant 5.000000e-01 : f32
    %162 = vector.broadcast %cst_112 : f32 to vector<8x128xf32>
    %163 = arith.addf %161, %162 : vector<8x128xf32>
    %164 = arith.mulf %156, %163 : vector<8x128xf32>
    %c1_113 = arith.constant 1 : index
    %c0_114 = arith.constant 0 : index
    %c0_115 = arith.constant 0 : index
    %165 = vector.load %arg5[%c1_113, %c0_114, %c0_115] : memref<4x128x128xf32, #tpu.memory_space<vmem>>, vector<1x128x128xf32>
    %166 = vector.shape_cast %165 : vector<1x128x128xf32> to vector<128x128xf32>
    %cst_116 = arith.constant dense<0.000000e+00> : vector<8x128xf32>
    %167 = tpu.matmul %164, %166, %cst_116 {dimension_numbers = #tpu.dot_dimension_numbers<[1], [0], [0], [1], [0, 0, 1, 1], [], []>} : vector<8x128xf32>, vector<128x128xf32>, vector<8x128xf32> -> vector<8x128xf32>
    %c1_117 = arith.constant 1 : index
    %c0_118 = arith.constant 0 : index
    %c0_119 = arith.constant 0 : index
    %168 = vector.load %arg7[%c1_117, %c0_118, %c0_119] : memref<4x1x128xf32, #tpu.memory_space<vmem>>, vector<1x1x128xf32>
    %169 = vector.shape_cast %168 : vector<1x1x128xf32> to vector<1x128xf32>
    %170 = vector.broadcast %169 : vector<1x128xf32> to vector<8x128xf32>
    %171 = arith.addf %167, %170 : vector<8x128xf32>
    %172 = arith.subf %5, %171 : vector<8x128xf32>
    %cst_120 = arith.constant 0.000000e+00 : f32
    %173 = vector.broadcast %cst_120 : f32 to vector<8x128xf32>
    %174 = arith.maximumf %172, %173 : vector<8x128xf32>
    %175 = math.absf %172 : vector<8x128xf32>
    %cst_121 = arith.constant 0.000000e+00 : f32
    %176 = vector.broadcast %cst_121 : f32 to vector<8x128xf32>
    %177 = arith.subf %176, %175 : vector<8x128xf32>
    %178 = math.exp %177 : vector<8x128xf32>
    %179 = math.log1p %178 : vector<8x128xf32>
    %180 = arith.addf %174, %179 : vector<8x128xf32>
    %181 = arith.subf %5, %180 : vector<8x128xf32>
    %182 = arith.subf %181, %2 : vector<8x128xf32>
    %cst_122 = arith.constant 0.000000e+00 : f32
    %183 = vector.broadcast %cst_122 : f32 to vector<8x128xf32>
    %184 = arith.maximumf %182, %183 : vector<8x128xf32>
    %185 = math.absf %182 : vector<8x128xf32>
    %cst_123 = arith.constant 0.000000e+00 : f32
    %186 = vector.broadcast %cst_123 : f32 to vector<8x128xf32>
    %187 = arith.subf %186, %185 : vector<8x128xf32>
    %188 = math.exp %187 : vector<8x128xf32>
    %189 = math.log1p %188 : vector<8x128xf32>
    %190 = arith.addf %184, %189 : vector<8x128xf32>
    %191 = arith.addf %2, %190 : vector<8x128xf32>
    %192 = math.exp %191 : vector<8x128xf32>
    %193 = arith.select %8, %171, %192 : vector<8x128xi1>, vector<8x128xf32>
    %c1_124 = arith.constant 1 : index
    %c0_125 = arith.constant 0 : index
    %c0_126 = arith.constant 0 : index
    %194 = vector.load %arg9[%c1_124, %c0_125, %c0_126] : memref<4x8x128xf32, #tpu.memory_space<vmem>>, vector<1x8x128xf32>
    %195 = vector.shape_cast %194 : vector<1x8x128xf32> to vector<8x128xf32>
    %196 = vector.shape_cast %193 : vector<8x128xf32> to vector<1x8x128xf32>
    tpu.vector_store %arg9[%c1_124, %c0_125, %c0_126], %196 {strides = array<i32>} : memref<4x8x128xf32, #tpu.memory_space<vmem>>, vector<1x8x128xf32>,
    %c2_127 = arith.constant 2 : index
    %c0_128 = arith.constant 0 : index
    %c0_129 = arith.constant 0 : index
    %197 = vector.load %arg2[%c2_127, %c0_128, %c0_129] : memref<4x8x8xf32, #tpu.memory_space<vmem>>, vector<1x8x8xf32>
    %198 = vector.shape_cast %197 : vector<1x8x8xf32> to vector<8x8xf32>
    %c2_130 = arith.constant 2 : index
    %c0_131 = arith.constant 0 : index
    %c0_132 = arith.constant 0 : index
    %199 = vector.load %arg3[%c2_130, %c0_131, %c0_132] : memref<4x8x128xf32, #tpu.memory_space<vmem>>, vector<1x8x128xf32>
    %200 = vector.shape_cast %199 : vector<1x8x128xf32> to vector<8x128xf32>
    %cst_133 = arith.constant dense<0.000000e+00> : vector<8x128xf32>
    %201 = tpu.matmul %198, %200, %cst_133 {dimension_numbers = #tpu.dot_dimension_numbers<[1], [0], [0], [1], [0, 0, 1, 1], [], []>} : vector<8x8xf32>, vector<8x128xf32>, vector<8x128xf32> -> vector<8x128xf32>
    %c2_134 = arith.constant 2 : index
    %c0_135 = arith.constant 0 : index
    %c0_136 = arith.constant 0 : index
    %c0_137 = arith.constant 0 : index
    %202 = vector.load %arg6[%c2_134, %c0_135, %c0_136, %c0_137] : memref<4x4x1x128xf32, #tpu.memory_space<vmem>>, vector<1x1x1x128xf32>
    %203 = vector.shape_cast %202 : vector<1x1x1x128xf32> to vector<1x128xf32>
    %204 = vector.broadcast %203 : vector<1x128xf32> to vector<8x128xf32>
    %205 = arith.addf %201, %204 : vector<8x128xf32>
    %cst_138 = arith.constant 5.000000e-01 : f32
    %206 = vector.broadcast %cst_138 : f32 to vector<8x128xf32>
    %207 = arith.mulf %206, %205 : vector<8x128xf32>
    %208 = math.tanh %207 : vector<8x128xf32>
    %cst_139 = arith.constant 5.000000e-01 : f32
    %209 = vector.broadcast %cst_139 : f32 to vector<8x128xf32>
    %210 = arith.mulf %209, %208 : vector<8x128xf32>
    %cst_140 = arith.constant 5.000000e-01 : f32
    %211 = vector.broadcast %cst_140 : f32 to vector<8x128xf32>
    %212 = arith.addf %210, %211 : vector<8x128xf32>
    %213 = arith.mulf %205, %212 : vector<8x128xf32>
    %c2_141 = arith.constant 2 : index
    %c0_142 = arith.constant 0 : index
    %c0_143 = arith.constant 0 : index
    %c0_144 = arith.constant 0 : index
    %214 = vector.load %arg4[%c2_141, %c0_142, %c0_143, %c0_144] : memref<4x3x128x128xf32, #tpu.memory_space<vmem>>, vector<1x1x128x128xf32>
    %215 = vector.shape_cast %214 : vector<1x1x128x128xf32> to vector<128x128xf32>
    %cst_145 = arith.constant dense<0.000000e+00> : vector<8x128xf32>
    %216 = tpu.matmul %213, %215, %cst_145 {dimension_numbers = #tpu.dot_dimension_numbers<[1], [0], [0], [1], [0, 0, 1, 1], [], []>} : vector<8x128xf32>, vector<128x128xf32>, vector<8x128xf32> -> vector<8x128xf32>
    %c2_146 = arith.constant 2 : index
    %c1_147 = arith.constant 1 : index
    %c0_148 = arith.constant 0 : index
    %c0_149 = arith.constant 0 : index
    %217 = vector.load %arg6[%c2_146, %c1_147, %c0_148, %c0_149] : memref<4x4x1x128xf32, #tpu.memory_space<vmem>>, vector<1x1x1x128xf32>
    %218 = vector.shape_cast %217 : vector<1x1x1x128xf32> to vector<1x128xf32>
    %219 = vector.broadcast %218 : vector<1x128xf32> to vector<8x128xf32>
    %220 = arith.addf %216, %219 : vector<8x128xf32>
    %cst_150 = arith.constant 5.000000e-01 : f32
    %221 = vector.broadcast %cst_150 : f32 to vector<8x128xf32>
    %222 = arith.mulf %221, %220 : vector<8x128xf32>
    %223 = math.tanh %222 : vector<8x128xf32>
    %cst_151 = arith.constant 5.000000e-01 : f32
    %224 = vector.broadcast %cst_151 : f32 to vector<8x128xf32>
    %225 = arith.mulf %224, %223 : vector<8x128xf32>
    %cst_152 = arith.constant 5.000000e-01 : f32
    %226 = vector.broadcast %cst_152 : f32 to vector<8x128xf32>
    %227 = arith.addf %225, %226 : vector<8x128xf32>
    %228 = arith.mulf %220, %227 : vector<8x128xf32>
    %c2_153 = arith.constant 2 : index
    %c1_154 = arith.constant 1 : index
    %c0_155 = arith.constant 0 : index
    %c0_156 = arith.constant 0 : index
    %229 = vector.load %arg4[%c2_153, %c1_154, %c0_155, %c0_156] : memref<4x3x128x128xf32, #tpu.memory_space<vmem>>, vector<1x1x128x128xf32>
    %230 = vector.shape_cast %229 : vector<1x1x128x128xf32> to vector<128x128xf32>
    %cst_157 = arith.constant dense<0.000000e+00> : vector<8x128xf32>
    %231 = tpu.matmul %228, %230, %cst_157 {dimension_numbers = #tpu.dot_dimension_numbers<[1], [0], [0], [1], [0, 0, 1, 1], [], []>} : vector<8x128xf32>, vector<128x128xf32>, vector<8x128xf32> -> vector<8x128xf32>
    %c2_158 = arith.constant 2 : index
    %c2_159 = arith.constant 2 : index
    %c0_160 = arith.constant 0 : index
    %c0_161 = arith.constant 0 : index
    %232 = vector.load %arg6[%c2_158, %c2_159, %c0_160, %c0_161] : memref<4x4x1x128xf32, #tpu.memory_space<vmem>>, vector<1x1x1x128xf32>
    %233 = vector.shape_cast %232 : vector<1x1x1x128xf32> to vector<1x128xf32>
    %234 = vector.broadcast %233 : vector<1x128xf32> to vector<8x128xf32>
    %235 = arith.addf %231, %234 : vector<8x128xf32>
    %cst_162 = arith.constant 5.000000e-01 : f32
    %236 = vector.broadcast %cst_162 : f32 to vector<8x128xf32>
    %237 = arith.mulf %236, %235 : vector<8x128xf32>
    %238 = math.tanh %237 : vector<8x128xf32>
    %cst_163 = arith.constant 5.000000e-01 : f32
    %239 = vector.broadcast %cst_163 : f32 to vector<8x128xf32>
    %240 = arith.mulf %239, %238 : vector<8x128xf32>
    %cst_164 = arith.constant 5.000000e-01 : f32
    %241 = vector.broadcast %cst_164 : f32 to vector<8x128xf32>
    %242 = arith.addf %240, %241 : vector<8x128xf32>
    %243 = arith.mulf %235, %242 : vector<8x128xf32>
    %c2_165 = arith.constant 2 : index
    %c2_166 = arith.constant 2 : index
    %c0_167 = arith.constant 0 : index
    %c0_168 = arith.constant 0 : index
    %244 = vector.load %arg4[%c2_165, %c2_166, %c0_167, %c0_168] : memref<4x3x128x128xf32, #tpu.memory_space<vmem>>, vector<1x1x128x128xf32>
    %245 = vector.shape_cast %244 : vector<1x1x128x128xf32> to vector<128x128xf32>
    %cst_169 = arith.constant dense<0.000000e+00> : vector<8x128xf32>
    %246 = tpu.matmul %243, %245, %cst_169 {dimension_numbers = #tpu.dot_dimension_numbers<[1], [0], [0], [1], [0, 0, 1, 1], [], []>} : vector<8x128xf32>, vector<128x128xf32>, vector<8x128xf32> -> vector<8x128xf32>
    %c2_170 = arith.constant 2 : index
    %c3_171 = arith.constant 3 : index
    %c0_172 = arith.constant 0 : index
    %c0_173 = arith.constant 0 : index
    %247 = vector.load %arg6[%c2_170, %c3_171, %c0_172, %c0_173] : memref<4x4x1x128xf32, #tpu.memory_space<vmem>>, vector<1x1x1x128xf32>
    %248 = vector.shape_cast %247 : vector<1x1x1x128xf32> to vector<1x128xf32>
    %249 = vector.broadcast %248 : vector<1x128xf32> to vector<8x128xf32>
    %250 = arith.addf %246, %249 : vector<8x128xf32>
    %cst_174 = arith.constant 5.000000e-01 : f32
    %251 = vector.broadcast %cst_174 : f32 to vector<8x128xf32>
    %252 = arith.mulf %251, %250 : vector<8x128xf32>
    %253 = math.tanh %252 : vector<8x128xf32>
    %cst_175 = arith.constant 5.000000e-01 : f32
    %254 = vector.broadcast %cst_175 : f32 to vector<8x128xf32>
    %255 = arith.mulf %254, %253 : vector<8x128xf32>
    %cst_176 = arith.constant 5.000000e-01 : f32
    %256 = vector.broadcast %cst_176 : f32 to vector<8x128xf32>
    %257 = arith.addf %255, %256 : vector<8x128xf32>
    %258 = arith.mulf %250, %257 : vector<8x128xf32>
    %c2_177 = arith.constant 2 : index
    %c0_178 = arith.constant 0 : index
    %c0_179 = arith.constant 0 : index
    %259 = vector.load %arg5[%c2_177, %c0_178, %c0_179] : memref<4x128x128xf32, #tpu.memory_space<vmem>>, vector<1x128x128xf32>
    %260 = vector.shape_cast %259 : vector<1x128x128xf32> to vector<128x128xf32>
    %cst_180 = arith.constant dense<0.000000e+00> : vector<8x128xf32>
    %261 = tpu.matmul %258, %260, %cst_180 {dimension_numbers = #tpu.dot_dimension_numbers<[1], [0], [0], [1], [0, 0, 1, 1], [], []>} : vector<8x128xf32>, vector<128x128xf32>, vector<8x128xf32> -> vector<8x128xf32>
    %c2_181 = arith.constant 2 : index
    %c0_182 = arith.constant 0 : index
    %c0_183 = arith.constant 0 : index
    %262 = vector.load %arg7[%c2_181, %c0_182, %c0_183] : memref<4x1x128xf32, #tpu.memory_space<vmem>>, vector<1x1x128xf32>
    %263 = vector.shape_cast %262 : vector<1x1x128xf32> to vector<1x128xf32>
    %264 = vector.broadcast %263 : vector<1x128xf32> to vector<8x128xf32>
    %265 = arith.addf %261, %264 : vector<8x128xf32>
    %266 = arith.subf %5, %265 : vector<8x128xf32>
    %cst_184 = arith.constant 0.000000e+00 : f32
    %267 = vector.broadcast %cst_184 : f32 to vector<8x128xf32>
    %268 = arith.maximumf %266, %267 : vector<8x128xf32>
    %269 = math.absf %266 : vector<8x128xf32>
    %cst_185 = arith.constant 0.000000e+00 : f32
    %270 = vector.broadcast %cst_185 : f32 to vector<8x128xf32>
    %271 = arith.subf %270, %269 : vector<8x128xf32>
    %272 = math.exp %271 : vector<8x128xf32>
    %273 = math.log1p %272 : vector<8x128xf32>
    %274 = arith.addf %268, %273 : vector<8x128xf32>
    %275 = arith.subf %5, %274 : vector<8x128xf32>
    %276 = arith.subf %275, %2 : vector<8x128xf32>
    %cst_186 = arith.constant 0.000000e+00 : f32
    %277 = vector.broadcast %cst_186 : f32 to vector<8x128xf32>
    %278 = arith.maximumf %276, %277 : vector<8x128xf32>
    %279 = math.absf %276 : vector<8x128xf32>
    %cst_187 = arith.constant 0.000000e+00 : f32
    %280 = vector.broadcast %cst_187 : f32 to vector<8x128xf32>
    %281 = arith.subf %280, %279 : vector<8x128xf32>
    %282 = math.exp %281 : vector<8x128xf32>
    %283 = math.log1p %282 : vector<8x128xf32>
    %284 = arith.addf %278, %283 : vector<8x128xf32>
    %285 = arith.addf %2, %284 : vector<8x128xf32>
    %286 = math.exp %285 : vector<8x128xf32>
    %287 = arith.select %8, %265, %286 : vector<8x128xi1>, vector<8x128xf32>
    %c2_188 = arith.constant 2 : index
    %c0_189 = arith.constant 0 : index
    %c0_190 = arith.constant 0 : index
    %288 = vector.load %arg9[%c2_188, %c0_189, %c0_190] : memref<4x8x128xf32, #tpu.memory_space<vmem>>, vector<1x8x128xf32>
    %289 = vector.shape_cast %288 : vector<1x8x128xf32> to vector<8x128xf32>
    %290 = vector.shape_cast %287 : vector<8x128xf32> to vector<1x8x128xf32>
    tpu.vector_store %arg9[%c2_188, %c0_189, %c0_190], %290 {strides = array<i32>} : memref<4x8x128xf32, #tpu.memory_space<vmem>>, vector<1x8x128xf32>,
    %c3_191 = arith.constant 3 : index
    %c0_192 = arith.constant 0 : index
    %c0_193 = arith.constant 0 : index
    %291 = vector.load %arg2[%c3_191, %c0_192, %c0_193] : memref<4x8x8xf32, #tpu.memory_space<vmem>>, vector<1x8x8xf32>
    %292 = vector.shape_cast %291 : vector<1x8x8xf32> to vector<8x8xf32>
    %c3_194 = arith.constant 3 : index
    %c0_195 = arith.constant 0 : index
    %c0_196 = arith.constant 0 : index
    %293 = vector.load %arg3[%c3_194, %c0_195, %c0_196] : memref<4x8x128xf32, #tpu.memory_space<vmem>>, vector<1x8x128xf32>
    %294 = vector.shape_cast %293 : vector<1x8x128xf32> to vector<8x128xf32>
    %cst_197 = arith.constant dense<0.000000e+00> : vector<8x128xf32>
    %295 = tpu.matmul %292, %294, %cst_197 {dimension_numbers = #tpu.dot_dimension_numbers<[1], [0], [0], [1], [0, 0, 1, 1], [], []>} : vector<8x8xf32>, vector<8x128xf32>, vector<8x128xf32> -> vector<8x128xf32>
    %c3_198 = arith.constant 3 : index
    %c0_199 = arith.constant 0 : index
    %c0_200 = arith.constant 0 : index
    %c0_201 = arith.constant 0 : index
    %296 = vector.load %arg6[%c3_198, %c0_199, %c0_200, %c0_201] : memref<4x4x1x128xf32, #tpu.memory_space<vmem>>, vector<1x1x1x128xf32>
    %297 = vector.shape_cast %296 : vector<1x1x1x128xf32> to vector<1x128xf32>
    %298 = vector.broadcast %297 : vector<1x128xf32> to vector<8x128xf32>
    %299 = arith.addf %295, %298 : vector<8x128xf32>
    %cst_202 = arith.constant 5.000000e-01 : f32
    %300 = vector.broadcast %cst_202 : f32 to vector<8x128xf32>
    %301 = arith.mulf %300, %299 : vector<8x128xf32>
    %302 = math.tanh %301 : vector<8x128xf32>
    %cst_203 = arith.constant 5.000000e-01 : f32
    %303 = vector.broadcast %cst_203 : f32 to vector<8x128xf32>
    %304 = arith.mulf %303, %302 : vector<8x128xf32>
    %cst_204 = arith.constant 5.000000e-01 : f32
    %305 = vector.broadcast %cst_204 : f32 to vector<8x128xf32>
    %306 = arith.addf %304, %305 : vector<8x128xf32>
    %307 = arith.mulf %299, %306 : vector<8x128xf32>
    %c3_205 = arith.constant 3 : index
    %c0_206 = arith.constant 0 : index
    %c0_207 = arith.constant 0 : index
    %c0_208 = arith.constant 0 : index
    %308 = vector.load %arg4[%c3_205, %c0_206, %c0_207, %c0_208] : memref<4x3x128x128xf32, #tpu.memory_space<vmem>>, vector<1x1x128x128xf32>
    %309 = vector.shape_cast %308 : vector<1x1x128x128xf32> to vector<128x128xf32>
    %cst_209 = arith.constant dense<0.000000e+00> : vector<8x128xf32>
    %310 = tpu.matmul %307, %309, %cst_209 {dimension_numbers = #tpu.dot_dimension_numbers<[1], [0], [0], [1], [0, 0, 1, 1], [], []>} : vector<8x128xf32>, vector<128x128xf32>, vector<8x128xf32> -> vector<8x128xf32>
    %c3_210 = arith.constant 3 : index
    %c1_211 = arith.constant 1 : index
    %c0_212 = arith.constant 0 : index
    %c0_213 = arith.constant 0 : index
    %311 = vector.load %arg6[%c3_210, %c1_211, %c0_212, %c0_213] : memref<4x4x1x128xf32, #tpu.memory_space<vmem>>, vector<1x1x1x128xf32>
    %312 = vector.shape_cast %311 : vector<1x1x1x128xf32> to vector<1x128xf32>
    %313 = vector.broadcast %312 : vector<1x128xf32> to vector<8x128xf32>
    %314 = arith.addf %310, %313 : vector<8x128xf32>
    %cst_214 = arith.constant 5.000000e-01 : f32
    %315 = vector.broadcast %cst_214 : f32 to vector<8x128xf32>
    %316 = arith.mulf %315, %314 : vector<8x128xf32>
    %317 = math.tanh %316 : vector<8x128xf32>
    %cst_215 = arith.constant 5.000000e-01 : f32
    %318 = vector.broadcast %cst_215 : f32 to vector<8x128xf32>
    %319 = arith.mulf %318, %317 : vector<8x128xf32>
    %cst_216 = arith.constant 5.000000e-01 : f32
    %320 = vector.broadcast %cst_216 : f32 to vector<8x128xf32>
    %321 = arith.addf %319, %320 : vector<8x128xf32>
    %322 = arith.mulf %314, %321 : vector<8x128xf32>
    %c3_217 = arith.constant 3 : index
    %c1_218 = arith.constant 1 : index
    %c0_219 = arith.constant 0 : index
    %c0_220 = arith.constant 0 : index
    %323 = vector.load %arg4[%c3_217, %c1_218, %c0_219, %c0_220] : memref<4x3x128x128xf32, #tpu.memory_space<vmem>>, vector<1x1x128x128xf32>
    %324 = vector.shape_cast %323 : vector<1x1x128x128xf32> to vector<128x128xf32>
    %cst_221 = arith.constant dense<0.000000e+00> : vector<8x128xf32>
    %325 = tpu.matmul %322, %324, %cst_221 {dimension_numbers = #tpu.dot_dimension_numbers<[1], [0], [0], [1], [0, 0, 1, 1], [], []>} : vector<8x128xf32>, vector<128x128xf32>, vector<8x128xf32> -> vector<8x128xf32>
    %c3_222 = arith.constant 3 : index
    %c2_223 = arith.constant 2 : index
    %c0_224 = arith.constant 0 : index
    %c0_225 = arith.constant 0 : index
    %326 = vector.load %arg6[%c3_222, %c2_223, %c0_224, %c0_225] : memref<4x4x1x128xf32, #tpu.memory_space<vmem>>, vector<1x1x1x128xf32>
    %327 = vector.shape_cast %326 : vector<1x1x1x128xf32> to vector<1x128xf32>
    %328 = vector.broadcast %327 : vector<1x128xf32> to vector<8x128xf32>
    %329 = arith.addf %325, %328 : vector<8x128xf32>
    %cst_226 = arith.constant 5.000000e-01 : f32
    %330 = vector.broadcast %cst_226 : f32 to vector<8x128xf32>
    %331 = arith.mulf %330, %329 : vector<8x128xf32>
    %332 = math.tanh %331 : vector<8x128xf32>
    %cst_227 = arith.constant 5.000000e-01 : f32
    %333 = vector.broadcast %cst_227 : f32 to vector<8x128xf32>
    %334 = arith.mulf %333, %332 : vector<8x128xf32>
    %cst_228 = arith.constant 5.000000e-01 : f32
    %335 = vector.broadcast %cst_228 : f32 to vector<8x128xf32>
    %336 = arith.addf %334, %335 : vector<8x128xf32>
    %337 = arith.mulf %329, %336 : vector<8x128xf32>
    %c3_229 = arith.constant 3 : index
    %c2_230 = arith.constant 2 : index
    %c0_231 = arith.constant 0 : index
    %c0_232 = arith.constant 0 : index
    %338 = vector.load %arg4[%c3_229, %c2_230, %c0_231, %c0_232] : memref<4x3x128x128xf32, #tpu.memory_space<vmem>>, vector<1x1x128x128xf32>
    %339 = vector.shape_cast %338 : vector<1x1x128x128xf32> to vector<128x128xf32>
    %cst_233 = arith.constant dense<0.000000e+00> : vector<8x128xf32>
    %340 = tpu.matmul %337, %339, %cst_233 {dimension_numbers = #tpu.dot_dimension_numbers<[1], [0], [0], [1], [0, 0, 1, 1], [], []>} : vector<8x128xf32>, vector<128x128xf32>, vector<8x128xf32> -> vector<8x128xf32>
    %c3_234 = arith.constant 3 : index
    %c3_235 = arith.constant 3 : index
    %c0_236 = arith.constant 0 : index
    %c0_237 = arith.constant 0 : index
    %341 = vector.load %arg6[%c3_234, %c3_235, %c0_236, %c0_237] : memref<4x4x1x128xf32, #tpu.memory_space<vmem>>, vector<1x1x1x128xf32>
    %342 = vector.shape_cast %341 : vector<1x1x1x128xf32> to vector<1x128xf32>
    %343 = vector.broadcast %342 : vector<1x128xf32> to vector<8x128xf32>
    %344 = arith.addf %340, %343 : vector<8x128xf32>
    %cst_238 = arith.constant 5.000000e-01 : f32
    %345 = vector.broadcast %cst_238 : f32 to vector<8x128xf32>
    %346 = arith.mulf %345, %344 : vector<8x128xf32>
    %347 = math.tanh %346 : vector<8x128xf32>
    %cst_239 = arith.constant 5.000000e-01 : f32
    %348 = vector.broadcast %cst_239 : f32 to vector<8x128xf32>
    %349 = arith.mulf %348, %347 : vector<8x128xf32>
    %cst_240 = arith.constant 5.000000e-01 : f32
    %350 = vector.broadcast %cst_240 : f32 to vector<8x128xf32>
    %351 = arith.addf %349, %350 : vector<8x128xf32>
    %352 = arith.mulf %344, %351 : vector<8x128xf32>
    %c3_241 = arith.constant 3 : index
    %c0_242 = arith.constant 0 : index
    %c0_243 = arith.constant 0 : index
    %353 = vector.load %arg5[%c3_241, %c0_242, %c0_243] : memref<4x128x128xf32, #tpu.memory_space<vmem>>, vector<1x128x128xf32>
    %354 = vector.shape_cast %353 : vector<1x128x128xf32> to vector<128x128xf32>
    %cst_244 = arith.constant dense<0.000000e+00> : vector<8x128xf32>
    %355 = tpu.matmul %352, %354, %cst_244 {dimension_numbers = #tpu.dot_dimension_numbers<[1], [0], [0], [1], [0, 0, 1, 1], [], []>} : vector<8x128xf32>, vector<128x128xf32>, vector<8x128xf32> -> vector<8x128xf32>
    %c3_245 = arith.constant 3 : index
    %c0_246 = arith.constant 0 : index
    %c0_247 = arith.constant 0 : index
    %356 = vector.load %arg7[%c3_245, %c0_246, %c0_247] : memref<4x1x128xf32, #tpu.memory_space<vmem>>, vector<1x1x128xf32>
    %357 = vector.shape_cast %356 : vector<1x1x128xf32> to vector<1x128xf32>
    %358 = vector.broadcast %357 : vector<1x128xf32> to vector<8x128xf32>
    %359 = arith.addf %355, %358 : vector<8x128xf32>
    %360 = arith.subf %5, %359 : vector<8x128xf32>
    %cst_248 = arith.constant 0.000000e+00 : f32
    %361 = vector.broadcast %cst_248 : f32 to vector<8x128xf32>
    %362 = arith.maximumf %360, %361 : vector<8x128xf32>
    %363 = math.absf %360 : vector<8x128xf32>
    %cst_249 = arith.constant 0.000000e+00 : f32
    %364 = vector.broadcast %cst_249 : f32 to vector<8x128xf32>
    %365 = arith.subf %364, %363 : vector<8x128xf32>
    %366 = math.exp %365 : vector<8x128xf32>
    %367 = math.log1p %366 : vector<8x128xf32>
    %368 = arith.addf %362, %367 : vector<8x128xf32>
    %369 = arith.subf %5, %368 : vector<8x128xf32>
    %370 = arith.subf %369, %2 : vector<8x128xf32>
    %cst_250 = arith.constant 0.000000e+00 : f32
    %371 = vector.broadcast %cst_250 : f32 to vector<8x128xf32>
    %372 = arith.maximumf %370, %371 : vector<8x128xf32>
    %373 = math.absf %370 : vector<8x128xf32>
    %cst_251 = arith.constant 0.000000e+00 : f32
    %374 = vector.broadcast %cst_251 : f32 to vector<8x128xf32>
    %375 = arith.subf %374, %373 : vector<8x128xf32>
    %376 = math.exp %375 : vector<8x128xf32>
    %377 = math.log1p %376 : vector<8x128xf32>
    %378 = arith.addf %372, %377 : vector<8x128xf32>
    %379 = arith.addf %2, %378 : vector<8x128xf32>
    %380 = math.exp %379 : vector<8x128xf32>
    %381 = arith.select %8, %359, %380 : vector<8x128xi1>, vector<8x128xf32>
    %c3_252 = arith.constant 3 : index
    %c0_253 = arith.constant 0 : index
    %c0_254 = arith.constant 0 : index
    %382 = vector.load %arg9[%c3_252, %c0_253, %c0_254] : memref<4x8x128xf32, #tpu.memory_space<vmem>>, vector<1x8x128xf32>
    %383 = vector.shape_cast %382 : vector<1x8x128xf32> to vector<8x128xf32>
    %384 = vector.shape_cast %381 : vector<8x128xf32> to vector<1x8x128xf32>
    tpu.vector_store %arg9[%c3_252, %c0_253, %c0_254], %384 {strides = array<i32>} : memref<4x8x128xf32, #tpu.memory_space<vmem>>, vector<1x8x128xf32>,
    return
  }
  func.func @transform_0(%arg0: i32, %arg1: i32) -> (i32, i32, i32) {
    %c0_i32 = arith.constant 0 : i32
    %c0_i32_0 = arith.constant 0 : i32
    return %arg0, %arg1, %c0_i32 : i32, i32, i32
  }
  func.func @transform_1(%arg0: i32, %arg1: i32) -> (i32, i32, i32) {
    %c0_i32 = arith.constant 0 : i32
    %c0_i32_0 = arith.constant 0 : i32
    %c0_i32_1 = arith.constant 0 : i32
    return %arg0, %c0_i32, %c0_i32_0 : i32, i32, i32
  }
  func.func @transform_2(%arg0: i32, %arg1: i32) -> (i32, i32, i32, i32) {
    %c0_i32 = arith.constant 0 : i32
    %c0_i32_0 = arith.constant 0 : i32
    %c0_i32_1 = arith.constant 0 : i32
    %c0_i32_2 = arith.constant 0 : i32
    return %arg0, %c0_i32, %c0_i32_0, %c0_i32_1 : i32, i32, i32, i32
  }
  func.func @transform_3(%arg0: i32, %arg1: i32) -> (i32, i32, i32) {
    %c0_i32 = arith.constant 0 : i32
    %c0_i32_0 = arith.constant 0 : i32
    %c0_i32_1 = arith.constant 0 : i32
    return %arg0, %c0_i32, %c0_i32_0 : i32, i32, i32
  }
  func.func @transform_4(%arg0: i32, %arg1: i32) -> (i32, i32, i32, i32) {
    %c0_i32 = arith.constant 0 : i32
    %c0_i32_0 = arith.constant 0 : i32
    %c0_i32_1 = arith.constant 0 : i32
    %c0_i32_2 = arith.constant 0 : i32
    return %arg0, %c0_i32, %c0_i32_0, %c0_i32_1 : i32, i32, i32, i32
  }
  func.func @transform_5(%arg0: i32, %arg1: i32) -> (i32, i32, i32) {
    %c0_i32 = arith.constant 0 : i32
    %c0_i32_0 = arith.constant 0 : i32
    %c0_i32_1 = arith.constant 0 : i32
    return %arg0, %c0_i32, %c0_i32_0 : i32, i32, i32
  }
  func.func @transform_6(%arg0: i32, %arg1: i32) -> (i32, i32) {
    %c0_i32 = arith.constant 0 : i32
    %c0_i32_0 = arith.constant 0 : i32
    %c0_i32_1 = arith.constant 0 : i32
    return %c0_i32, %c0_i32_0 : i32, i32
  }
  func.func @transform_7(%arg0: i32, %arg1: i32) -> (i32, i32, i32) {
    %c0_i32 = arith.constant 0 : i32
    %c0_i32_0 = arith.constant 0 : i32
    return %arg0, %arg1, %c0_i32 : i32, i32, i32
  }
}

</mosaic_0001>

<bundles_post_ra>
// kernel: tpu_custom_call.1
= control target key start
LH: loop header
LB: loop body
LE: loop exit
PB: predicated region body
PF: predicated region fallthrough
CT: control target
= control target key end

     0   :  { %s5919_s0 = inlined_call_operand.hbm [shape: f32[8,8,8], index: 0, kind: input, shape index: {}]   ;;  %s5920_s1 = inlined_call_operand.hbm [shape: f32[8,8,128], index: 1, kind: input, shape index: {}]   ;;  %s5921_s2 = inlined_call_operand.hbm [shape: f32[8,3,128,128], index: 2, kind: input, shape index: {}]   ;;  %s5922_s3 = inlined_call_operand.hbm [shape: f32[8,128,128], index: 3, kind: input, shape index: {}]   ;;  %s5923_s4 = inlined_call_operand.hbm [shape: f32[8,4,1,128], index: 4, kind: input, shape index: {}]   ;;  %s5924_s5 = inlined_call_operand.hbm [shape: f32[8,1,128], index: 5, kind: input, shape index: {}]   ;;  %s5925_s6 = inlined_call_operand.hbm [shape: f32[2,128], index: 6, kind: input, shape index: {}]   ;;  %s5926_s7 = inlined_call_operand.hbm [shape: f32[8,8,128], index: 7, kind: output, shape index: {}]  }
   0x1   :  { %5941 = sst [smem:[#allocation27_spill]] %s5920_s1 }
   0x2   :  { %5942 = sst [smem:[#allocation28_spill]] %s5922_s3 }
   0x3   :  { %5943 = sst [smem:[#allocation29_spill]] %s5925_s6 }
   0x4   :  { %5944 = sst [smem:[#allocation30_spill]] %s5926_s7 }
   0x5   :  { %12 = vsyncpa [#allocation3], 0 }
   0x6   :  { %14 = vsyncpa [#allocation3 + $0x1], 0 }
   0x7   :  { %15 = vsyncpa [#allocation6], 0 }
   0x8   :  { %17 = vsyncpa [#allocation6 + $0x1], 0 }
   0x9   :  { %18 = vsyncpa [#allocation9], 0 }
   0xa   :  { %20 = vsyncpa [#allocation9 + $0x1], 0 }
   0xb   :  { %21 = vsyncpa [#allocation12], 0 }
   0xc   :  { %23 = vsyncpa [#allocation12 + $0x1], 0 }
   0xd   :  { %24 = vsyncpa [#allocation4], 0 }
   0xe   :  { %26 = vsyncpa [#allocation4 + $0x1], 0  ;;  %s4967_s24 = smov 0   ;;  %s4969_s25 = smov 0  }
   0xf   :  { %s4971_s26 = smov 0   ;;  %s4973_s27 = smov 0  }
  0x10   :  { %s4975_s28 = smov 0   ;;  %s4977_s29 = smov 0  }
  0x11 LB: > { %5945 = sst [smem:[#allocation21_spill]] %s4888_s24  ;;  %s4998_s30 = sadd.s32 4294967295, %s4908_s29   ;;  %s4908_s29 = sphi %s4977_s29, %s32_s29   ;;  %s4904_s28 = sphi %s4975_s28, %s5985_s28   ;;  %s4900_s27 = sphi %s4973_s27, %s5984_s27   ;;  %s4896_s26 = sphi %s4971_s26, %s5980_s26   ;;  %s4892_s25 = sphi %s4969_s25, %s5983_s25   ;;  %s4888_s24 = sphi %s4967_s24, %s5982_s24  }
  0x12   : > { %5946 = sst [smem:[#allocation22_spill]] %s4896_s26  ;;  %s2852_s8 = sadd.s32 4294967294, %s4908_s29  }
  0x13   : > { %5947 = sst [smem:[#allocation23_spill]] %s4908_s29  ;;  %s44_s9 = sadd.s32 1, %s4904_s28 }
  0x14   : > { %s53_s10 = sadd.s32 1, %s4896_s26  ;;  %p46_p0 = scmp.ge.s32.totalorder %s44_s9, 2 }
  0x15   : > { %p60_p1 = scmp.ne.s32.totalorder %s4896_s26, %s4892_s25  ;;  %p61_p2 = scmp.eq.s32.totalorder %s4908_s29, 0 }
  0x16   : > { %p66_p3 = scmp.ne.s32.totalorder %s4892_s25, %s4888_s24  ;;  %s5987_s9 = smov (%p46_p0, %s44_s9), 0 }
  0x17   : > { %5948 = sst [smem:[#allocation24_spill]] %s5987_s9  ;;  %p5010_p4 = por %p61_p2, %p60_p1 }
  0x18   : > { %p5929_p5 = scmp.eq.s32.totalorder %s4998_s30, 0  ;;  %s48_s12 = ssub.s32 %s4904_s28, %s5987_s9 }
  0x19   : > { %p243_p6 = scmp.eq.s32.totalorder %s4998_s30, 1  ;;  %p51_p7 = scmp.eq.s32.totalorder %s48_s12, 0 }
  0x1a   : > { %p5020_p8 = por %p5929_p5, %p66_p3  ;;  %p249_p10 = scmp.eq.s32.totalorder %s2852_s8, 1 }
  0x1b   : > { %p5024_p9 = por %p243_p6, %p60_p1  ;;  %p2853_p12 = scmp.ge.s32.totalorder %s4908_s29, 1 }
  0x1c   : > { %s5950_s13 = scalar_select %p5020_p8, 1, 0 }
  0x1d   : > { %s5951_s14 = scalar_select %p5024_p9, 1, 0 }
  0x1e   : > { %s5029_s15 = scalar_select %p51_p7, %s4896_s26, %s53_s10  }
  0x1f   : > { %p5031_p11 = por %p249_p10, %p66_p3  ;;  %p256_p13 = scmp.lt.s32.totalorder %s4908_s29, 3 }
  0x20   : > { %5952 = sst [smem:[#allocation25_spill]] %s5029_s15  ;;  %s4910_s18 = smov [#allocation13]  }
  0x21   : > { %s5953_s16 = scalar_select %p5031_p11, 1, 0 }
  0x22   : > { %p5038_p2 = pnand %p2853_p12, %p256_p13  ;;  %s269_s19 = sshll.u32 %s4910_s18, 4  ;;  %s270_s19 = int_to_ptr.vmem [resolvable:$true] %s269_s19 }
  0x23   : > { %5954 = sst [smem:[#allocation26_spill]] %s5953_s16  ;;  %p4467_p1 = scmp.lt.s32.totalorder %s4908_s29, 2 }
  0x24   : > { %s5955_s17 = scalar_select %p5038_p2, 1, 0 }
  0x25   : > { %p4439_p6 = pneg %p5038_p2  ;;  %s5046_s20 = sand.u32 1, %s4896_s26  }
  0x26   : > { %p5050_p3 = pnand %p4467_p1, %p5010_p4  ;;  %s5934_s8 = sshll.u32 %s4904_s28, 9 }
  0x27   : > { %p5057_p7 = pnand %p4439_p6, %p5929_p5  ;;  %s5958_s6 = sld [smem:[#allocation29_spill]] }
  0x28   : > { %s5956_s21 = scalar_select %p5050_p3, 1, 0 }
  0x29   : > { %p4604_p4 = pneg %p5057_p7 }
  0x2d   : > { %s4602_s18 = scalar_lea.hbm %s5958_s6, 32 }
  0x2e   : > { %p4603_p10 = scmp.ne.s32.totalorder %s5958_s6, %s4602_s18  ;;  %p4609_p1 = scmp.lt.u32.totalorder %s4602_s18, %s5958_s6 }
  0x30   : > { %p4605_p12 = pnand %p4604_p4, %p4603_p10 }
  0x32   : > { %p4606_p13 = pneg %p4605_p12 }
  0x34   : > { %p4611_p6 = pnand %p4609_p1, %p4606_p13 }
  0x36   : > { %4614 = shalt.err (!%p4611_p6)
}
  0x37   : > { %s4615_s26 = scalar_lea.vmem %s270_s19, 32  ;;  %p4623_p9 = scmp.lt.s32.totalorder %s270_s19, %s270_s19 }
  0x38   : > { %p4616_p0 = scmp.ne.s32.totalorder %s270_s19, %s4615_s26  ;;  %p4624_p8 = scmp.lt.s32.totalorder %s4615_s26, %s4615_s26 }
  0x3a   : > { %p4618_p5 = pnand %p4616_p0, %p4604_p4  ;;  %p4625_p2 = por %p4624_p8, %p4623_p9 }
  0x3c   : > { %p4619_p11 = pneg %p4618_p5 }
  0x3e   : > { %p4626_p3 = pnand %p4625_p2, %p4619_p11 }
  0x40   : > { %4629 = shalt.err (!%p4626_p3)
}
  0x41   : > { %4442 = dma.hbm_to_vmem [thread:$0]  (!%p5057_p7), %s5958_s6, 32, %s270_s19, [#allocation12]  }
  0x42   : > { %s5079_s22 = sand.u32 1, %s4908_s29   ;;  %s5959_s1 = sld [smem:[#allocation27_spill]] }
  0x43   : > { %s5960_s18 = sshll.u32 %s5046_s20, 5  ;;  %s5939_s19 = scalar_lea.sflag [#allocation6], %s5079_s22 }
  0x44   : > { %s306_s23 = scalar_lea.vmem [#allocation5], %s5960_s18  ;;  %p5961_p8 = scmp.ne.s32.totalorder %s5956_s21, 0 }
  0x45   : > { %s313_s11 = sshll.u32 %s306_s23, 4  ;;  %s5090_s11 = int_to_ptr.vmem [resolvable:$true] %s313_s11 }
  0x46   : > { %p5098_p9 = pneg %p5961_p8 }
  0x48   : > { %s5086_s26 = scalar_lea.hbm %s5959_s1, %s5934_s8  ;;  %s4635_s18 = scalar_lea.hbm %s5959_s1, 1024 }
  0x49   : > { %s4630_s15 = scalar_lea.hbm %s5086_s26, 512  ;;  %p4636_p2 = scmp.lt.u32.totalorder %s5086_s26, %s5959_s1 }
  0x4a   : > { %p4631_p5 = scmp.ne.s32.totalorder %s5086_s26, %s4630_s15  ;;  %p4637_p3 = scmp.lt.u32.totalorder %s4635_s18, %s4630_s15 }
  0x4b   : > { %p4639_p10 = scmp.lt.u32.totalorder %s4630_s15, %s5086_s26 }
  0x4c   : > { %p4633_p11 = pnand %p5098_p9, %p4631_p5  ;;  %p4638_p7 = por %p4637_p3, %p4636_p2 }
  0x4e   : > { %p4634_p0 = pneg %p4633_p11  ;;  %p4640_p4 = por %p4639_p10, %p4638_p7 }
  0x50   : > { %p4641_p12 = pnand %p4640_p4, %p4634_p0 }
  0x52   : > { %4644 = shalt.err (!%p4641_p12)
}
  0x53   : > { %s4645_s9 = scalar_lea.vmem %s5090_s11, 512  ;;  %s4911_s10 = smov [#allocation5]  }
  0x54   : > { %p4646_p13 = scmp.ne.s32.totalorder %s5090_s11, %s4645_s9  ;;  %s4650_s12 = sshll.u32 %s4911_s10, 4  ;;  %s4651_s12 = int_to_ptr.vmem [resolvable:$false] %s4650_s12 }
  0x55   : > { %s4652_s8 = scalar_lea.vmem %s4651_s12, 1024  ;;  %p4653_p5 = scmp.lt.s32.totalorder %s5090_s11, %s4651_s12 }
  0x56   : > { %p4648_p1 = pnand %p4646_p13, %p5098_p9  ;;  %p4654_p11 = scmp.lt.s32.totalorder %s4652_s8, %s4645_s9 }
  0x58   : > { %p4649_p6 = pneg %p4648_p1  ;;  %p4655_p2 = por %p4654_p11, %p4653_p5 }
  0x5a   : > { %p4656_p3 = pnand %p4655_p2, %p4649_p6 }
  0x5c   : > { %4659 = shalt.err (!%p4656_p3)
}
  0x5d   : > { %s4912_s15 = smov 128   ;;  %s4913_s18 = smov 8  }
  0x5e   : > { %4449 = dma.hbm_to_vmem [thread:$0]  (!%p5961_p8), %s5086_s26, 512, %s5090_s11, %s5939_s19, %s4912_s15, %s4912_s15, %s4913_s18  }
  0x5f   : > { %s3169_s9 = sshll.u32 %s4904_s28, 13  ;;  %s5963_s3 = sld [smem:[#allocation28_spill]] }
  0x60   : > { %s5964_s8 = sshll.u32 %s5046_s20, 9  ;;  %s346_s16 = scalar_lea.sflag [#allocation9], %s5079_s22 }
  0x61   : > { %s349_s1 = scalar_lea.vmem [#allocation8], %s5964_s8 }
  0x62   : > { %s357_s29 = sshll.u32 %s349_s1, 4  ;;  %s5134_s29 = int_to_ptr.vmem [resolvable:$true] %s357_s29 }
  0x65   : > { %s5130_s12 = scalar_lea.hbm %s5963_s3, %s3169_s9  ;;  %s4665_s9 = scalar_lea.hbm %s5963_s3, 16384 }
  0x66   : > { %s4660_s24 = scalar_lea.hbm %s5130_s12, 8192  ;;  %p4666_p4 = scmp.lt.u32.totalorder %s5130_s12, %s5963_s3 }
  0x67   : > { %p4661_p0 = scmp.ne.s32.totalorder %s5130_s12, %s4660_s24  ;;  %p4667_p12 = scmp.lt.u32.totalorder %s4665_s9, %s4660_s24 }
  0x68   : > { %p4669_p1 = scmp.lt.u32.totalorder %s4660_s24, %s5130_s12 }
  0x69   : > { %p4663_p7 = pnand %p4661_p0, %p5098_p9  ;;  %p4668_p13 = por %p4667_p12, %p4666_p4 }
  0x6b   : > { %p4664_p10 = pneg %p4663_p7  ;;  %p4670_p6 = por %p4669_p1, %p4668_p13 }
  0x6d   : > { %p4671_p5 = pnand %p4670_p6, %p4664_p10 }
  0x6f   : > { %4674 = shalt.err (!%p4671_p5)
}
  0x70   : > { %s4675_s1 = scalar_lea.vmem %s5134_s29, 8192  ;;  %s4914_s8 = smov [#allocation8]  }
  0x71   : > { %p4676_p11 = scmp.ne.s32.totalorder %s5134_s29, %s4675_s1  ;;  %s4680_s26 = sshll.u32 %s4914_s8, 4  ;;  %s4681_s26 = int_to_ptr.vmem [resolvable:$false] %s4680_s26 }
  0x72   : > { %s4682_s11 = scalar_lea.vmem %s4681_s26, 16384  ;;  %p4683_p0 = scmp.lt.s32.totalorder %s5134_s29, %s4681_s26 }
  0x73   : > { %p4678_p2 = pnand %p4676_p11, %p5098_p9  ;;  %p4684_p7 = scmp.lt.s32.totalorder %s4682_s11, %s4675_s1 }
  0x75   : > { %p4679_p3 = pneg %p4678_p2  ;;  %p4685_p4 = por %p4684_p7, %p4683_p0 }
  0x77   : > { %p4686_p12 = pnand %p4685_p4, %p4679_p3 }
  0x79   : > { %4689 = shalt.err (!%p4686_p12)
}
  0x7a   : > { %4455 = dma.hbm_to_vmem [thread:$0]  (!%p5961_p8), %s5130_s12, 8192, %s5134_s29, %s346_s16, %s4912_s15, %s4912_s15, %s4913_s18  }
  0x7b   : > { %s5965_s24 = sshll.u32 %s4904_s28, 9  ;;  %s5966_s1 = sshll.u32 %s5046_s20, 5 }
  0x7c   : > { %s5168_s10 = scalar_lea.hbm %s5919_s0, %s5965_s24  ;;  %s284_s8 = scalar_lea.vmem [#allocation2], %s5966_s1 }
  0x7d   : > { %s292_s26 = sshll.u32 %s284_s8, 4  ;;  %s4418_s11 = smul.u32 1536, %s5046_s20  ;;  %s5173_s26 = int_to_ptr.vmem [resolvable:$true] %s292_s26 }
  0x7e   : > { %s4419_s19 = smul.u32 24576, %s4904_s28  ;;  %s281_s3 = scalar_lea.sflag [#allocation3], %s5046_s20 }
  0x7f   : > { %s4690_s7 = scalar_lea.hbm %s5168_s10, 512  ;;  %s4695_s24 = scalar_lea.hbm %s5919_s0, 1024 }
  0x80   : > { %p4691_p10 = scmp.ne.s32.totalorder %s5168_s10, %s4690_s7  ;;  %p4696_p6 = scmp.lt.u32.totalorder %s5168_s10, %s5919_s0 }
  0x81   : > { %p4697_p5 = scmp.lt.u32.totalorder %s4695_s24, %s4690_s7  ;;  %p4699_p2 = scmp.lt.u32.totalorder %s4690_s7, %s5168_s10 }
  0x82   : > { %p4693_p13 = pnand %p4691_p10, %p5098_p9 }
  0x83   : > { %p4698_p11 = por %p4697_p5, %p4696_p6 }
  0x84   : > { %p4694_p1 = pneg %p4693_p13 }
  0x85   : > { %p4700_p3 = por %p4699_p2, %p4698_p11 }
  0x87   : > { %p4701_p0 = pnand %p4700_p3, %p4694_p1 }
  0x89   : > { %4704 = shalt.err (!%p4701_p0)
}
  0x8a   : > { %s4705_s1 = scalar_lea.vmem %s5173_s26, 512  ;;  %s4915_s8 = smov [#allocation2]  }
  0x8b   : > { %p4706_p7 = scmp.ne.s32.totalorder %s5173_s26, %s4705_s1  ;;  %s4710_s29 = sshll.u32 %s4915_s8, 4  ;;  %s4711_s29 = int_to_ptr.vmem [resolvable:$false] %s4710_s29 }
  0x8c   : > { %s4712_s12 = scalar_lea.vmem %s4711_s29, 1024  ;;  %p4713_p10 = scmp.lt.s32.totalorder %s5173_s26, %s4711_s29 }
  0x8d   : > { %p4708_p4 = pnand %p4706_p7, %p5098_p9  ;;  %p4714_p13 = scmp.lt.s32.totalorder %s4712_s12, %s4705_s1 }
  0x8f   : > { %p4709_p12 = pneg %p4708_p4  ;;  %p4715_p6 = por %p4714_p13, %p4713_p10 }
  0x91   : > { %p4716_p5 = pnand %p4715_p6, %p4709_p12 }
  0x93   : > { %4719 = shalt.err (!%p4716_p5)
}
  0x94   : > { %4446 = dma.hbm_to_vmem [thread:$0]  (!%p5961_p8), %s5168_s10, 512, %s5173_s26, %s281_s3, %s4912_s15, %s4912_s15, %s4913_s18  }
  0x95   : > { %s5208_s9 = scalar_lea.hbm %s5921_s2, %s4419_s19  ;;  %s327_s23 = scalar_lea.vmem [#allocation7], %s4418_s11 }
  0x96   : > { %s335_s1 = sshll.u32 %s327_s23, 4  ;;  %s2869_s8 = sshll.u32 %s5046_s20, 4  ;;  %s5213_s1 = int_to_ptr.vmem [resolvable:$true] %s335_s1 }
  0x97   : > { %s4720_s29 = scalar_lea.hbm %s5208_s9, 24576  ;;  %s4725_s19 = scalar_lea.hbm %s5921_s2, 49152 }
  0x98   : > { %p4721_p1 = scmp.ne.s32.totalorder %s5208_s9, %s4720_s29  ;;  %p4726_p3 = scmp.lt.u32.totalorder %s5208_s9, %s5921_s2 }
  0x99   : > { %p4727_p0 = scmp.lt.u32.totalorder %s4725_s19, %s4720_s29  ;;  %p4729_p4 = scmp.lt.u32.totalorder %s4720_s29, %s5208_s9 }
  0x9a   : > { %p4723_p11 = pnand %p4721_p1, %p5098_p9 }
  0x9b   : > { %p4728_p7 = por %p4727_p0, %p4726_p3 }
  0x9c   : > { %p4724_p2 = pneg %p4723_p11 }
  0x9d   : > { %p4730_p12 = por %p4729_p4, %p4728_p7 }
  0x9f   : > { %p4731_p10 = pnand %p4730_p12, %p4724_p2 }
  0xa1   : > { %4734 = shalt.err (!%p4731_p10)
}
  0xa2   : > { %s4735_s11 = scalar_lea.vmem %s5213_s1, 24576  ;;  %s4916_s7 = smov [#allocation7]  }
  0xa3   : > { %p4736_p13 = scmp.ne.s32.totalorder %s5213_s1, %s4735_s11  ;;  %s4740_s24 = sshll.u32 %s4916_s7, 4  ;;  %s4741_s24 = int_to_ptr.vmem [resolvable:$false] %s4740_s24 }
  0xa4   : > { %s4742_s23 = scalar_lea.vmem %s4741_s24, 49152  ;;  %p4743_p1 = scmp.lt.s32.totalorder %s5213_s1, %s4741_s24 }
  0xa5   : > { %p4738_p6 = pnand %p4736_p13, %p5098_p9  ;;  %p4744_p11 = scmp.lt.s32.totalorder %s4742_s23, %s4735_s11 }
  0xa7   : > { %p4739_p5 = pneg %p4738_p6  ;;  %p4745_p3 = por %p4744_p11, %p4743_p1 }
  0xa9   : > { %p4746_p0 = pnand %p4745_p3, %p4739_p5 }
  0xab   : > { %4749 = shalt.err (!%p4746_p0)
}
  0xac   : > { %s5967_s29 = scalar_lea.sflag [#allocation6], %s5079_s22  ;;  %s3171_s3 = sshll.u32 %s4904_s28, 8 }
  0xad   : > { %4452 = dma.hbm_to_vmem [thread:$0]  (!%p5961_p8), %s5208_s9, 24576, %s5213_s1, %s5967_s29, %s4912_s15, %s4912_s15, %s4913_s18  }
  0xae   : > { %s371_s10 = scalar_lea.vmem [#allocation10], %s2869_s8  ;;  %s5247_s11 = scalar_lea.hbm %s5923_s4, %s3171_s3 }
  0xaf   : > { %s379_s19 = sshll.u32 %s371_s10, 4  ;;  %s4750_s7 = scalar_lea.hbm %s5247_s11, 256  ;;  %s5249_s19 = int_to_ptr.vmem [resolvable:$true] %s379_s19 }
  0xb0   : > { %p4751_p2 = scmp.ne.s32.totalorder %s5247_s11, %s4750_s7  ;;  %s4755_s9 = scalar_lea.hbm %s5923_s4, 512 }
  0xb1   : > { %p4756_p12 = scmp.lt.u32.totalorder %s5247_s11, %s5923_s4  ;;  %p4757_p10 = scmp.lt.u32.totalorder %s4755_s9, %s4750_s7 }
  0xb2   : > { %p4753_p7 = pnand %p4751_p2, %p5098_p9  ;;  %p4759_p6 = scmp.lt.u32.totalorder %s4750_s7, %s5247_s11 }
  0xb3   : > { %p4758_p13 = por %p4757_p10, %p4756_p12 }
  0xb4   : > { %p4754_p4 = pneg %p4753_p7 }
  0xb5   : > { %p4760_p5 = por %p4759_p6, %p4758_p13 }
  0xb7   : > { %p4761_p1 = pnand %p4760_p5, %p4754_p4 }
  0xb9   : > { %4764 = shalt.err (!%p4761_p1)
}
  0xba   : > { %s4765_s24 = scalar_lea.vmem %s5249_s19, 256  ;;  %s4917_s23 = smov [#allocation10]  }
  0xbb   : > { %p4766_p11 = scmp.ne.s32.totalorder %s5249_s19, %s4765_s24  ;;  %s4770_s29 = sshll.u32 %s4917_s23, 4  ;;  %s4771_s29 = int_to_ptr.vmem [resolvable:$false] %s4770_s29 }
  0xbc   : > { %s4772_s3 = scalar_lea.vmem %s4771_s29, 512  ;;  %p4773_p2 = scmp.lt.s32.totalorder %s5249_s19, %s4771_s29 }
  0xbd   : > { %p4768_p3 = pnand %p4766_p11, %p5098_p9  ;;  %p4774_p7 = scmp.lt.s32.totalorder %s4772_s3, %s4765_s24 }
  0xbf   : > { %p4769_p0 = pneg %p4768_p3  ;;  %p4775_p12 = por %p4774_p7, %p4773_p2 }
  0xc1   : > { %p4776_p10 = pnand %p4775_p12, %p4769_p0 }
  0xc3   : > { %4779 = shalt.err (!%p4776_p10)
}
  0xc4   : > { %s4918_s10 = smov 16   ;;  %s4919_s26 = smov 1  }
  0xc5   : > { %4458 = dma.hbm_to_vmem [thread:$0]  (!%p5961_p8), %s5247_s11, 256, %s5249_s19, %s346_s16, %s4918_s10, %s4918_s10, %s4919_s26  }
  0xc6   : > { %s2873_s12 = sshll.u32 %s5046_s20, 2  ;;  %s3172_s7 = sshll.u32 %s4904_s28, 6 }
  0xc7   : > { %s5282_s9 = scalar_lea.hbm %s5924_s5, %s3172_s7  ;;  %s393_s1 = scalar_lea.vmem [#allocation11], %s2873_s12 }
  0xc8   : > { %s400_s8 = sshll.u32 %s393_s1, 4  ;;  %s390_s24 = scalar_lea.sflag [#allocation12], %s5079_s22  ;;  %s5284_s8 = int_to_ptr.vmem [resolvable:$true] %s400_s8 }
  0xc9   : > { %s4780_s23 = scalar_lea.hbm %s5282_s9, 64  ;;  %s4785_s19 = scalar_lea.hbm %s5924_s5, 128 }
  0xca   : > { %p4781_p4 = scmp.ne.s32.totalorder %s5282_s9, %s4780_s23  ;;  %p4786_p5 = scmp.lt.u32.totalorder %s5282_s9, %s5924_s5 }
  0xcb   : > { %p4787_p1 = scmp.lt.u32.totalorder %s4785_s19, %s4780_s23  ;;  %p4789_p3 = scmp.lt.u32.totalorder %s4780_s23, %s5282_s9 }
  0xcc   : > { %p4783_p13 = pnand %p4781_p4, %p5098_p9 }
  0xcd   : > { %p4788_p11 = por %p4787_p1, %p4786_p5 }
  0xce   : > { %p4784_p6 = pneg %p4783_p13 }
  0xcf   : > { %p4790_p0 = por %p4789_p3, %p4788_p11 }
  0xd1   : > { %p4791_p2 = pnand %p4790_p0, %p4784_p6 }
  0xd3   : > { %4794 = shalt.err (!%p4791_p2)
}
  0xd4   : > { %s4795_s3 = scalar_lea.vmem %s5284_s8, 64  ;;  %s4920_s12 = smov [#allocation11]  }
  0xd5   : > { %p4796_p7 = scmp.ne.s32.totalorder %s5284_s8, %s4795_s3  ;;  %s4800_s7 = sshll.u32 %s4920_s12, 4  ;;  %s4801_s7 = int_to_ptr.vmem [resolvable:$false] %s4800_s7 }
  0xd6   : > { %s4802_s15 = scalar_lea.vmem %s4801_s7, 128  ;;  %p4803_p4 = scmp.lt.s32.totalorder %s5284_s8, %s4801_s7 }
  0xd7   : > { %p4798_p12 = pnand %p4796_p7, %p5098_p9  ;;  %p4804_p13 = scmp.lt.s32.totalorder %s4802_s15, %s4795_s3 }
  0xd9   : > { %p4799_p10 = pneg %p4798_p12  ;;  %p4805_p5 = por %p4804_p13, %p4803_p4 }
  0xdb   : > { %p4806_p1 = pnand %p4805_p5, %p4799_p10 }
  0xdd   : > { %4809 = shalt.err (!%p4806_p1)
}
  0xde   : > { %4461 = dma.hbm_to_vmem [thread:$0]  (!%p5961_p8), %s5282_s9, 64, %s5284_s8, %s390_s24, %s4918_s10, %s4918_s10, %s4919_s26  }
  0xdf   : > { %p5968_p9 = scmp.ne.s32.totalorder %s5955_s17, 0 }
  0xe0   : > { %s5316_s6 = sand.u32 (!%p5968_p9), 1, %s4892_s25   ;;  %p5969_p6 = scmp.ne.s32.totalorder (!%p5968_p9), %s5950_s13, 0 }
  0xe1   : > { %412 = sbr.rel (%p5968_p9) target bundleno = 3697 (0xe71), region = 48  ;;  %s5319_s18 = sshll.u32 (!%p5968_p9), %s5316_s6, 5 }
  0xe2   : > { %s415_s21 = scalar_lea.sflag (!%p5968_p9), [#allocation3], %s5316_s6  ;;  %s5323_s1 = scalar_lea.vmem (!%p5968_p9), [#allocation2], %s5319_s18 }
  0xe8   : > { %4863 = dma.done.wait (%p5969_p6), %s415_s21, 512  }
  0xe9   : > { %4865 = vsyncadd (%p5969_p6), %s415_s21, 4294966784  ;;  %s423_s17 = sand.u32 1, %s4998_s30   ;;  %s5331_s10 = scalar_lea.vmem [#allocation5], %s5319_s18 }
  0xea   : > { %s424_s22 = scalar_lea.sflag [#allocation6], %s423_s17 }
  0xeb   : > { %4867 = dma.done.wait (%p5969_p6), %s424_s22, 25088  }
  0xec   : > { %4869 = vsyncadd (%p5969_p6), %s424_s22, 4294942208  ;;  %s4420_s26 = smul.u32 1536, %s5316_s6  ;;  %s2879_s9 = sshll.u32 %s5316_s6, 9 }
  0xed   : > { %s442_s24 = scalar_lea.sflag [#allocation9], %s423_s17  ;;  %s5341_s23 = scalar_lea.vmem [#allocation8], %s2879_s9 }
  0xee   : > { %s5339_s8 = scalar_lea.vmem [#allocation7], %s4420_s26 }
  0xef   : > { %4871 = dma.done.wait (%p5969_p6), %s442_s24, 8448  }
  0xf0   : > { %4873 = vsyncadd (%p5969_p6), %s442_s24, 4294958848  ;;  %s2880_s16 = sshll.u32 %s5316_s6, 4  ;;  %s2881_s20 = sshll.u32 %s5316_s6, 2 }
  0xf1   : > { %s5349_s19 = scalar_lea.vmem [#allocation10], %s2880_s16  ;;  %s460_s11 = scalar_lea.sflag [#allocation12], %s423_s17 }
  0xf2   : > { %s5351_s29 = scalar_lea.vmem [#allocation11], %s2881_s20 }
  0xf3   : > { %4875 = dma.done.wait (%p5969_p6), %s460_s11, 64  }
  0xf4   : > { %4877 = vsyncadd (%p5969_p6), %s460_s11, 4294967232  ;;  %p5970_p8 = scmp.eq.s32.totalorder %s4998_s30, 0 }
  0xf6   : > { %4879 = dma.done.wait (%p5970_p8), [#allocation12], 32   ;;  %p5971_p11 = pmov %p5970_p8 }
  0xf7   : > { %v4921_v0 = vmov 0.0   ;;  %vm4922_vm0 = vmmov 0   ;;  %v4923_v1 = vmov 0.0|0.0   ;;  %vm552_vm1 = vcmask 64512   ;;  %v544_v2 = vld [vmem:[%s5331_s10] sm:$0xff]  ;;  %v632_v5 = vld [vmem:[%s5339_s8 + $0x8] sm:$0xff] }
  0xf8   : > { %4881 = vsyncadd (%p5971_p11), [#allocation12], 4294967264  ;;  %3454 = vmatprep.subr.mxu0 %v4921_v0  ;;  %3456 = vmatprep.mubr.msk.f32.mxu0 %vm4922_vm0, %v4921_v0  ;;  %v543_v3 = vld [vmem:[%s5323_s1] sm:$0xff]  ;;  %v633_v6 = vld [vmem:[%s5339_s8 + $0x10] sm:$0xff]  ;;  %s5565_s30 = scalar_lea.vmem [#allocation14], %s5319_s18  ;;  %s3173_s3 = sshll.u32 %s4900_s27, 9 }
  0xf9   : > { %4034 = vmatprep.subr.bf16.mxu1 %v4923_v1  ;;  %3491 = vmatprep.mubr.msk.f32.mxu1 %vm4922_vm0, %v4921_v0  ;;  %v631_v4 = vld [vmem:[%s5339_s8] sm:$0xff]  ;;  %v634_v7 = vld [vmem:[%s5339_s8 + $0x18] sm:$0xff]  ;;  %v636_v11 = vld [vmem:[%s5339_s8 + $0x28] sm:$0xff]  ;;  %s2648_s13 = sshll.u32 %s5565_s30, 4  ;;  %s5972_s15 = sld [smem:[#allocation30_spill]]  ;;  %s5862_s13 = int_to_ptr.vmem [resolvable:$true] %s2648_s13 }
  0xfa   : > { %3455 = vmatpush3.msra.mxu0 %v544_v2  ;;  %v4035_v8 = vpack.c.bf16 %v632_v5, %v631_v4  ;;  %v4038_v9 = vpack.c.bf16 %v634_v7, %v633_v6  ;;  %v635_v10 = vld [vmem:[%s5339_s8 + $0x20] sm:$0xff]  ;;  %v637_v13 = vld [vmem:[%s5339_s8 + $0x30] sm:$0xff]  ;;  %v638_v14 = vld [vmem:[%s5339_s8 + $0x38] sm:$0xff]  ;;  %s2634_s21 = scalar_lea.sflag [#allocation4], %s5316_s6  ;;  %p5973_p0 = scmp.ne.s32.totalorder %s5951_s14, 0 }
  0xfb   : > { %3457 = vmatmul.mubr.msk.f32.vlgmr.msra.gmra.mrb[0].mxu0 %vm552_vm1, %v543_v3  ;;  %4058 = vmatprep.subr.bf16.mxu0 %v4923_v1  ;;  %v4041_v12 = vpack.c.bf16 %v636_v11, %v635_v10  ;;  %v4044_v15 = vpack.c.bf16 %v638_v14, %v637_v13  ;;  %v639_v16 = vld [vmem:[%s5339_s8 + $0x40] sm:$0xff]  ;;  %v640_v17 = vld [vmem:[%s5339_s8 + $0x48] sm:$0xff]  ;;  %v641_v19 = vld [vmem:[%s5339_s8 + $0x50] sm:$0xff]  ;;  %s4924_s27 = smov [#allocation14]  }
  0xfc   : > { %3526 = vmatprep.mubr.msk.f32.mxu0 %vm4922_vm0, %v4921_v0  ;;  %4036 = vmatpush3.bf16.msra.mxu1 %v4035_v8  ;;  %v4047_v18 = vpack.c.bf16 %v640_v17, %v639_v16  ;;  %v642_v20 = vld [vmem:[%s5339_s8 + $0x58] sm:$0xff]  ;;  %v643_v22 = vld [vmem:[%s5339_s8 + $0x60] sm:$0xff]  ;;  %v644_v23 = vld [vmem:[%s5339_s8 + $0x68] sm:$0xff]  ;;  %s4814_s17 = sshll.u32 %s4924_s27, 4  ;;  %s4815_s17 = int_to_ptr.vmem [resolvable:$false] %s4814_s17 }
  0xfd   : > { %4037 = vmatprep.subr.bf16.mxu1 %v4923_v1  ;;  %v4050_v21 = vpack.c.bf16 %v642_v20, %v641_v19  ;;  %v4053_v24 = vpack.c.bf16 %v644_v23, %v643_v22  ;;  %v645_v25 = vld [vmem:[%s5339_s8 + $0x70] sm:$0xff]  ;;  %v646_v26 = vld [vmem:[%s5339_s8 + $0x78] sm:$0xff]  ;;  %v2890_v28 = vld [vmem:[%s5339_s8 + $0x80] sm:$0xff]  ;;  %s4816_s22 = scalar_lea.vmem %s4815_s17, 1024  ;;  %p4817_p12 = scmp.lt.s32.totalorder %s5862_s13, %s4815_s17 }
  0xfe   : > { %v4056_v27 = vpack.c.bf16 %v646_v26, %v645_v25  ;;  %v2891_v29 = vld [vmem:[%s5339_s8 + $0x88] sm:$0xff]  ;;  %v2892_v30 = vld [vmem:[%s5339_s8 + $0x90] sm:$0xff]  ;;  %v2893_v32 = vld [vmem:[%s5339_s8 + $0x98] sm:$0xff] }
  0xff   : > { %v4059_v31 = vpack.c.bf16 %v2891_v29, %v2890_v28  ;;  %v4062_v33 = vpack.c.bf16 %v2893_v32, %v2892_v30  ;;  %v2894_v34 = vld [vmem:[%s5339_s8 + $0xa0] sm:$0xff]  ;;  %v2895_v35 = vld [vmem:[%s5339_s8 + $0xa8] sm:$0xff]  ;;  %v2896_v46 = vld [vmem:[%s5339_s8 + $0xb0] sm:$0xff]  ;;  %s5867_s18 = scalar_lea.hbm %s5972_s15, %s3173_s3 }
 0x100   : > { %4039 = vmatpush3.bf16.msra.mxu1 %v4038_v9  ;;  %v4065_v36 = vpack.c.bf16 %v2895_v35, %v2894_v34  ;;  %v2886_v37 = vld [vmem:[%s5349_s19] ss:$0 sm:$0xff]  ;;  %v2897_v47 = vld [vmem:[%s5339_s8 + $0xb8] sm:$0xff]  ;;  %v2899_v50 = vld [vmem:[%s5339_s8 + $0xc8] sm:$0xff] }
 0x101   : > { %4040 = vmatprep.subr.bf16.mxu1 %v4923_v1  ;;  %4060 = vmatpush3.bf16.msra.mxu0 %v4059_v31  ;;  %v4068_v48 = vpack.c.bf16 %v2897_v47, %v2896_v46  ;;  %v2898_v49 = vld [vmem:[%s5339_s8 + $0xc0] sm:$0xff]  ;;  %v2900_v52 = vld [vmem:[%s5339_s8 + $0xd0] sm:$0xff]  ;;  %v2901_v53 = vld [vmem:[%s5339_s8 + $0xd8] sm:$0xff] }
 0x102   : > { %4061 = vmatprep.subr.bf16.mxu0 %v4923_v1  ;;  %v4071_v51 = vpack.c.bf16 %v2899_v50, %v2898_v49  ;;  %v4074_v54 = vpack.c.bf16 %v2901_v53, %v2900_v52  ;;  %v2902_v55 = vld [vmem:[%s5339_s8 + $0xe0] sm:$0xff]  ;;  %v2903_v56 = vld [vmem:[%s5339_s8 + $0xe8] sm:$0xff]  ;;  %v2904_v58 = vld [vmem:[%s5339_s8 + $0xf0] sm:$0xff] }
 0x103   : > { %v4077_v57 = vpack.c.bf16 %v2903_v56, %v2902_v55  ;;  %v2905_v59 = vld [vmem:[%s5339_s8 + $0xf8] sm:$0xff]  ;;  %v2908_v61 = vld [vmem:[%s5339_s8 + $0x100] sm:$0xff]  ;;  %v2909_v62 = vld [vmem:[%s5339_s8 + $0x108] sm:$0xff] }
 0x104   : > { %4042 = vmatpush3.bf16.msra.mxu1 %v4041_v12  ;;  %v4080_v60 = vpack.c.bf16 %v2905_v59, %v2904_v58  ;;  %v2910_v63 = vld [vmem:[%s5339_s8 + $0x110] sm:$0xff]  ;;  %v4083_v2 = vpack.c.bf16 %v2909_v62, %v2908_v61  ;;  %v2911_v3 = vld [vmem:[%s5339_s8 + $0x118] sm:$0xff]  ;;  %v2912_v5 = vld [vmem:[%s5339_s8 + $0x120] sm:$0xff] }
 0x105   : > { %4043 = vmatprep.subr.bf16.mxu1 %v4923_v1  ;;  %4063 = vmatpush3.bf16.msra.mxu0 %v4062_v33  ;;  %v4086_v4 = vpack.c.bf16 %v2911_v3, %v2910_v63  ;;  %v2913_v6 = vld [vmem:[%s5339_s8 + $0x128] sm:$0xff]  ;;  %v2889_v8 = vld [vmem:[%s5349_s19 + $0x1] ss:$0 sm:$0xff]  ;;  %v2923_v30 = vld [vmem:[%s5339_s8 + $0x178] sm:$0xff] }
 0x106   : > { %4064 = vmatprep.subr.bf16.mxu0 %v4923_v1  ;;  %v4089_v7 = vpack.c.bf16 %v2913_v6, %v2912_v5  ;;  %v2914_v17 = vld [vmem:[%s5339_s8 + $0x130] sm:$0xff]  ;;  %v2916_v20 = vld [vmem:[%s5339_s8 + $0x140] sm:$0xff]  ;;  %v931_v33 = vld [vmem:[%s5341_s23 + $0x8] sm:$0xff] }
 0x107   : > { %v2918_v23 = vld [vmem:[%s5339_s8 + $0x150] sm:$0xff]  ;;  %v2920_v26 = vld [vmem:[%s5339_s8 + $0x160] sm:$0xff]  ;;  %v2928_v50 = vld [vmem:[%s5331_s10 + $0x8] sm:$0xff] }
 0x108   : > { %4045 = vmatpush3.bf16.msra.mxu1 %v4044_v15  ;;  %v2922_v29 = vld [vmem:[%s5339_s8 + $0x170] sm:$0xff]  ;;  %v930_v32 = vld [vmem:[%s5341_s23] sm:$0xff]  ;;  %v937_v53 = vld [vmem:[%s5341_s23 + $0x38] sm:$0xff] }
 0x109   : > { %4046 = vmatprep.subr.bf16.mxu1 %v4923_v1  ;;  %4066 = vmatpush3.bf16.msra.mxu0 %v4065_v36  ;;  %v4104_v31 = vpack.c.bf16 %v2923_v30, %v2922_v29  ;;  %v932_v34 = vld [vmem:[%s5341_s23 + $0x10] sm:$0xff]  ;;  %v4107_v35 = vpack.c.bf16 %v931_v33, %v930_v32  ;;  %v933_v36 = vld [vmem:[%s5341_s23 + $0x18] sm:$0xff]  ;;  %v938_v55 = vld [vmem:[%s5341_s23 + $0x40] sm:$0xff] }
 0x10a   : > { %4067 = vmatprep.subr.bf16.mxu0 %v4923_v1  ;;  %v936_v52 = vld [vmem:[%s5341_s23 + $0x30] sm:$0xff]  ;;  %v939_v56 = vld [vmem:[%s5341_s23 + $0x48] sm:$0xff]  ;;  %v941_v59 = vld [vmem:[%s5341_s23 + $0x58] sm:$0xff] }
 0x10b   : > { %v940_v58 = vld [vmem:[%s5341_s23 + $0x50] sm:$0xff]  ;;  %v942_v61 = vld [vmem:[%s5341_s23 + $0x60] sm:$0xff]  ;;  %v943_v62 = vld [vmem:[%s5341_s23 + $0x68] sm:$0xff] }
 0x10c   : > { %4048 = vmatpush3.bf16.msra.mxu1 %v4047_v18  ;;  %v2915_v18 = vld [vmem:[%s5339_s8 + $0x138] sm:$0xff]  ;;  %v4125_v63 = vpack.c.bf16 %v943_v62, %v942_v61  ;;  %v2925_v5 = vld [vmem:[%s5349_s19 + $0x3] ss:$0 sm:$0xff]  ;;  %v2941_v32 = vld [vmem:[%s5339_s8 + $0x1c8] sm:$0xff] }
 0x10d   : > { %4049 = vmatprep.subr.bf16.mxu1 %v4923_v1  ;;  %4069 = vmatpush3.bf16.msra.mxu0 %v4068_v48  ;;  %v4092_v19 = vpack.c.bf16 %v2915_v18, %v2914_v17  ;;  %v945_v3 = vld [vmem:[%s5341_s23 + $0x78] sm:$0xff]  ;;  %v2960_v62 = vld [vmem:[%s5339_s8 + $0x250] sm:$0xff] }
 0x10e   : > { %4070 = vmatprep.subr.bf16.mxu0 %v4923_v1  ;;  %v2939_v29 = vld [vmem:[%s5339_s8 + $0x1b8] sm:$0xff] }
 0x110   : > { %4051 = vmatpush3.bf16.msra.mxu1 %v4050_v21  ;;  %v2917_v21 = vld [vmem:[%s5339_s8 + $0x148] sm:$0xff] }
 0x111   : > { %4052 = vmatprep.subr.bf16.mxu1 %v4923_v1  ;;  %4072 = vmatpush3.bf16.msra.mxu0 %v4071_v51  ;;  %v4095_v22 = vpack.c.bf16 %v2917_v21, %v2916_v20  ;;  %v2927_v51 = vld [vmem:[%s5323_s1 + $0x8] sm:$0xff]  ;;  %v2934_v20 = vld [vmem:[%s5339_s8 + $0x190] sm:$0xff]  ;;  %v2935_v21 = vld [vmem:[%s5339_s8 + $0x198] sm:$0xff] }
 0x112   : > { %4073 = vmatprep.subr.bf16.mxu0 %v4923_v1 }
 0x114   : > { %4054 = vmatpush3.bf16.msra.mxu1 %v4053_v24  ;;  %v2919_v24 = vld [vmem:[%s5339_s8 + $0x158] sm:$0xff] }
 0x115   : > { %4055 = vmatprep.subr.bf16.mxu1 %v4923_v1  ;;  %4075 = vmatpush3.bf16.msra.mxu0 %v4074_v54  ;;  %v4098_v25 = vpack.c.bf16 %v2919_v24, %v2918_v23  ;;  %v4116_v54 = vpack.c.bf16 %v937_v53, %v936_v52  ;;  %v4134_v23 = vpack.c.bf16 %v2935_v21, %v2934_v20  ;;  %v2936_v24 = vld [vmem:[%s5339_s8 + $0x1a0] sm:$0xff] }
 0x116   : > { %4076 = vmatprep.subr.bf16.mxu0 %v4923_v1  ;;  %v2954_v53 = vld [vmem:[%s5339_s8 + $0x220] sm:$0xff] }
 0x118   : > { %4057 = vmatpush3.bf16.msra.mxu1 %v4056_v27  ;;  %v2921_v27 = vld [vmem:[%s5339_s8 + $0x168] sm:$0xff] }
 0x119   : > { %4082 = vmatprep.subr.bf16.mxu1 %v4923_v1  ;;  %4078 = vmatpush3.bf16.msra.mxu0 %v4077_v57  ;;  %v4101_v28 = vpack.c.bf16 %v2921_v27, %v2920_v26  ;;  %v4119_v57 = vpack.c.bf16 %v939_v56, %v938_v55  ;;  %v2956_v56 = vld [vmem:[%s5339_s8 + $0x230] sm:$0xff] }
 0x11a   : > { %4079 = vmatprep.subr.bf16.mxu0 %v4923_v1 }
 0x11d   : > { %4081 = vmatpush3.bf16.msra.mxu0 %v4080_v60  ;;  %v4122_v60 = vpack.c.bf16 %v941_v59, %v940_v58  ;;  %v2958_v59 = vld [vmem:[%s5339_s8 + $0x240] sm:$0xff] }
 0x11e   : > { %4106 = vmatprep.subr.bf16.mxu0 %v4923_v1 }
 0x1ce   : > { %v622_v38 = vpop.f32.mrb[0].mxu0 }
 0x1cf   : > { %v623_v39 = vadd.f32 %v2886_v37, %v622_v38  ;;  %v3458_v40 = vpop.f32.mrb[1].mxu0  ;;  %v4110_v37 = vpack.c.bf16 %v933_v36, %v932_v34  ;;  %v934_v38 = vld [vmem:[%s5341_s23 + $0x20] sm:$0xff]  ;;  %v2942_v34 = vld [vmem:[%s5339_s8 + $0x1d0] sm:$0xff] }
 0x1d1   : > { %v626_v41 = vmul.f32 0.5, %v623_v39 }
 0x1d3   : > { %4528 = vtanh.f32 %v626_v41  ;;  %v2907_v41 = vld [vmem:[%s5349_s19 + $0x2] ss:$0 sm:$0xff] }
 0x1dd   : > { %v4529_v42 = vpop.eup %4528 }
 0x1de   : > { %v628_v43 = vmul.f32 0.5, %v4529_v42 }
 0x1e0   : > { %v629_v44 = vadd.f32 0.5, %v628_v43 }
 0x1e2   : > { %v630_v45 = vmul.f32 %v629_v44, %v623_v39  ;;  %v935_v39 = vld [vmem:[%s5341_s23 + $0x28] sm:$0xff] }
 0x1e3   : > { %v4113_v40 = vpack.c.bf16 %v935_v39, %v934_v38  ;;  %v2945_v38 = vld [vmem:[%s5339_s8 + $0x1e8] sm:$0xff] }
 0x1e4   : > { %3492 = vmatmul.mubr.f32.vlgmr.msra.gmra.mrb[0].mxu1 %v630_v45 }
 0x1e5   : > { %3561 = vmatprep.mubr.msk.f32.mxu1 %vm4922_vm0, %v4921_v0  ;;  %4084 = vmatpush3.bf16.msra.mxu1 %v4083_v2  ;;  %v944_v2 = vld [vmem:[%s5341_s23 + $0x70] sm:$0xff] }
 0x1e6   : > { %4085 = vmatprep.subr.bf16.mxu1 %v4923_v1 }
 0x1e9   : > { %4087 = vmatpush3.bf16.msra.mxu1 %v4086_v4  ;;  %v4128_v4 = vpack.c.bf16 %v945_v3, %v944_v2  ;;  %v2962_v3 = vld [vmem:[%s5339_s8 + $0x260] sm:$0xff] }
 0x1ea   : > { %4088 = vmatprep.subr.bf16.mxu1 %v4923_v1 }
 0x1ed   : > { %4090 = vmatpush3.bf16.msra.mxu1 %v4089_v7 }
 0x1ee   : > { %4091 = vmatprep.subr.bf16.mxu1 %v4923_v1 }
 0x1f1   : > { %4093 = vmatpush3.bf16.msra.mxu1 %v4092_v19  ;;  %v2930_v19 = vld [vmem:[%s5349_s19 + $0x4] ss:$0 sm:$0xff] }
 0x1f2   : > { %4094 = vmatprep.subr.bf16.mxu1 %v4923_v1 }
 0x1f5   : > { %4096 = vmatpush3.bf16.msra.mxu1 %v4095_v22 }
 0x1f6   : > { %4097 = vmatprep.subr.bf16.mxu1 %v4923_v1 }
 0x1f9   : > { %4099 = vmatpush3.bf16.msra.mxu1 %v4098_v25  ;;  %v2937_v25 = vld [vmem:[%s5339_s8 + $0x1a8] sm:$0xff] }
 0x1fa   : > { %4100 = vmatprep.subr.bf16.mxu1 %v4923_v1  ;;  %v4137_v27 = vpack.c.bf16 %v2937_v25, %v2936_v24 }
 0x1fd   : > { %4102 = vmatpush3.bf16.msra.mxu1 %v4101_v28  ;;  %v2938_v28 = vld [vmem:[%s5339_s8 + $0x1b0] sm:$0xff] }
 0x1fe   : > { %4103 = vmatprep.subr.bf16.mxu1 %v4923_v1  ;;  %v4140_v30 = vpack.c.bf16 %v2939_v29, %v2938_v28 }
 0x201   : > { %4105 = vmatpush3.bf16.msra.mxu1 %v4104_v31  ;;  %v2940_v31 = vld [vmem:[%s5339_s8 + $0x1c0] sm:$0xff] }
 0x202   : > { %3599 = vmatprep.subr.mxu1 %v4921_v0  ;;  %v4143_v33 = vpack.c.bf16 %v2941_v32, %v2940_v31 }
 0x2b7   : > { %v721_v9 = vpop.f32.mrb[0].mxu1 }
 0x2b8   : > { %v722_v10 = vadd.f32 %v2889_v8, %v721_v9  ;;  %v3493_v11 = vpop.f32.mrb[1].mxu1 }
 0x2ba   : > { %v725_v12 = vmul.f32 0.5, %v722_v10 }
 0x2bc   : > { %4530 = vtanh.f32 %v725_v12 }
 0x2c6   : > { %v4531_v13 = vpop.eup %4530 }
 0x2c7   : > { %v727_v14 = vmul.f32 0.5, %v4531_v13 }
 0x2c9   : > { %v728_v15 = vadd.f32 0.5, %v727_v14  ;;  %v2932_v14 = vld [vmem:[%s5339_s8 + $0x180] sm:$0xff] }
 0x2cb   : > { %v729_v16 = vmul.f32 %v728_v15, %v722_v10  ;;  %v2933_v15 = vld [vmem:[%s5339_s8 + $0x188] sm:$0xff] }
 0x2cc   : > { %v4131_v17 = vpack.c.bf16 %v2933_v15, %v2932_v14  ;;  %v2972_v15 = vld [vmem:[%s5339_s8 + $0x2a0] sm:$0xff] }
 0x2cd   : > { %3527 = vmatmul.mubr.f32.vlgmr.msra.gmra.mrb[2].mxu0 %v729_v16 }
 0x2ce   : > { %3596 = vmatprep.mubr.msk.f32.mxu0 %vm4922_vm0, %v4921_v0  ;;  %4108 = vmatpush3.bf16.msra.mxu0 %v4107_v35  ;;  %v2943_v35 = vld [vmem:[%s5339_s8 + $0x1d8] sm:$0xff] }
 0x2cf   : > { %4109 = vmatprep.subr.bf16.mxu0 %v4923_v1  ;;  %v4146_v36 = vpack.c.bf16 %v2943_v35, %v2942_v34 }
 0x2d2   : > { %4111 = vmatpush3.bf16.msra.mxu0 %v4110_v37  ;;  %v2944_v37 = vld [vmem:[%s5339_s8 + $0x1e0] sm:$0xff] }
 0x2d3   : > { %4112 = vmatprep.subr.bf16.mxu0 %v4923_v1 }
 0x2d6   : > { %4114 = vmatpush3.bf16.msra.mxu0 %v4113_v40  ;;  %v4149_v40 = vpack.c.bf16 %v2945_v38, %v2944_v37 }
 0x2d7   : > { %4115 = vmatprep.subr.bf16.mxu0 %v4923_v1 }
 0x2da   : > { %4117 = vmatpush3.bf16.msra.mxu0 %v4116_v54  ;;  %v2955_v54 = vld [vmem:[%s5339_s8 + $0x228] sm:$0xff] }
 0x2db   : > { %4118 = vmatprep.subr.bf16.mxu0 %v4923_v1  ;;  %v4161_v55 = vpack.c.bf16 %v2955_v54, %v2954_v53 }
 0x2de   : > { %4120 = vmatpush3.bf16.msra.mxu0 %v4119_v57  ;;  %v2957_v57 = vld [vmem:[%s5339_s8 + $0x238] sm:$0xff] }
 0x2df   : > { %4121 = vmatprep.subr.bf16.mxu0 %v4923_v1  ;;  %v4164_v58 = vpack.c.bf16 %v2957_v57, %v2956_v56 }
 0x2e2   : > { %4123 = vmatpush3.bf16.msra.mxu0 %v4122_v60  ;;  %v2959_v60 = vld [vmem:[%s5339_s8 + $0x248] sm:$0xff] }
 0x2e3   : > { %4124 = vmatprep.subr.bf16.mxu0 %v4923_v1  ;;  %v4167_v61 = vpack.c.bf16 %v2959_v60, %v2958_v59 }
 0x2e6   : > { %4126 = vmatpush3.bf16.msra.mxu0 %v4125_v63  ;;  %v2961_v63 = vld [vmem:[%s5339_s8 + $0x258] sm:$0xff] }
 0x2e7   : > { %4127 = vmatprep.subr.bf16.mxu0 %v4923_v1  ;;  %v4170_v2 = vpack.c.bf16 %v2961_v63, %v2960_v62 }
 0x2ea   : > { %4129 = vmatpush3.bf16.msra.mxu0 %v4128_v4  ;;  %v2963_v4 = vld [vmem:[%s5339_s8 + $0x268] sm:$0xff] }
 0x2eb   : > { %4130 = vmatprep.subr.bf16.mxu0 %v4923_v1 }
 0x3a0   : > { %v821_v42 = vpop.f32.mrb[2].mxu0 }
 0x3a1   : > { %v822_v43 = vadd.f32 %v2907_v41, %v821_v42  ;;  %v3528_v44 = vpop.f32.mrb[3].mxu0  ;;  %v2946_v42 = vld [vmem:[%s5339_s8 + $0x1f0] sm:$0xff] }
 0x3a3   : > { %v825_v45 = vmul.f32 0.5, %v822_v43 }
 0x3a5   : > { %4532 = vtanh.f32 %v825_v45 }
 0x3af   : > { %v4533_v46 = vpop.eup %4532 }
 0x3b0   : > { %v827_v47 = vmul.f32 0.5, %v4533_v46 }
 0x3b2   : > { %v828_v48 = vadd.f32 0.5, %v827_v47  ;;  %v2950_v47 = vld [vmem:[%s5339_s8 + $0x200] sm:$0xff] }
 0x3b4   : > { %v829_v49 = vmul.f32 %v828_v48, %v822_v43  ;;  %v2947_v43 = vld [vmem:[%s5339_s8 + $0x1f8] sm:$0xff]  ;;  %v2951_v48 = vld [vmem:[%s5339_s8 + $0x208] sm:$0xff] }
 0x3b5   : > { %v4152_v44 = vpack.c.bf16 %v2947_v43, %v2946_v42  ;;  %v5552_v43 = vld [vmem:[#allocation13] ss:$0 sm:$0xff] }
 0x3b6   : > { %3562 = vmatmul.mubr.f32.vlgmr.msra.gmra.mrb[2].mxu1 %v829_v49  ;;  %v4155_v49 = vpack.c.bf16 %v2951_v48, %v2950_v47 }
 0x3b7   : > { %3600 = vmatpush3.msra.mxu1 %v2928_v50  ;;  %3601 = vmatprep.mubr.msk.f32.mxu1 %vm4922_vm0, %v4921_v0  ;;  %v2952_v50 = vld [vmem:[%s5339_s8 + $0x210] sm:$0xff] }
 0x3b8   : > { %4154 = vmatprep.subr.bf16.mxu1 %v4923_v1 }
 0x3ba   : > { %3602 = vmatmul.mubr.msk.f32.vlgmr.msra.gmra.mrb[4].mxu1 %vm552_vm1, %v2927_v51  ;;  %v2953_v51 = vld [vmem:[%s5339_s8 + $0x218] sm:$0xff] }
 0x3bb   : > { %3671 = vmatprep.mubr.msk.f32.mxu1 %vm4922_vm0, %v4921_v0  ;;  %4156 = vmatpush3.bf16.msra.mxu1 %v4155_v49  ;;  %v4158_v52 = vpack.c.bf16 %v2953_v51, %v2952_v50 }
 0x3bc   : > { %4157 = vmatprep.subr.bf16.mxu1 %v4923_v1 }
 0x3bf   : > { %4159 = vmatpush3.bf16.msra.mxu1 %v4158_v52 }
 0x3c0   : > { %4160 = vmatprep.subr.bf16.mxu1 %v4923_v1 }
 0x3c3   : > { %4162 = vmatpush3.bf16.msra.mxu1 %v4161_v55 }
 0x3c4   : > { %4163 = vmatprep.subr.bf16.mxu1 %v4923_v1 }
 0x3c7   : > { %4165 = vmatpush3.bf16.msra.mxu1 %v4164_v58 }
 0x3c8   : > { %4166 = vmatprep.subr.bf16.mxu1 %v4923_v1 }
 0x3cb   : > { %4168 = vmatpush3.bf16.msra.mxu1 %v4167_v61 }
 0x3cc   : > { %4169 = vmatprep.subr.bf16.mxu1 %v4923_v1 }
 0x3cf   : > { %4171 = vmatpush3.bf16.msra.mxu1 %v4170_v2 }
 0x3d0   : > { %4172 = vmatprep.subr.bf16.mxu1 %v4923_v1 }
 0x489   : > { %v921_v6 = vpop.f32.mrb[2].mxu1 }
 0x48a   : > { %v922_v7 = vadd.f32 %v2925_v5, %v921_v6  ;;  %v3563_v8 = vpop.f32.mrb[3].mxu1  ;;  %v4173_v5 = vpack.c.bf16 %v2963_v4, %v2962_v3  ;;  %v2964_v6 = vld [vmem:[%s5339_s8 + $0x270] sm:$0xff]  ;;  %v540_v4 = vlaneseq }
 0x48c   : > { %v925_v9 = vmul.f32 0.5, %v922_v7  ;;  %4174 = vmatpush3.bf16.msra.mxu1 %v4173_v5  ;;  %v5559_v5 = vand.u32 127, %v540_v4 }
 0x48d   : > { %v1142_v10 = vpop.f32.mrb[4].mxu1  ;;  %4175 = vmatprep.subr.bf16.mxu1 %v4923_v1 }
 0x48e   : > { %4534 = vtanh.f32 %v925_v9  ;;  %v3603_v11 = vpop.f32.mrb[5].mxu1  ;;  %v1143_v22 = vadd.f32 %v2930_v19, %v1142_v10  ;;  %v2968_v9 = vld [vmem:[%s5339_s8 + $0x280] sm:$0xff]  ;;  %v2969_v10 = vld [vmem:[%s5339_s8 + $0x288] sm:$0xff]  ;;  %vm542_vm4 = vcmp.lt.s32.totalorder %v5559_v5, 64 }
 0x48f   : > { %v2970_v11 = vld [vmem:[%s5339_s8 + $0x290] sm:$0xff]  ;;  %v5548_v19 = vld [vmem:[#allocation13 + $0x1] ss:$0 sm:$0xff] }
 0x490   : > { %v1146_v26 = vmul.f32 0.5, %v1143_v22 }
 0x492   : > { %4536 = vtanh.f32 %v1146_v26 }
 0x498   : > { %v4535_v12 = vpop.eup %4534 }
 0x499   : > { %v927_v13 = vmul.f32 0.5, %v4535_v12  ;;  %v4179_v12 = vpack.c.bf16 %v2969_v10, %v2968_v9  ;;  %v2975_v9 = vld [vmem:[%s5339_s8 + $0x2b8] sm:$0xff] }
 0x49b   : > { %v928_v16 = vadd.f32 0.5, %v927_v13  ;;  %v2971_v13 = vld [vmem:[%s5339_s8 + $0x298] sm:$0xff] }
 0x49c   : > { %v4537_v39 = vpop.eup %4536  ;;  %v4182_v14 = vpack.c.bf16 %v2971_v13, %v2970_v11  ;;  %v2976_v11 = vld [vmem:[%s5339_s8 + $0x2c0] sm:$0xff] }
 0x49d   : > { %v929_v18 = vmul.f32 %v928_v16, %v922_v7  ;;  %v1148_v41 = vmul.f32 0.5, %v4537_v39  ;;  %v2965_v7 = vld [vmem:[%s5339_s8 + $0x278] sm:$0xff]  ;;  %v2973_v16 = vld [vmem:[%s5339_s8 + $0x2a8] sm:$0xff] }
 0x49e   : > { %v4176_v8 = vpack.c.bf16 %v2965_v7, %v2964_v6 }
 0x49f   : > { %3597 = vmatmul.mubr.f32.vlgmr.msra.gmra.mrb[4].mxu0 %v929_v18  ;;  %v1149_v45 = vadd.f32 0.5, %v1148_v41  ;;  %v2926_v18 = vld [vmem:[%s5351_s29] ss:$0 sm:$0xff] }
 0x4a0   : > { %4132 = vmatpush3.bf16.msra.mxu0 %v4131_v17  ;;  %3636 = vmatprep.mubr.msk.f32.mxu0 %vm4922_vm0, %v4921_v0  ;;  %v4185_v17 = vpack.c.bf16 %v2973_v16, %v2972_v15  ;;  %v2979_v15 = vld [vmem:[%s5339_s8 + $0x2d8] sm:$0xff] }
 0x4a1   : > { %4133 = vmatprep.subr.bf16.mxu0 %v4923_v1  ;;  %v1150_v46 = vmul.f32 %v1149_v45, %v1143_v22  ;;  %4177 = vmatpush3.bf16.msra.mxu1 %v4176_v8  ;;  %v2974_v8 = vld [vmem:[%s5339_s8 + $0x2b0] sm:$0xff] }
 0x4a2   : > { %4202 = vmatprep.subr.bf16.mxu1 %v4923_v1  ;;  %v4188_v10 = vpack.c.bf16 %v2975_v9, %v2974_v8  ;;  %v3010_v8 = vld [vmem:[%s5339_s8 + $0x300] sm:$0xff]  ;;  %v3011_v9 = vld [vmem:[%s5339_s8 + $0x308] sm:$0xff] }
 0x4a4   : > { %4135 = vmatpush3.bf16.msra.mxu0 %v4134_v23 }
 0x4a5   : > { %4136 = vmatprep.subr.bf16.mxu0 %v4923_v1 }
 0x4a8   : > { %4138 = vmatpush3.bf16.msra.mxu0 %v4137_v27 }
 0x4a9   : > { %4139 = vmatprep.subr.bf16.mxu0 %v4923_v1 }
 0x4ac   : > { %4141 = vmatpush3.bf16.msra.mxu0 %v4140_v30  ;;  %v2949_v30 = vld [vmem:[%s5349_s19 + $0x5] ss:$0 sm:$0xff] }
 0x4ad   : > { %4142 = vmatprep.subr.bf16.mxu0 %v4923_v1 }
 0x4b0   : > { %4144 = vmatpush3.bf16.msra.mxu0 %v4143_v33 }
 0x4b1   : > { %4145 = vmatprep.subr.bf16.mxu0 %v4923_v1 }
 0x4b4   : > { %4147 = vmatpush3.bf16.msra.mxu0 %v4146_v36 }
 0x4b5   : > { %4148 = vmatprep.subr.bf16.mxu0 %v4923_v1 }
 0x4b8   : > { %4150 = vmatpush3.bf16.msra.mxu0 %v4149_v40 }
 0x4b9   : > { %4151 = vmatprep.subr.bf16.mxu0 %v4923_v1 }
 0x4bc   : > { %4153 = vmatpush3.bf16.msra.mxu0 %v4152_v44 }
 0x4bd   : > { %4178 = vmatprep.subr.bf16.mxu0 %v4923_v1 }
 0x4bf   : > { %3637 = vmatmul.mubr.f32.vlgmr.msra.gmra.mrb[6].mxu0 %v1150_v46 }
 0x4c0   : > { %3706 = vmatprep.mubr.msk.f32.mxu0 %vm4922_vm0, %v4921_v0  ;;  %4180 = vmatpush3.bf16.msra.mxu0 %v4179_v12  ;;  %v2977_v12 = vld [vmem:[%s5339_s8 + $0x2c8] sm:$0xff] }
 0x4c1   : > { %4181 = vmatprep.subr.bf16.mxu0 %v4923_v1  ;;  %v4191_v13 = vpack.c.bf16 %v2977_v12, %v2976_v11  ;;  %v4227_v11 = vpack.c.bf16 %v3011_v9, %v3010_v8  ;;  %v3048_v8 = vld [vmem:[%s5339_s8 + $0x410] sm:$0xff] }
 0x4c4   : > { %4183 = vmatpush3.bf16.msra.mxu0 %v4182_v14  ;;  %v2978_v14 = vld [vmem:[%s5339_s8 + $0x2d0] sm:$0xff] }
 0x4c5   : > { %4184 = vmatprep.subr.bf16.mxu0 %v4923_v1  ;;  %v4194_v16 = vpack.c.bf16 %v2979_v15, %v2978_v14  ;;  %v3012_v14 = vld [vmem:[%s5339_s8 + $0x310] sm:$0xff]  ;;  %v3013_v15 = vld [vmem:[%s5339_s8 + $0x318] sm:$0xff] }
 0x4c8   : > { %4186 = vmatpush3.bf16.msra.mxu0 %v4185_v17  ;;  %v2980_v17 = vld [vmem:[%s5339_s8 + $0x2e0] sm:$0xff] }
 0x4c9   : > { %4187 = vmatprep.subr.bf16.mxu0 %v4923_v1 }
 0x4cc   : > { %4189 = vmatpush3.bf16.msra.mxu0 %v4188_v10 }
 0x4cd   : > { %4190 = vmatprep.subr.bf16.mxu0 %v4923_v1 }
 0x4d0   : > { %4192 = vmatpush3.bf16.msra.mxu0 %v4191_v13  ;;  %v3008_v13 = vld [vmem:[%s5349_s19 + $0x8] ss:$0 sm:$0xff] }
 0x4d1   : > { %4193 = vmatprep.subr.bf16.mxu0 %v4923_v1 }
 0x4d4   : > { %4195 = vmatpush3.bf16.msra.mxu0 %v4194_v16 }
 0x4d5   : > { %4196 = vmatprep.subr.bf16.mxu0 %v4923_v1 }
 0x572   : > { %v1019_v20 = vpop.f32.mrb[4].mxu0 }
 0x573   : > { %v1020_v21 = vadd.f32 %v2926_v18, %v1019_v20  ;;  %v3598_v22 = vpop.f32.mrb[5].mxu0  ;;  %v2981_v18 = vld [vmem:[%s5339_s8 + $0x2e8] sm:$0xff] }
 0x574   : > { %v4197_v20 = vpack.c.bf16 %v2981_v18, %v2980_v17  ;;  %v2983_v22 = vld [vmem:[%s5339_s8 + $0x2f8] sm:$0xff]  ;;  %v4230_v17 = vpack.c.bf16 %v3013_v15, %v3012_v14  ;;  %v3014_v18 = vld [vmem:[%s5339_s8 + $0x320] sm:$0xff] }
 0x575   : > { %v1023_v23 = vsub.f32 %v5548_v19, %v1020_v21  ;;  %v3003_v15 = vld [vmem:[%s5351_s29 + $0x1] ss:$0 sm:$0xff] }
 0x576   : > { %4198 = vmatpush3.bf16.msra.mxu0 %v4197_v20  ;;  %v3015_v20 = vld [vmem:[%s5339_s8 + $0x328] sm:$0xff] }
 0x577   : > { %v1025_v24 = vand.u32 2147483647, %v1023_v23  ;;  %v1024_v40 = vmax.f32 %v1023_v23, 0.0  ;;  %4199 = vmatprep.subr.bf16.mxu0 %v4923_v1 }
 0x579   : > { %v1026_v25 = vsub.f32 0.0, %v1025_v24  ;;  %v2986_v24 = vld [vmem:[%s5341_s23 + $0x80] sm:$0xff] }
 0x57b   : > { %v1027_v26 = vmul.f32 1.442695, %v1026_v25  ;;  %v2987_v25 = vld [vmem:[%s5341_s23 + $0x88] sm:$0xff] }
 0x57d   : > { %4538 = vpow2.f32 %v1027_v26  ;;  %v2988_v26 = vld [vmem:[%s5341_s23 + $0x90] sm:$0xff] }
 0x587   : > { %v4539_v27 = vpop.eup %4538 }
 0x588   : > { %v1029_v28 = vadd.f32 1.0, %v4539_v27  ;;  %v1032_v29 = vmul.f32 -0.5, %v4539_v27  ;;  %v1035_v32 = vand.u32 2147483647, %v4539_v27 }
 0x58a   : > { %4540 = vlog2.f32 %v1029_v28  ;;  %v1033_v31 = vadd.f32 1.0, %v1032_v29  ;;  %vm1036_vm2 = vcmp.lt.f32.partialorder %v1035_v32, 0.0004427343  ;;  %v2989_v28 = vld [vmem:[%s5341_s23 + $0x98] sm:$0xff] }
 0x58b   : > { %v4206_v29 = vpack.c.bf16 %v2989_v28, %v2988_v26  ;;  %v3018_v26 = vld [vmem:[%s5339_s8 + $0x340] sm:$0xff] }
 0x58c   : > { %v1034_v38 = vmul.f32 %v4539_v27, %v1033_v31  ;;  %v4203_v27 = vpack.c.bf16 %v2987_v25, %v2986_v24  ;;  %v2991_v31 = vld [vmem:[%s5341_s23 + $0xa8] sm:$0xff]  ;;  %v3017_v24 = vld [vmem:[%s5339_s8 + $0x338] sm:$0xff] }
 0x592   : > { %v1242_v33 = vpop.f32.mrb[6].mxu0 }
 0x593   : > { %v1243_v34 = vadd.f32 %v2949_v30, %v1242_v33  ;;  %v3638_v35 = vpop.f32.mrb[7].mxu0  ;;  %v2990_v30 = vld [vmem:[%s5341_s23 + $0xa0] sm:$0xff] }
 0x594   : > { %v4541_v36 = vpop.eup %4540  ;;  %v4209_v32 = vpack.c.bf16 %v2991_v31, %v2990_v30  ;;  %v2967_v33 = vld [vmem:[%s5349_s19 + $0x6] ss:$0 sm:$0xff]  ;;  %v3021_v30 = vld [vmem:[%s5339_s8 + $0x358] sm:$0xff] }
 0x595   : > { %v1031_v37 = vmul.f32 0.6931472, %v4541_v36  ;;  %v1246_v39 = vmul.f32 0.5, %v1243_v34 }
 0x597   : > { %v1037_v41 = vsel %vm1036_vm2, %v1034_v38, %v1031_v37  ;;  %4542 = vtanh.f32 %v1246_v39 }
 0x598   : > { %v1038_v42 = vadd.f32 %v1037_v41, %v1024_v40 }
 0x59a   : > { %v1039_v44 = vsub.f32 %v5548_v19, %v1038_v42  ;;  %v3006_v42 = vld [vmem:[%s5331_s10 + $0x10] sm:$0xff] }
 0x59c   : > { %v1040_v45 = vsub.f32 %v1039_v44, %v5552_v43  ;;  %v3005_v44 = vld [vmem:[%s5323_s1 + $0x10] sm:$0xff] }
 0x59e   : > { %v1042_v46 = vand.u32 2147483647, %v1040_v45  ;;  %v1041_v61 = vmax.f32 %v1040_v45, 0.0  ;;  %v2992_v45 = vld [vmem:[%s5341_s23 + $0xb0] sm:$0xff] }
 0x5a0   : > { %v1043_v47 = vsub.f32 0.0, %v1042_v46  ;;  %v2993_v46 = vld [vmem:[%s5341_s23 + $0xb8] sm:$0xff] }
 0x5a1   : > { %v4543_v48 = vpop.eup %4542 }
 0x5a2   : > { %v1044_v49 = vmul.f32 1.442695, %v1043_v47  ;;  %v1248_v50 = vmul.f32 0.5, %v4543_v48  ;;  %v4212_v47 = vpack.c.bf16 %v2993_v46, %v2992_v45  ;;  %v2994_v48 = vld [vmem:[%s5341_s23 + $0xc0] sm:$0xff]  ;;  %v3030_v46 = vld [vmem:[%s5339_s8 + $0x390] sm:$0xff] }
 0x5a4   : > { %4544 = vpow2.f32 %v1044_v49  ;;  %v1249_v51 = vadd.f32 0.5, %v1248_v50  ;;  %v2995_v49 = vld [vmem:[%s5341_s23 + $0xc8] sm:$0xff] }
 0x5a5   : > { %v4215_v50 = vpack.c.bf16 %v2995_v49, %v2994_v48  ;;  %v3032_v49 = vld [vmem:[%s5339_s8 + $0x3a0] sm:$0xff] }
 0x5a6   : > { %v1250_v52 = vmul.f32 %v1249_v51, %v1243_v34  ;;  %v2996_v51 = vld [vmem:[%s5341_s23 + $0xd0] sm:$0xff] }
 0x5a8   : > { %3672 = vmatmul.mubr.f32.vlgmr.msra.gmra.mrb[6].mxu1 %v1250_v52  ;;  %v2997_v52 = vld [vmem:[%s5341_s23 + $0xd8] sm:$0xff] }
 0x5a9   : > { %3741 = vmatprep.mubr.msk.f32.mxu1 %vm4922_vm0, %v4921_v0  ;;  %4204 = vmatpush3.bf16.msra.mxu1 %v4203_v27  ;;  %v3019_v27 = vld [vmem:[%s5339_s8 + $0x348] sm:$0xff] }
 0x5aa   : > { %4205 = vmatprep.subr.bf16.mxu1 %v4923_v1  ;;  %v4239_v28 = vpack.c.bf16 %v3019_v27, %v3018_v26  ;;  %v3027_v27 = vld [vmem:[%s5349_s19 + $0x9] ss:$0 sm:$0xff] }
 0x5ad   : > { %4207 = vmatpush3.bf16.msra.mxu1 %v4206_v29  ;;  %v3020_v29 = vld [vmem:[%s5339_s8 + $0x350] sm:$0xff] }
 0x5ae   : > { %v4545_v53 = vpop.eup %4544  ;;  %4208 = vmatprep.subr.bf16.mxu1 %v4923_v1  ;;  %v4242_v31 = vpack.c.bf16 %v3021_v30, %v3020_v29 }
 0x5af   : > { %v1046_v54 = vadd.f32 1.0, %v4545_v53  ;;  %v1049_v55 = vmul.f32 -0.5, %v4545_v53  ;;  %v1052_v57 = vand.u32 2147483647, %v4545_v53 }
 0x5b1   : > { %4546 = vlog2.f32 %v1046_v54  ;;  %v1050_v56 = vadd.f32 1.0, %v1049_v55  ;;  %vm1053_vm3 = vcmp.lt.f32.partialorder %v1052_v57, 0.0004427343  ;;  %4210 = vmatpush3.bf16.msra.mxu1 %v4209_v32  ;;  %v2998_v54 = vld [vmem:[%s5341_s23 + $0xe0] sm:$0xff]  ;;  %v2999_v55 = vld [vmem:[%s5341_s23 + $0xe8] sm:$0xff]  ;;  %v3000_v57 = vld [vmem:[%s5341_s23 + $0xf0] sm:$0xff] }
 0x5b2   : > { %4211 = vmatprep.subr.bf16.mxu1 %v4923_v1  ;;  %v3022_v32 = vld [vmem:[%s5339_s8 + $0x360] sm:$0xff] }
 0x5b3   : > { %v1051_v60 = vmul.f32 %v4545_v53, %v1050_v56  ;;  %v4218_v53 = vpack.c.bf16 %v2997_v52, %v2996_v51  ;;  %v4221_v56 = vpack.c.bf16 %v2999_v55, %v2998_v54  ;;  %v3034_v52 = vld [vmem:[%s5339_s8 + $0x3b0] sm:$0xff]  ;;  %v3036_v55 = vld [vmem:[%s5339_s8 + $0x3c0] sm:$0xff] }
 0x5b5   : > { %4213 = vmatpush3.bf16.msra.mxu1 %v4212_v47  ;;  %v3031_v47 = vld [vmem:[%s5339_s8 + $0x398] sm:$0xff] }
 0x5b6   : > { %4214 = vmatprep.subr.bf16.mxu1 %v4923_v1  ;;  %v4254_v48 = vpack.c.bf16 %v3031_v47, %v3030_v46 }
 0x5b9   : > { %4216 = vmatpush3.bf16.msra.mxu1 %v4215_v50  ;;  %v3033_v50 = vld [vmem:[%s5339_s8 + $0x3a8] sm:$0xff] }
 0x5ba   : > { %4217 = vmatprep.subr.bf16.mxu1 %v4923_v1  ;;  %v4257_v51 = vpack.c.bf16 %v3033_v50, %v3032_v49 }
 0x5bb   : > { %v4547_v58 = vpop.eup %4546 }
 0x5bc   : > { %v1048_v59 = vmul.f32 0.6931472, %v4547_v58  ;;  %v3001_v58 = vld [vmem:[%s5341_s23 + $0xf8] sm:$0xff] }
 0x5bd   : > { %4219 = vmatpush3.bf16.msra.mxu1 %v4218_v53  ;;  %v3035_v53 = vld [vmem:[%s5339_s8 + $0x3b8] sm:$0xff] }
 0x5be   : > { %v1054_v62 = vsel %vm1053_vm3, %v1051_v60, %v1048_v59  ;;  %4220 = vmatprep.subr.bf16.mxu1 %v4923_v1  ;;  %v4224_v59 = vpack.c.bf16 %v3001_v58, %v3000_v57  ;;  %v2985_v60 = vld [vmem:[%s5349_s19 + $0x7] ss:$0 sm:$0xff]  ;;  %v4260_v54 = vpack.c.bf16 %v3035_v53, %v3034_v52 }
 0x5bf   : > { %v1055_v63 = vadd.f32 %v1054_v62, %v1041_v61  ;;  %v3038_v58 = vld [vmem:[%s5339_s8 + $0x3d0] sm:$0xff] }
 0x5c1   : > { %v1056_v2 = vadd.f32 %v5552_v43, %v1055_v63  ;;  %4222 = vmatpush3.bf16.msra.mxu1 %v4221_v56  ;;  %v3037_v56 = vld [vmem:[%s5339_s8 + $0x3c8] sm:$0xff] }
 0x5c2   : > { %4223 = vmatprep.subr.bf16.mxu1 %v4923_v1  ;;  %v4263_v57 = vpack.c.bf16 %v3037_v56, %v3036_v55 }
 0x5c3   : > { %v1057_v3 = vmul.f32 1.442695, %v1056_v2 }
 0x5c5   : > { %4548 = vpow2.f32 %v1057_v3  ;;  %4225 = vmatpush3.bf16.msra.mxu1 %v4224_v59  ;;  %v3039_v59 = vld [vmem:[%s5339_s8 + $0x3d8] sm:$0xff] }
 0x5c6   : > { %4226 = vmatprep.subr.bf16.mxu1 %v4923_v1 }
 0x5cf   : > { %v4549_v6 = vpop.eup %4548 }
 0x5d0   : > { %v1059_v7 = vsel %vm542_vm4, %v1020_v21, %v4549_v6  ;;  %v2982_v21 = vld [vmem:[%s5339_s8 + $0x2f0] sm:$0xff] }
 0x5d1   : > { %1060 = vst [vmem:[%s5565_s30] sm:$0xff] %v1059_v7  ;;  %v4200_v23 = vpack.c.bf16 %v2983_v22, %v2982_v21  ;;  %v4233_v22 = vpack.c.bf16 %v3015_v20, %v3014_v18 }
 0x5d3   : > { %4201 = vmatpush3.bf16.msra.mxu0 %v4200_v23  ;;  %v3016_v23 = vld [vmem:[%s5339_s8 + $0x330] sm:$0xff] }
 0x5d4   : > { %3744 = vmatprep.subr.mxu0 %v4921_v0  ;;  %v4236_v25 = vpack.c.bf16 %v3017_v24, %v3016_v23 }
 0x67b   : > { %v1342_v34 = vpop.f32.mrb[6].mxu1 }
 0x67c   : > { %v1343_v35 = vadd.f32 %v2967_v33, %v1342_v34  ;;  %v3673_v36 = vpop.f32.mrb[7].mxu1  ;;  %v3023_v33 = vld [vmem:[%s5339_s8 + $0x368] sm:$0xff] }
 0x67e   : > { %v1346_v37 = vmul.f32 0.5, %v1343_v35 }
 0x680   : > { %4550 = vtanh.f32 %v1346_v37  ;;  %v3024_v37 = vld [vmem:[%s5339_s8 + $0x370] sm:$0xff] }
 0x68a   : > { %v4551_v38 = vpop.eup %4550 }
 0x68b   : > { %v1348_v39 = vmul.f32 0.5, %v4551_v38  ;;  %v3025_v38 = vld [vmem:[%s5339_s8 + $0x378] sm:$0xff] }
 0x68d   : > { %v1349_v40 = vadd.f32 0.5, %v1348_v39  ;;  %v4248_v39 = vpack.c.bf16 %v3025_v38, %v3024_v37 }
 0x68f   : > { %v1350_v41 = vmul.f32 %v1349_v40, %v1343_v35  ;;  %v4245_v35 = vpack.c.bf16 %v3023_v33, %v3022_v32 }
 0x691   : > { %3707 = vmatmul.mubr.f32.vlgmr.msra.gmra.mrb[8].mxu0 %v1350_v41 }
 0x692   : > { %3745 = vmatpush3.msra.mxu0 %v3006_v42  ;;  %3746 = vmatprep.mubr.msk.f32.mxu0 %vm4922_vm0, %v4921_v0  ;;  %v3028_v42 = vld [vmem:[%s5339_s8 + $0x380] sm:$0xff] }
 0x693   : > { %4250 = vmatprep.subr.bf16.mxu0 %v4923_v1 }
 0x695   : > { %3747 = vmatmul.mubr.msk.f32.vlgmr.msra.gmra.mrb[10].mxu0 %vm552_vm1, %v3005_v44  ;;  %v3029_v44 = vld [vmem:[%s5339_s8 + $0x388] sm:$0xff] }
 0x696   : > { %3816 = vmatprep.mubr.msk.f32.mxu0 %vm4922_vm0, %v4921_v0  ;;  %v4251_v45 = vpack.c.bf16 %v3029_v44, %v3028_v42 }
 0x698   : > { %4252 = vmatpush3.bf16.msra.mxu0 %v4251_v45 }
 0x699   : > { %4253 = vmatprep.subr.bf16.mxu0 %v4923_v1 }
 0x69c   : > { %4255 = vmatpush3.bf16.msra.mxu0 %v4254_v48 }
 0x69d   : > { %4256 = vmatprep.subr.bf16.mxu0 %v4923_v1 }
 0x6a0   : > { %4258 = vmatpush3.bf16.msra.mxu0 %v4257_v51 }
 0x6a1   : > { %4259 = vmatprep.subr.bf16.mxu0 %v4923_v1 }
 0x6a4   : > { %4261 = vmatpush3.bf16.msra.mxu0 %v4260_v54 }
 0x6a5   : > { %4262 = vmatprep.subr.bf16.mxu0 %v4923_v1 }
 0x6a8   : > { %4264 = vmatpush3.bf16.msra.mxu0 %v4263_v57 }
 0x6a9   : > { %4265 = vmatprep.subr.bf16.mxu0 %v4923_v1 }
 0x764   : > { %v1442_v61 = vpop.f32.mrb[8].mxu0 }
 0x765   : > { %v1443_v62 = vadd.f32 %v2985_v60, %v1442_v61  ;;  %v3708_v63 = vpop.f32.mrb[9].mxu0  ;;  %v4266_v60 = vpack.c.bf16 %v3039_v59, %v3038_v58  ;;  %v3040_v61 = vld [vmem:[%s5339_s8 + $0x3e0] sm:$0xff] }
 0x767   : > { %v1446_v2 = vmul.f32 0.5, %v1443_v62  ;;  %4267 = vmatpush3.bf16.msra.mxu0 %v4266_v60 }
 0x768   : > { %v1666_v3 = vpop.f32.mrb[10].mxu0  ;;  %4268 = vmatprep.subr.bf16.mxu0 %v4923_v1 }
 0x769   : > { %4552 = vtanh.f32 %v1446_v2  ;;  %v3748_v4 = vpop.f32.mrb[11].mxu0  ;;  %v1667_v16 = vadd.f32 %v3008_v13, %v1666_v3  ;;  %v3042_v2 = vld [vmem:[%s5339_s8 + $0x3f0] sm:$0xff]  ;;  %v3043_v3 = vld [vmem:[%s5339_s8 + $0x3f8] sm:$0xff]  ;;  %v3051_v13 = vld [vmem:[%s5339_s8 + $0x428] sm:$0xff] }
 0x76a   : > { %v4272_v4 = vpack.c.bf16 %v3043_v3, %v3042_v2  ;;  %v3052_v2 = vld [vmem:[%s5339_s8 + $0x430] sm:$0xff]  ;;  %v3053_v3 = vld [vmem:[%s5339_s8 + $0x438] sm:$0xff] }
 0x76b   : > { %v1670_v21 = vmul.f32 0.5, %v1667_v16 }
 0x76d   : > { %4554 = vtanh.f32 %v1670_v21 }
 0x773   : > { %v4553_v6 = vpop.eup %4552 }
 0x774   : > { %v1448_v7 = vmul.f32 0.5, %v4553_v6  ;;  %v3046_v6 = vld [vmem:[%s5339_s8 + $0x400] sm:$0xff] }
 0x776   : > { %v1449_v10 = vadd.f32 0.5, %v1448_v7  ;;  %v3047_v7 = vld [vmem:[%s5339_s8 + $0x408] sm:$0xff] }
 0x777   : > { %v4555_v34 = vpop.eup %4554  ;;  %v4275_v9 = vpack.c.bf16 %v3047_v7, %v3046_v6  ;;  %v3054_v6 = vld [vmem:[%s5339_s8 + $0x440] sm:$0xff] }
 0x778   : > { %v1450_v12 = vmul.f32 %v1449_v10, %v1443_v62  ;;  %v1672_v36 = vmul.f32 0.5, %v4555_v34  ;;  %v3041_v62 = vld [vmem:[%s5339_s8 + $0x3e8] sm:$0xff]  ;;  %v3049_v10 = vld [vmem:[%s5339_s8 + $0x418] sm:$0xff] }
 0x779   : > { %v4269_v63 = vpack.c.bf16 %v3041_v62, %v3040_v61 }
 0x77a   : > { %3742 = vmatmul.mubr.f32.vlgmr.msra.gmra.mrb[8].mxu1 %v1450_v12  ;;  %v1673_v40 = vadd.f32 0.5, %v1672_v36  ;;  %v3050_v12 = vld [vmem:[%s5339_s8 + $0x420] sm:$0xff] }
 0x77b   : > { %4228 = vmatpush3.bf16.msra.mxu1 %v4227_v11  ;;  %3781 = vmatprep.mubr.msk.f32.mxu1 %vm4922_vm0, %v4921_v0  ;;  %v4278_v11 = vpack.c.bf16 %v3049_v10, %v3048_v8  ;;  %v4281_v14 = vpack.c.bf16 %v3051_v13, %v3050_v12  ;;  %v3056_v8 = vld [vmem:[%s5339_s8 + $0x450] sm:$0xff]  ;;  %v3059_v12 = vld [vmem:[%s5339_s8 + $0x468] sm:$0xff] }
 0x77c   : > { %4229 = vmatprep.subr.bf16.mxu1 %v4923_v1  ;;  %v1674_v41 = vmul.f32 %v1673_v40, %v1667_v16  ;;  %4270 = vmatpush3.bf16.msra.mxu0 %v4269_v63 }
 0x77d   : > { %4271 = vmatprep.subr.bf16.mxu0 %v4923_v1 }
 0x77f   : > { %4231 = vmatpush3.bf16.msra.mxu1 %v4230_v17 }
 0x780   : > { %4232 = vmatprep.subr.bf16.mxu1 %v4923_v1  ;;  %4273 = vmatpush3.bf16.msra.mxu0 %v4272_v4  ;;  %v4284_v4 = vpack.c.bf16 %v3053_v3, %v3052_v2 }
 0x781   : > { %4298 = vmatprep.subr.bf16.mxu0 %v4923_v1 }
 0x783   : > { %4234 = vmatpush3.bf16.msra.mxu1 %v4233_v22 }
 0x784   : > { %4235 = vmatprep.subr.bf16.mxu1 %v4923_v1 }
 0x787   : > { %4237 = vmatpush3.bf16.msra.mxu1 %v4236_v25 }
 0x788   : > { %4238 = vmatprep.subr.bf16.mxu1 %v4923_v1 }
 0x78b   : > { %4240 = vmatpush3.bf16.msra.mxu1 %v4239_v28 }
 0x78c   : > { %4241 = vmatprep.subr.bf16.mxu1 %v4923_v1 }
 0x78f   : > { %4243 = vmatpush3.bf16.msra.mxu1 %v4242_v31 }
 0x790   : > { %4244 = vmatprep.subr.bf16.mxu1 %v4923_v1 }
 0x793   : > { %4246 = vmatpush3.bf16.msra.mxu1 %v4245_v35 }
 0x794   : > { %4247 = vmatprep.subr.bf16.mxu1 %v4923_v1 }
 0x797   : > { %4249 = vmatpush3.bf16.msra.mxu1 %v4248_v39 }
 0x798   : > { %4274 = vmatprep.subr.bf16.mxu1 %v4923_v1 }
 0x79a   : > { %3782 = vmatmul.mubr.f32.vlgmr.msra.gmra.mrb[10].mxu1 %v1674_v41 }
 0x79b   : > { %3851 = vmatprep.mubr.msk.f32.mxu1 %vm4922_vm0, %v4921_v0  ;;  %4276 = vmatpush3.bf16.msra.mxu1 %v4275_v9  ;;  %v3057_v9 = vld [vmem:[%s5339_s8 + $0x458] sm:$0xff] }
 0x79c   : > { %4277 = vmatprep.subr.bf16.mxu1 %v4923_v1  ;;  %v4290_v10 = vpack.c.bf16 %v3057_v9, %v3056_v8 }
 0x79f   : > { %4279 = vmatpush3.bf16.msra.mxu1 %v4278_v11  ;;  %v3058_v11 = vld [vmem:[%s5339_s8 + $0x460] sm:$0xff] }
 0x7a0   : > { %4280 = vmatprep.subr.bf16.mxu1 %v4923_v1  ;;  %v4293_v13 = vpack.c.bf16 %v3059_v12, %v3058_v11  ;;  %v3093_v11 = vld [vmem:[%s5339_s8 + $0x4a8] sm:$0xff] }
 0x7a3   : > { %4282 = vmatpush3.bf16.msra.mxu1 %v4281_v14  ;;  %v3060_v14 = vld [vmem:[%s5339_s8 + $0x470] sm:$0xff] }
 0x7a4   : > { %4283 = vmatprep.subr.bf16.mxu1 %v4923_v1 }
 0x7a7   : > { %4285 = vmatpush3.bf16.msra.mxu1 %v4284_v4 }
 0x7a8   : > { %4286 = vmatprep.subr.bf16.mxu1 %v4923_v1 }
 0x84d   : > { %v1542_v16 = vpop.f32.mrb[8].mxu1 }
 0x84e   : > { %v1543_v17 = vadd.f32 %v3003_v15, %v1542_v16  ;;  %v3743_v18 = vpop.f32.mrb[9].mxu1  ;;  %v3061_v15 = vld [vmem:[%s5339_s8 + $0x478] sm:$0xff] }
 0x84f   : > { %v4296_v16 = vpack.c.bf16 %v3061_v15, %v3060_v14  ;;  %v3065_v18 = vld [vmem:[%s5341_s23 + $0x108] sm:$0xff]  ;;  %v3094_v14 = vld [vmem:[%s5339_s8 + $0x4b0] sm:$0xff]  ;;  %v3095_v15 = vld [vmem:[%s5339_s8 + $0x4b8] sm:$0xff] }
 0x850   : > { %v1546_v20 = vsub.f32 %v5548_v19, %v1543_v17 }
 0x852   : > { %v1548_v21 = vand.u32 2147483647, %v1546_v20  ;;  %v1547_v37 = vmax.f32 %v1546_v20, 0.0  ;;  %v3066_v20 = vld [vmem:[%s5341_s23 + $0x110] sm:$0xff] }
 0x854   : > { %v1549_v22 = vsub.f32 0.0, %v1548_v21 }
 0x856   : > { %v1550_v23 = vmul.f32 1.442695, %v1549_v22  ;;  %v3067_v22 = vld [vmem:[%s5341_s23 + $0x118] sm:$0xff] }
 0x858   : > { %4556 = vpow2.f32 %v1550_v23  ;;  %v4302_v23 = vpack.c.bf16 %v3067_v22, %v3066_v20  ;;  %v3099_v22 = vld [vmem:[%s5339_s8 + $0x4d8] sm:$0xff] }
 0x862   : > { %v4557_v24 = vpop.eup %4556 }
 0x863   : > { %v1552_v25 = vadd.f32 1.0, %v4557_v24  ;;  %v1555_v26 = vmul.f32 -0.5, %v4557_v24  ;;  %v1558_v29 = vand.u32 2147483647, %v4557_v24 }
 0x865   : > { %4558 = vlog2.f32 %v1552_v25  ;;  %v1556_v28 = vadd.f32 1.0, %v1555_v26  ;;  %vm1559_vm5 = vcmp.lt.f32.partialorder %v1558_v29, 0.0004427343  ;;  %v3069_v25 = vld [vmem:[%s5341_s23 + $0x128] sm:$0xff] }
 0x867   : > { %v1557_v35 = vmul.f32 %v4557_v24, %v1556_v28  ;;  %v3068_v24 = vld [vmem:[%s5341_s23 + $0x120] sm:$0xff] }
 0x868   : > { %v4305_v26 = vpack.c.bf16 %v3069_v25, %v3068_v24  ;;  %v3100_v24 = vld [vmem:[%s5339_s8 + $0x4e0] sm:$0xff]  ;;  %v3101_v25 = vld [vmem:[%s5339_s8 + $0x4e8] sm:$0xff] }
 0x86d   : > { %v1766_v30 = vpop.f32.mrb[10].mxu1 }
 0x86e   : > { %v1767_v31 = vadd.f32 %v3027_v27, %v1766_v30  ;;  %v3783_v32 = vpop.f32.mrb[11].mxu1  ;;  %v3045_v27 = vld [vmem:[%s5349_s19 + $0xa] ss:$0 sm:$0xff] }
 0x86f   : > { %v4559_v33 = vpop.eup %4558 }
 0x870   : > { %v1554_v34 = vmul.f32 0.6931472, %v4559_v33  ;;  %v1770_v36 = vmul.f32 0.5, %v1767_v31 }
 0x872   : > { %v1560_v38 = vsel %vm1559_vm5, %v1557_v35, %v1554_v34  ;;  %4560 = vtanh.f32 %v1770_v36  ;;  %v3084_v36 = vld [vmem:[%s5331_s10 + $0x18] sm:$0xff] }
 0x873   : > { %v1561_v39 = vadd.f32 %v1560_v38, %v1547_v37  ;;  %v3083_v37 = vld [vmem:[%s5323_s1 + $0x18] sm:$0xff]  ;;  %v3070_v38 = vld [vmem:[%s5341_s23 + $0x130] sm:$0xff]  ;;  %s4810_s1 = scalar_lea.vmem %s5862_s13, 512 }
 0x874   : > { %p4811_p3 = scmp.ne.s32.totalorder %s5862_s13, %s4810_s1  ;;  %p4818_p10 = scmp.lt.s32.totalorder %s4816_s22, %s4810_s1 }
 0x875   : > { %v1562_v40 = vsub.f32 %v5548_v19, %v1561_v39  ;;  %v3071_v39 = vld [vmem:[%s5341_s23 + $0x138] sm:$0xff] }
 0x876   : > { %p4812_p2 = pnand %p4811_p3, %p5973_p0  ;;  %p4819_p4 = por %p4818_p10, %p4817_p12 }
 0x877   : > { %v1563_v41 = vsub.f32 %v1562_v40, %v5552_v43  ;;  %v4308_v40 = vpack.c.bf16 %v3071_v39, %v3070_v38  ;;  %v3109_v38 = vld [vmem:[%s5339_s8 + $0x518] sm:$0xff] }
 0x878   : > { %p4813_p7 = pneg %p4812_p2 }
 0x879   : > { %v1565_v42 = vand.u32 2147483647, %v1563_v41  ;;  %v1564_v57 = vmax.f32 %v1563_v41, 0.0  ;;  %v3072_v41 = vld [vmem:[%s5341_s23 + $0x140] sm:$0xff] }
 0x87a   : > { %p4820_p13 = pnand %p4819_p4, %p4813_p7 }
 0x87b   : > { %v1566_v44 = vsub.f32 0.0, %v1565_v42  ;;  %v3073_v42 = vld [vmem:[%s5341_s23 + $0x148] sm:$0xff] }
 0x87c   : > { %v4561_v45 = vpop.eup %4560 }
 0x87d   : > { %v1567_v46 = vmul.f32 1.442695, %v1566_v44  ;;  %v1772_v47 = vmul.f32 0.5, %v4561_v45  ;;  %v4311_v44 = vpack.c.bf16 %v3073_v42, %v3072_v41  ;;  %v3074_v45 = vld [vmem:[%s5341_s23 + $0x150] sm:$0xff]  ;;  %v3111_v41 = vld [vmem:[%s5339_s8 + $0x528] sm:$0xff] }
 0x87f   : > { %4562 = vpow2.f32 %v1567_v46  ;;  %v1773_v48 = vadd.f32 0.5, %v1772_v47  ;;  %v3075_v46 = vld [vmem:[%s5341_s23 + $0x158] sm:$0xff] }
 0x880   : > { %v4314_v47 = vpack.c.bf16 %v3075_v46, %v3074_v45  ;;  %v3113_v45 = vld [vmem:[%s5339_s8 + $0x538] sm:$0xff] }
 0x881   : > { %v1774_v49 = vmul.f32 %v1773_v48, %v1767_v31  ;;  %v3076_v48 = vld [vmem:[%s5341_s23 + $0x160] sm:$0xff] }
 0x883   : > { %3817 = vmatmul.mubr.f32.vlgmr.msra.gmra.mrb[12].mxu0 %v1774_v49  ;;  %v3077_v49 = vld [vmem:[%s5341_s23 + $0x168] sm:$0xff] }
 0x884   : > { %3886 = vmatprep.mubr.msk.f32.mxu0 %vm4922_vm0, %v4921_v0 }
 0x889   : > { %v4563_v50 = vpop.eup %4562 }
 0x88a   : > { %v1569_v51 = vadd.f32 1.0, %v4563_v50  ;;  %v1572_v52 = vmul.f32 -0.5, %v4563_v50  ;;  %v1575_v53 = vand.u32 2147483647, %v4563_v50 }
 0x88c   : > { %4564 = vlog2.f32 %v1569_v51  ;;  %v1573_v19 = vadd.f32 1.0, %v1572_v52  ;;  %vm1576_vm6 = vcmp.lt.f32.partialorder %v1575_v53, 0.0004427343  ;;  %v3078_v51 = vld [vmem:[%s5341_s23 + $0x170] sm:$0xff]  ;;  %v3079_v52 = vld [vmem:[%s5341_s23 + $0x178] sm:$0xff] }
 0x88d   : > { %v3063_v53 = vld [vmem:[%s5349_s19 + $0xb] ss:$0 sm:$0xff] }
 0x88e   : > { %v1574_v56 = vmul.f32 %v4563_v50, %v1573_v19  ;;  %v4317_v50 = vpack.c.bf16 %v3077_v49, %v3076_v48  ;;  %v4320_v19 = vpack.c.bf16 %v3079_v52, %v3078_v51  ;;  %v3115_v48 = vld [vmem:[%s5339_s8 + $0x548] sm:$0xff]  ;;  %v3117_v51 = vld [vmem:[%s5339_s8 + $0x558] sm:$0xff] }
 0x896   : > { %v4565_v54 = vpop.eup %4564 }
 0x897   : > { %v1571_v55 = vmul.f32 0.6931472, %v4565_v54 }
 0x899   : > { %v1577_v58 = vsel %vm1576_vm6, %v1574_v56, %v1571_v55 }
 0x89a   : > { %v1578_v59 = vadd.f32 %v1577_v58, %v1564_v57 }
 0x89c   : > { %v1579_v60 = vadd.f32 %v5552_v43, %v1578_v59  ;;  %v3055_v43 = vld [vmem:[%s5339_s8 + $0x448] sm:$0xff] }
 0x89d   : > { %v4287_v7 = vpack.c.bf16 %v3055_v43, %v3054_v6  ;;  %v3086_v6 = vld [vmem:[%s5349_s19 + $0xc] ss:$0 sm:$0xff]  ;;  %v3090_v43 = vld [vmem:[%s5339_s8 + $0x490] sm:$0xff] }
 0x89e   : > { %v1580_v61 = vmul.f32 1.442695, %v1579_v60 }
 0x89f   : > { %4288 = vmatpush3.bf16.msra.mxu1 %v4287_v7  ;;  %v3091_v7 = vld [vmem:[%s5339_s8 + $0x498] sm:$0xff] }
 0x8a0   : > { %4566 = vpow2.f32 %v1580_v61  ;;  %4289 = vmatprep.subr.bf16.mxu1 %v4923_v1  ;;  %v4326_v9 = vpack.c.bf16 %v3091_v7, %v3090_v43 }
 0x8a3   : > { %4291 = vmatpush3.bf16.msra.mxu1 %v4290_v10  ;;  %v3092_v10 = vld [vmem:[%s5339_s8 + $0x4a0] sm:$0xff] }
 0x8a4   : > { %4292 = vmatprep.subr.bf16.mxu1 %v4923_v1 }
 0x8a7   : > { %4294 = vmatpush3.bf16.msra.mxu1 %v4293_v13  ;;  %v4329_v13 = vpack.c.bf16 %v3093_v11, %v3092_v10 }
 0x8a8   : > { %4295 = vmatprep.subr.bf16.mxu1 %v4923_v1 }
 0x8aa   : > { %v4567_v62 = vpop.eup %4566 }
 0x8ab   : > { %v1582_v63 = vsel %vm542_vm4, %v1543_v17, %v4567_v62  ;;  %4297 = vmatpush3.bf16.msra.mxu1 %v4296_v16  ;;  %v3064_v17 = vld [vmem:[%s5341_s23 + $0x100] sm:$0xff]  ;;  %v4332_v16 = vpack.c.bf16 %v3095_v15, %v3094_v14 }
 0x8ac   : > { %3004 = vst [vmem:[%s5565_s30 + $0x8] sm:$0xff] %v1582_v63  ;;  %3889 = vmatprep.subr.mxu1 %v4921_v0  ;;  %v4299_v21 = vpack.c.bf16 %v3065_v18, %v3064_v17  ;;  %v3088_v62 = vld [vmem:[%s5339_s8 + $0x480] sm:$0xff]  ;;  %v3089_v63 = vld [vmem:[%s5339_s8 + $0x488] sm:$0xff] }
 0x8ad   : > { %v4323_v3 = vpack.c.bf16 %v3089_v63, %v3088_v62  ;;  %v3096_v17 = vld [vmem:[%s5339_s8 + $0x4c0] sm:$0xff]  ;;  %v3097_v18 = vld [vmem:[%s5339_s8 + $0x4c8] sm:$0xff]  ;;  %v3127_v62 = vld [vmem:[%s5339_s8 + $0x598] sm:$0xff] }
 0x8ae   : > { %4300 = vmatpush3.bf16.msra.mxu0 %v4299_v21  ;;  %v4335_v20 = vpack.c.bf16 %v3097_v18, %v3096_v17  ;;  %v3098_v21 = vld [vmem:[%s5339_s8 + $0x4d0] sm:$0xff]  ;;  %v3105_v17 = vld [vmem:[%s5349_s19 + $0xd] ss:$0 sm:$0xff] }
 0x8af   : > { %4301 = vmatprep.subr.bf16.mxu0 %v4923_v1 }
 0x8b2   : > { %4303 = vmatpush3.bf16.msra.mxu0 %v4302_v23  ;;  %v4338_v23 = vpack.c.bf16 %v3099_v22, %v3098_v21 }
 0x8b3   : > { %4304 = vmatprep.subr.bf16.mxu0 %v4923_v1 }
 0x8b6   : > { %4306 = vmatpush3.bf16.msra.mxu0 %v4305_v26 }
 0x8b7   : > { %4307 = vmatprep.subr.bf16.mxu0 %v4923_v1 }
 0x8ba   : > { %4309 = vmatpush3.bf16.msra.mxu0 %v4308_v40  ;;  %v3110_v40 = vld [vmem:[%s5339_s8 + $0x520] sm:$0xff] }
 0x8bb   : > { %4310 = vmatprep.subr.bf16.mxu0 %v4923_v1  ;;  %v4353_v42 = vpack.c.bf16 %v3111_v41, %v3110_v40 }
 0x8be   : > { %4312 = vmatpush3.bf16.msra.mxu0 %v4311_v44  ;;  %v3112_v44 = vld [vmem:[%s5339_s8 + $0x530] sm:$0xff] }
 0x8bf   : > { %4313 = vmatprep.subr.bf16.mxu0 %v4923_v1  ;;  %v4356_v46 = vpack.c.bf16 %v3113_v45, %v3112_v44 }
 0x8c2   : > { %4315 = vmatpush3.bf16.msra.mxu0 %v4314_v47  ;;  %v3114_v47 = vld [vmem:[%s5339_s8 + $0x540] sm:$0xff] }
 0x8c3   : > { %4316 = vmatprep.subr.bf16.mxu0 %v4923_v1  ;;  %v4359_v49 = vpack.c.bf16 %v3115_v48, %v3114_v47 }
 0x8c6   : > { %4318 = vmatpush3.bf16.msra.mxu0 %v4317_v50  ;;  %v3116_v50 = vld [vmem:[%s5339_s8 + $0x550] sm:$0xff] }
 0x8c7   : > { %4319 = vmatprep.subr.bf16.mxu0 %v4923_v1  ;;  %v4362_v52 = vpack.c.bf16 %v3117_v51, %v3116_v50 }
 0x8ca   : > { %4321 = vmatpush3.bf16.msra.mxu0 %v4320_v19  ;;  %v3118_v19 = vld [vmem:[%s5339_s8 + $0x560] sm:$0xff] }
 0x8cb   : > { %4322 = vmatprep.subr.bf16.mxu0 %v4923_v1 }
 0x956   : > { %v1866_v28 = vpop.f32.mrb[12].mxu0 }
 0x957   : > { %v1867_v29 = vadd.f32 %v3045_v27, %v1866_v28  ;;  %v3818_v30 = vpop.f32.mrb[13].mxu0  ;;  %v4341_v27 = vpack.c.bf16 %v3101_v25, %v3100_v24 }
 0x958   : > { %v3103_v30 = vld [vmem:[%s5339_s8 + $0x4f8] sm:$0xff] }
 0x959   : > { %v1870_v31 = vmul.f32 0.5, %v1867_v29 }
 0x95b   : > { %4568 = vtanh.f32 %v1870_v31 }
 0x965   : > { %v4569_v32 = vpop.eup %4568 }
 0x966   : > { %v1872_v33 = vmul.f32 0.5, %v4569_v32 }
 0x968   : > { %v1873_v34 = vadd.f32 0.5, %v1872_v33 }
 0x96a   : > { %v1874_v35 = vmul.f32 %v1873_v34, %v1867_v29  ;;  %v3102_v29 = vld [vmem:[%s5339_s8 + $0x4f0] sm:$0xff]  ;;  %v3106_v34 = vld [vmem:[%s5339_s8 + $0x500] sm:$0xff] }
 0x96b   : > { %v4344_v31 = vpack.c.bf16 %v3103_v30, %v3102_v29 }
 0x96c   : > { %3852 = vmatmul.mubr.f32.vlgmr.msra.gmra.mrb[12].mxu1 %v1874_v35  ;;  %v3107_v35 = vld [vmem:[%s5339_s8 + $0x508] sm:$0xff] }
 0x96d   : > { %3890 = vmatpush3.msra.mxu1 %v3084_v36  ;;  %3891 = vmatprep.mubr.msk.f32.mxu1 %vm4922_vm0, %v4921_v0  ;;  %v4347_v36 = vpack.c.bf16 %v3107_v35, %v3106_v34 }
 0x96e   : > { %4346 = vmatprep.subr.bf16.mxu1 %v4923_v1 }
 0x970   : > { %3892 = vmatmul.mubr.msk.f32.vlgmr.msra.gmra.mrb[14].mxu1 %vm552_vm1, %v3083_v37  ;;  %v3108_v37 = vld [vmem:[%s5339_s8 + $0x510] sm:$0xff] }
 0x971   : > { %3961 = vmatprep.mubr.msk.f32.mxu1 %vm4922_vm0, %v4921_v0  ;;  %4348 = vmatpush3.bf16.msra.mxu1 %v4347_v36  ;;  %v4350_v39 = vpack.c.bf16 %v3109_v38, %v3108_v37 }
 0x972   : > { %4349 = vmatprep.subr.bf16.mxu1 %v4923_v1 }
 0x975   : > { %4351 = vmatpush3.bf16.msra.mxu1 %v4350_v39 }
 0x976   : > { %4352 = vmatprep.subr.bf16.mxu1 %v4923_v1 }
 0x979   : > { %4354 = vmatpush3.bf16.msra.mxu1 %v4353_v42 }
 0x97a   : > { %4355 = vmatprep.subr.bf16.mxu1 %v4923_v1 }
 0x97d   : > { %4357 = vmatpush3.bf16.msra.mxu1 %v4356_v46 }
 0x97e   : > { %4358 = vmatprep.subr.bf16.mxu1 %v4923_v1 }
 0x981   : > { %4360 = vmatpush3.bf16.msra.mxu1 %v4359_v49 }
 0x982   : > { %4361 = vmatprep.subr.bf16.mxu1 %v4923_v1 }
 0x985   : > { %4363 = vmatpush3.bf16.msra.mxu1 %v4362_v52 }
 0x986   : > { %4364 = vmatprep.subr.bf16.mxu1 %v4923_v1 }
 0xa3f   : > { %v1966_v54 = vpop.f32.mrb[12].mxu1 }
 0xa40   : > { %v1967_v55 = vadd.f32 %v3063_v53, %v1966_v54  ;;  %v3853_v56 = vpop.f32.mrb[13].mxu1  ;;  %v3119_v53 = vld [vmem:[%s5339_s8 + $0x568] sm:$0xff] }
 0xa41   : > { %v4365_v54 = vpack.c.bf16 %v3119_v53, %v3118_v19  ;;  %v3121_v56 = vld [vmem:[%s5339_s8 + $0x578] sm:$0xff] }
 0xa42   : > { %v1970_v57 = vmul.f32 0.5, %v1967_v55 }
 0xa43   : > { %v2190_v58 = vpop.f32.mrb[14].mxu1  ;;  %4366 = vmatpush3.bf16.msra.mxu1 %v4365_v54 }
 0xa44   : > { %4570 = vtanh.f32 %v1970_v57  ;;  %v3893_v59 = vpop.f32.mrb[15].mxu1  ;;  %v2191_v8 = vadd.f32 %v3086_v6, %v2190_v58  ;;  %4367 = vmatprep.subr.bf16.mxu1 %v4923_v1  ;;  %v3124_v58 = vld [vmem:[%s5339_s8 + $0x580] sm:$0xff] }
 0xa45   : > { %v3125_v59 = vld [vmem:[%s5339_s8 + $0x588] sm:$0xff]  ;;  %v3081_v6 = vld [vmem:[%s5351_s29 + $0x2] ss:$0 sm:$0xff] }
 0xa46   : > { %v2194_v12 = vmul.f32 0.5, %v2191_v8 }
 0xa48   : > { %4572 = vtanh.f32 %v2194_v12 }
 0xa4e   : > { %v4571_v60 = vpop.eup %4570 }
 0xa4f   : > { %v1972_v61 = vmul.f32 0.5, %v4571_v60  ;;  %v3126_v60 = vld [vmem:[%s5339_s8 + $0x590] sm:$0xff] }
 0xa50   : > { %v4374_v63 = vpack.c.bf16 %v3127_v62, %v3126_v60  ;;  %v3135_v62 = vld [vmem:[%s5339_s8 + $0x5d8] sm:$0xff] }
 0xa51   : > { %v1973_v2 = vadd.f32 0.5, %v1972_v61  ;;  %v4371_v61 = vpack.c.bf16 %v3125_v59, %v3124_v58  ;;  %v3132_v58 = vld [vmem:[%s5339_s8 + $0x5c0] sm:$0xff]  ;;  %v3133_v59 = vld [vmem:[%s5339_s8 + $0x5c8] sm:$0xff] }
 0xa52   : > { %v4573_v26 = vpop.eup %4572  ;;  %v4383_v60 = vpack.c.bf16 %v3133_v59, %v3132_v58 }
 0xa53   : > { %v1974_v4 = vmul.f32 %v1973_v2, %v1967_v55  ;;  %v2196_v28 = vmul.f32 0.5, %v4573_v26  ;;  %v3120_v55 = vld [vmem:[%s5339_s8 + $0x570] sm:$0xff]  ;;  %v3128_v2 = vld [vmem:[%s5339_s8 + $0x5a0] sm:$0xff] }
 0xa54   : > { %v4368_v57 = vpack.c.bf16 %v3121_v56, %v3120_v55  ;;  %v3130_v55 = vld [vmem:[%s5339_s8 + $0x5b0] sm:$0xff]  ;;  %v3131_v56 = vld [vmem:[%s5339_s8 + $0x5b8] sm:$0xff] }
 0xa55   : > { %3887 = vmatmul.mubr.f32.vlgmr.msra.gmra.mrb[14].mxu0 %v1974_v4  ;;  %v2197_v32 = vadd.f32 0.5, %v2196_v28 }
 0xa56   : > { %4324 = vmatpush3.bf16.msra.mxu0 %v4323_v3  ;;  %3926 = vmatprep.mubr.msk.f32.mxu0 %vm4922_vm0, %v4921_v0  ;;  %v3129_v3 = vld [vmem:[%s5339_s8 + $0x5a8] sm:$0xff] }
 0xa57   : > { %4325 = vmatprep.subr.bf16.mxu0 %v4923_v1  ;;  %v2198_v33 = vmul.f32 %v2197_v32, %v2191_v8  ;;  %4369 = vmatpush3.bf16.msra.mxu1 %v4368_v57  ;;  %v4377_v4 = vpack.c.bf16 %v3129_v3, %v3128_v2  ;;  %v5807_v32 = vld [vmem:[#allocation13] ss:$0 sm:$0xff]  ;;  %v4380_v57 = vpack.c.bf16 %v3131_v56, %v3130_v55  ;;  %v3136_v2 = vld [vmem:[%s5339_s8 + $0x5e0] sm:$0xff] }
 0xa58   : > { %4394 = vmatprep.subr.bf16.mxu1 %v4923_v1  ;;  %v3137_v3 = vld [vmem:[%s5339_s8 + $0x5e8] sm:$0xff] }
 0xa5a   : > { %4327 = vmatpush3.bf16.msra.mxu0 %v4326_v9  ;;  %v5802_v9 = vld [vmem:[#allocation13 + $0x1] ss:$0 sm:$0xff] }
 0xa5b   : > { %4328 = vmatprep.subr.bf16.mxu0 %v4923_v1 }
 0xa5e   : > { %4330 = vmatpush3.bf16.msra.mxu0 %v4329_v13 }
 0xa5f   : > { %4331 = vmatprep.subr.bf16.mxu0 %v4923_v1 }
 0xa62   : > { %4333 = vmatpush3.bf16.msra.mxu0 %v4332_v16 }
 0xa63   : > { %4334 = vmatprep.subr.bf16.mxu0 %v4923_v1 }
 0xa66   : > { %4336 = vmatpush3.bf16.msra.mxu0 %v4335_v20 }
 0xa67   : > { %4337 = vmatprep.subr.bf16.mxu0 %v4923_v1 }
 0xa6a   : > { %4339 = vmatpush3.bf16.msra.mxu0 %v4338_v23 }
 0xa6b   : > { %4340 = vmatprep.subr.bf16.mxu0 %v4923_v1 }
 0xa6e   : > { %4342 = vmatpush3.bf16.msra.mxu0 %v4341_v27 }
 0xa6f   : > { %4343 = vmatprep.subr.bf16.mxu0 %v4923_v1 }
 0xa72   : > { %4345 = vmatpush3.bf16.msra.mxu0 %v4344_v31 }
 0xa73   : > { %4370 = vmatprep.subr.bf16.mxu0 %v4923_v1 }
 0xa75   : > { %3927 = vmatmul.mubr.f32.vlgmr.msra.gmra.mrb[16].mxu0 %v2198_v33 }
 0xa76   : > { %3996 = vmatprep.mubr.msk.f32.mxu0 %vm4922_vm0, %v4921_v0  ;;  %4372 = vmatpush3.bf16.msra.mxu0 %v4371_v61  ;;  %v3134_v61 = vld [vmem:[%s5339_s8 + $0x5d0] sm:$0xff] }
 0xa77   : > { %4373 = vmatprep.subr.bf16.mxu0 %v4923_v1 }
 0xa7a   : > { %4375 = vmatpush3.bf16.msra.mxu0 %v4374_v63  ;;  %v4386_v63 = vpack.c.bf16 %v3135_v62, %v3134_v61 }
 0xa7b   : > { %4376 = vmatprep.subr.bf16.mxu0 %v4923_v1 }
 0xa7e   : > { %4378 = vmatpush3.bf16.msra.mxu0 %v4377_v4  ;;  %v4389_v4 = vpack.c.bf16 %v3137_v3, %v3136_v2 }
 0xa7f   : > { %4379 = vmatprep.subr.bf16.mxu0 %v4923_v1 }
 0xa82   : > { %4381 = vmatpush3.bf16.msra.mxu0 %v4380_v57 }
 0xa83   : > { %4382 = vmatprep.subr.bf16.mxu0 %v4923_v1 }
 0xa86   : > { %4384 = vmatpush3.bf16.msra.mxu0 %v4383_v60 }
 0xa87   : > { %4385 = vmatprep.subr.bf16.mxu0 %v4923_v1 }
 0xa8a   : > { %4387 = vmatpush3.bf16.msra.mxu0 %v4386_v63 }
 0xa8b   : > { %4388 = vmatprep.subr.bf16.mxu0 %v4923_v1 }
 0xa8e   : > { %4390 = vmatpush3.bf16.msra.mxu0 %v4389_v4 }
 0xa8f   : > { %4391 = vmatprep.subr.bf16.mxu0 %v4923_v1 }
 0xb28   : > { %v2066_v43 = vpop.f32.mrb[14].mxu0 }
 0xb29   : > { %v2067_v7 = vadd.f32 %v3081_v6, %v2066_v43  ;;  %v3888_v8 = vpop.f32.mrb[15].mxu0  ;;  %v3138_v6 = vld [vmem:[%s5339_s8 + $0x5f0] sm:$0xff]  ;;  %v3139_v43 = vld [vmem:[%s5339_s8 + $0x5f8] sm:$0xff] }
 0xb2a   : > { %v3142_v8 = vld [vmem:[%s5341_s23 + $0x180] sm:$0xff] }
 0xb2b   : > { %v2070_v10 = vsub.f32 %v5802_v9, %v2067_v7 }
 0xb2d   : > { %v2072_v11 = vand.u32 2147483647, %v2070_v10  ;;  %v2071_v28 = vmax.f32 %v2070_v10, 0.0  ;;  %v3143_v10 = vld [vmem:[%s5341_s23 + $0x188] sm:$0xff] }
 0xb2f   : > { %v2073_v12 = vsub.f32 0.0, %v2072_v11  ;;  %v3144_v11 = vld [vmem:[%s5341_s23 + $0x190] sm:$0xff] }
 0xb31   : > { %v2074_v13 = vmul.f32 1.442695, %v2073_v12  ;;  %v4395_v12 = vpack.c.bf16 %v3143_v10, %v3142_v8 }
 0xb33   : > { %4574 = vpow2.f32 %v2074_v13  ;;  %v3145_v13 = vld [vmem:[%s5341_s23 + $0x198] sm:$0xff] }
 0xb3d   : > { %v4575_v14 = vpop.eup %4574 }
 0xb3e   : > { %v2076_v15 = vadd.f32 1.0, %v4575_v14  ;;  %v2079_v16 = vmul.f32 -0.5, %v4575_v14  ;;  %v2082_v20 = vand.u32 2147483647, %v4575_v14 }
 0xb40   : > { %4576 = vlog2.f32 %v2076_v15  ;;  %v2080_v18 = vadd.f32 1.0, %v2079_v16  ;;  %vm2083_vm7 = vcmp.lt.f32.partialorder %v2082_v20, 0.0004427343  ;;  %v3146_v15 = vld [vmem:[%s5341_s23 + $0x1a0] sm:$0xff]  ;;  %v3147_v16 = vld [vmem:[%s5341_s23 + $0x1a8] sm:$0xff] }
 0xb42   : > { %v2081_v26 = vmul.f32 %v4575_v14, %v2080_v18  ;;  %v4398_v14 = vpack.c.bf16 %v3145_v13, %v3144_v11  ;;  %v3123_v18 = vld [vmem:[%s5349_s19 + $0xe] ss:$0 sm:$0xff] }
 0xb48   : > { %v2290_v21 = vpop.f32.mrb[16].mxu0 }
 0xb49   : > { %v2291_v22 = vadd.f32 %v3105_v17, %v2290_v21  ;;  %v3928_v23 = vpop.f32.mrb[17].mxu0  ;;  %v4401_v17 = vpack.c.bf16 %v3147_v16, %v3146_v15 }
 0xb4a   : > { %v4577_v24 = vpop.eup %4576 }
 0xb4b   : > { %v2078_v25 = vmul.f32 0.6931472, %v4577_v24  ;;  %v2294_v27 = vmul.f32 0.5, %v2291_v22 }
 0xb4d   : > { %v2084_v29 = vsel %vm2083_vm7, %v2081_v26, %v2078_v25  ;;  %4578 = vtanh.f32 %v2294_v27 }
 0xb4e   : > { %v2085_v30 = vadd.f32 %v2084_v29, %v2071_v28  ;;  %v3148_v28 = vld [vmem:[%s5341_s23 + $0x1b0] sm:$0xff]  ;;  %v3149_v29 = vld [vmem:[%s5341_s23 + $0x1b8] sm:$0xff] }
 0xb50   : > { %v2086_v31 = vsub.f32 %v5802_v9, %v2085_v30  ;;  %v4404_v30 = vpack.c.bf16 %v3149_v29, %v3148_v28 }
 0xb52   : > { %v2087_v33 = vsub.f32 %v2086_v31, %v5807_v32  ;;  %v3150_v31 = vld [vmem:[%s5341_s23 + $0x1c0] sm:$0xff] }
 0xb54   : > { %v2089_v34 = vand.u32 2147483647, %v2087_v33  ;;  %v2088_v50 = vmax.f32 %v2087_v33, 0.0  ;;  %v3151_v33 = vld [vmem:[%s5341_s23 + $0x1c8] sm:$0xff] }
 0xb56   : > { %v2090_v35 = vsub.f32 0.0, %v2089_v34  ;;  %v4407_v34 = vpack.c.bf16 %v3151_v33, %v3150_v31 }
 0xb57   : > { %v4579_v36 = vpop.eup %4578 }
 0xb58   : > { %v2091_v37 = vmul.f32 1.442695, %v2090_v35  ;;  %v2296_v38 = vmul.f32 0.5, %v4579_v36  ;;  %v3152_v35 = vld [vmem:[%s5341_s23 + $0x1d0] sm:$0xff]  ;;  %v3153_v36 = vld [vmem:[%s5341_s23 + $0x1d8] sm:$0xff] }
 0xb5a   : > { %4580 = vpow2.f32 %v2091_v37  ;;  %v2297_v39 = vadd.f32 0.5, %v2296_v38  ;;  %v4410_v37 = vpack.c.bf16 %v3153_v36, %v3152_v35  ;;  %v3154_v38 = vld [vmem:[%s5341_s23 + $0x1e0] sm:$0xff] }
 0xb5c   : > { %v2298_v40 = vmul.f32 %v2297_v39, %v2291_v22  ;;  %v3155_v39 = vld [vmem:[%s5341_s23 + $0x1e8] sm:$0xff] }
 0xb5e   : > { %3962 = vmatmul.mubr.f32.vlgmr.msra.gmra.mrb[16].mxu1 %v2298_v40  ;;  %v4413_v40 = vpack.c.bf16 %v3155_v39, %v3154_v38 }
 0xb5f   : > { %4031 = vmatprep.mubr.msk.f32.mxu1 %vm4922_vm0, %v4921_v0  ;;  %4396 = vmatpush3.bf16.msra.mxu1 %v4395_v12 }
 0xb60   : > { %4397 = vmatprep.subr.bf16.mxu1 %v4923_v1 }
 0xb63   : > { %4399 = vmatpush3.bf16.msra.mxu1 %v4398_v14 }
 0xb64   : > { %v4581_v41 = vpop.eup %4580  ;;  %4400 = vmatprep.subr.bf16.mxu1 %v4923_v1 }
 0xb65   : > { %v2093_v42 = vadd.f32 1.0, %v4581_v41  ;;  %v2096_v44 = vmul.f32 -0.5, %v4581_v41  ;;  %v2099_v46 = vand.u32 2147483647, %v4581_v41 }
 0xb67   : > { %4582 = vlog2.f32 %v2093_v42  ;;  %v2097_v45 = vadd.f32 1.0, %v2096_v44  ;;  %vm2100_vm8 = vcmp.lt.f32.partialorder %v2099_v46, 0.0004427343  ;;  %4402 = vmatpush3.bf16.msra.mxu1 %v4401_v17  ;;  %v3157_v42 = vld [vmem:[%s5341_s23 + $0x1f8] sm:$0xff] }
 0xb68   : > { %4403 = vmatprep.subr.bf16.mxu1 %v4923_v1 }
 0xb69   : > { %v2098_v49 = vmul.f32 %v4581_v41, %v2097_v45  ;;  %v3156_v41 = vld [vmem:[%s5341_s23 + $0x1f0] sm:$0xff]  ;;  %v3141_v45 = vld [vmem:[%s5349_s19 + $0xf] ss:$0 sm:$0xff] }
 0xb6a   : > { %v4416_v44 = vpack.c.bf16 %v3157_v42, %v3156_v41 }
 0xb6b   : > { %4405 = vmatpush3.bf16.msra.mxu1 %v4404_v30 }
 0xb6c   : > { %4406 = vmatprep.subr.bf16.mxu1 %v4923_v1 }
 0xb6f   : > { %4408 = vmatpush3.bf16.msra.mxu1 %v4407_v34 }
 0xb70   : > { %4409 = vmatprep.subr.bf16.mxu1 %v4923_v1 }
 0xb71   : > { %v4583_v47 = vpop.eup %4582 }
 0xb72   : > { %v2095_v48 = vmul.f32 0.6931472, %v4583_v47 }
 0xb73   : > { %4411 = vmatpush3.bf16.msra.mxu1 %v4410_v37 }
 0xb74   : > { %v2101_v51 = vsel %vm2100_vm8, %v2098_v49, %v2095_v48  ;;  %4412 = vmatprep.subr.bf16.mxu1 %v4923_v1 }
 0xb75   : > { %v2102_v52 = vadd.f32 %v2101_v51, %v2088_v50 }
 0xb77   : > { %v2103_v0 = vadd.f32 %v5807_v32, %v2102_v52  ;;  %4414 = vmatpush3.bf16.msra.mxu1 %v4413_v40 }
 0xb78   : > { %4415 = vmatprep.subr.bf16.mxu1 %v4923_v1 }
 0xb79   : > { %v2104_v19 = vmul.f32 1.442695, %v2103_v0 }
 0xb7b   : > { %4584 = vpow2.f32 %v2104_v19  ;;  %4417 = vmatpush3.bf16.msra.mxu1 %v4416_v44  ;;  %v3159_v19 = vld [vmem:[%s5351_s29 + $0x3] ss:$0 sm:$0xff] }
 0xb85   : > { %v4585_v53 = vpop.eup %4584 }
 0xb86   : > { %v2106_v54 = vsel %vm542_vm4, %v2067_v7, %v4585_v53  ;;  %v4392_v7 = vpack.c.bf16 %v3139_v43, %v3138_v6 }
 0xb87   : > { %3082 = vst [vmem:[%s5565_s30 + $0x10] sm:$0xff] %v2106_v54 }
 0xb88   : > { %4393 = vmatpush3.bf16.msra.mxu0 %v4392_v7 }
 0xc31   : > { %v2390_v20 = vpop.f32.mrb[16].mxu1 }
 0xc32   : > { %v2391_v21 = vadd.f32 %v3123_v18, %v2390_v20  ;;  %v3963_v22 = vpop.f32.mrb[17].mxu1 }
 0xc34   : > { %v2394_v23 = vmul.f32 0.5, %v2391_v21 }
 0xc36   : > { %4586 = vtanh.f32 %v2394_v23 }
 0xc40   : > { %v4587_v24 = vpop.eup %4586 }
 0xc41   : > { %v2396_v25 = vmul.f32 0.5, %v4587_v24 }
 0xc43   : > { %v2397_v26 = vadd.f32 0.5, %v2396_v25 }
 0xc45   : > { %v2398_v27 = vmul.f32 %v2397_v26, %v2391_v21 }
 0xc47   : > { %3997 = vmatmul.mubr.f32.vlgmr.msra.gmra.mrb[18].mxu0 %v2398_v27 }
 0xd1a   : > { %v2490_v46 = vpop.f32.mrb[18].mxu0 }
 0xd1b   : > { %v2491_v47 = vadd.f32 %v3141_v45, %v2490_v46  ;;  %v3998_v48 = vpop.f32.mrb[19].mxu0 }
 0xd1d   : > { %v2494_v49 = vmul.f32 0.5, %v2491_v47 }
 0xd1f   : > { %4588 = vtanh.f32 %v2494_v49 }
 0xd29   : > { %v4589_v50 = vpop.eup %4588 }
 0xd2a   : > { %v2496_v51 = vmul.f32 0.5, %v4589_v50 }
 0xd2c   : > { %v2497_v52 = vadd.f32 0.5, %v2496_v51 }
 0xd2e   : > { %v2498_v0 = vmul.f32 %v2497_v52, %v2491_v47 }
 0xd30   : > { %4032 = vmatmul.mubr.f32.vlgmr.msra.gmra.mrb[18].mxu1 %v2498_v0 }
 0xe03   : > { %v2590_v53 = vpop.f32.mrb[18].mxu1 }
 0xe04   : > { %v2591_v54 = vadd.f32 %v3159_v19, %v2590_v53  ;;  %v4033_v1 = vpop.f32.mrb[19].mxu1 }
 0xe06   : > { %v2594_v55 = vsub.f32 %v5802_v9, %v2591_v54 }
 0xe08   : > { %v2596_v56 = vand.u32 2147483647, %v2594_v55  ;;  %v2595_v6 = vmax.f32 %v2594_v55, 0.0 }
 0xe0a   : > { %v2597_v57 = vsub.f32 0.0, %v2596_v56 }
 0xe0c   : > { %v2598_v58 = vmul.f32 1.442695, %v2597_v57 }
 0xe0e   : > { %4590 = vpow2.f32 %v2598_v58 }
 0xe18   : > { %v4591_v59 = vpop.eup %4590 }
 0xe19   : > { %v2600_v60 = vadd.f32 1.0, %v4591_v59  ;;  %v2603_v61 = vmul.f32 -0.5, %v4591_v59  ;;  %v2606_v63 = vand.u32 2147483647, %v4591_v59 }
 0xe1b   : > { %4592 = vlog2.f32 %v2600_v60  ;;  %v2604_v62 = vadd.f32 1.0, %v2603_v61  ;;  %vm2607_vm9 = vcmp.lt.f32.partialorder %v2606_v63, 0.0004427343 }
 0xe1d   : > { %v2605_v4 = vmul.f32 %v4591_v59, %v2604_v62 }
 0xe25   : > { %v4593_v2 = vpop.eup %4592 }
 0xe26   : > { %v2602_v3 = vmul.f32 0.6931472, %v4593_v2 }
 0xe28   : > { %v2608_v43 = vsel %vm2607_vm9, %v2605_v4, %v2602_v3 }
 0xe29   : > { %v2609_v7 = vadd.f32 %v2608_v43, %v2595_v6 }
 0xe2b   : > { %v2610_v8 = vsub.f32 %v5802_v9, %v2609_v7 }
 0xe2d   : > { %v2611_v10 = vsub.f32 %v2610_v8, %v5807_v32 }
 0xe2f   : > { %v2613_v11 = vand.u32 2147483647, %v2611_v10  ;;  %v2612_v9 = vmax.f32 %v2611_v10, 0.0 }
 0xe31   : > { %v2614_v12 = vsub.f32 0.0, %v2613_v11 }
 0xe33   : > { %v2615_v13 = vmul.f32 1.442695, %v2614_v12 }
 0xe35   : > { %4594 = vpow2.f32 %v2615_v13 }
 0xe3f   : > { %v4595_v14 = vpop.eup %4594 }
 0xe40   : > { %v2617_v15 = vadd.f32 1.0, %v4595_v14  ;;  %v2620_v16 = vmul.f32 -0.5, %v4595_v14  ;;  %v2623_v18 = vand.u32 2147483647, %v4595_v14 }
 0xe42   : > { %4596 = vlog2.f32 %v2617_v15  ;;  %v2621_v17 = vadd.f32 1.0, %v2620_v16  ;;  %vm2624_vm10 = vcmp.lt.f32.partialorder %v2623_v18, 0.0004427343 }
 0xe44   : > { %v2622_v22 = vmul.f32 %v4595_v14, %v2621_v17 }
 0xe4c   : > { %v4597_v20 = vpop.eup %4596 }
 0xe4d   : > { %v2619_v21 = vmul.f32 0.6931472, %v4597_v20 }
 0xe4f   : > { %v2625_v23 = vsel %vm2624_vm10, %v2622_v22, %v2619_v21 }
 0xe50   : > { %v2626_v24 = vadd.f32 %v2625_v23, %v2612_v9 }
 0xe52   : > { %v2627_v25 = vadd.f32 %v5807_v32, %v2626_v24 }
 0xe54   : > { %v2628_v26 = vmul.f32 1.442695, %v2627_v25 }
 0xe56   : > { %4598 = vpow2.f32 %v2628_v26 }
 0xe60   : > { %v4599_v27 = vpop.eup %4598 }
 0xe61   : > { %v2630_v28 = vsel %vm542_vm4, %v2591_v54, %v4599_v27 }
 0xe62   : > { %3160 = vst [vmem:[%s5565_s30 + $0x18] sm:$0xff] %v2630_v28 }
 0xe63   : > { %4823 = shalt.err (!%p4820_p13)
}
 0xe64   : > { %s4824_s10 = scalar_lea.hbm %s5867_s18, 512  ;;  %s4828_s8 = scalar_lea.hbm %s5972_s15, 1024 }
 0xe65   : > { %p4825_p5 = scmp.ne.s32.totalorder %s5867_s18, %s4824_s10  ;;  %p4829_p6 = scmp.lt.u32.totalorder %s5867_s18, %s5972_s15 }
 0xe66   : > { %p4830_p8 = scmp.lt.u32.totalorder %s4828_s8, %s4824_s10  ;;  %p4832_p3 = scmp.lt.u32.totalorder %s4824_s10, %s5867_s18 }
 0xe67   : > { %p4826_p1 = pnand %p4825_p5, %p5973_p0 }
 0xe68   : > { %p4831_p11 = por %p4830_p8, %p4829_p6 }
 0xe69   : > { %p4827_p9 = pneg %p4826_p1 }
 0xe6a   : > { %p4833_p2 = por %p4832_p3, %p4831_p11 }
 0xe6c   : > { %p4834_p7 = pnand %p4833_p2, %p4827_p9 }
 0xe6e   : > { %4837 = shalt.err (!%p4834_p7)
}
 0xe6f   : > { %s4925_s16 = smov 128   ;;  %s4926_s20 = smov 8  }
 0xe70   : > { %4437 = dma.vmem_to_hbm [thread:$0]  (%p5973_p0), %s5862_s13, 512, %s5867_s18, %s2634_s21, %s4925_s16, %s4925_s16, %s4926_s20  }
 0xe71 PF: > { %s5974_s19 = sld [smem:[#allocation21_spill]]  ;;  %s5975_s11 = sld [smem:[#allocation26_spill]] }
 0xe72   : > { %s5976_s29 = sld [smem:[#allocation23_spill]] }
 0xe77   : > { %s2663_s30 = sand.u32 1, %s5974_s19   ;;  %p5977_p12 = scmp.ne.s32.totalorder %s5975_s11, 0 }
 0xe78   : > { %p5978_p10 = scmp.ge.s32.totalorder %s5976_s29, 2  ;;  %s2664_s3 = scalar_lea.sflag [#allocation4], %s2663_s30 }
 0xe7a   : > { %p4463_p4 = pnand %p5978_p10, %p5977_p12 }
 0xe7c   : > { %4883 = dma.done.wait (!%p4463_p4), %s2664_s3, 512  }
 0xe7d   : > { %4885 = vsyncadd (!%p4463_p4), %s2664_s3, 4294966784  ;;  %s32_s29 = sadd.s32 1, %s5976_s29   ;;  %s5979_s12 = sld [smem:[#allocation22_spill]] }
 0xe7e   : > { %p29_p13 = scmp.ge.s32.totalorder %s32_s29, 4   ;;  %s5980_s26 = sld [smem:[#allocation25_spill]] }
 0xe7f   : > { %s5981_s14 = sld [smem:[#allocation24_spill]]  ;;  %s5982_s24 = smov %s4892_s25 }
 0xe80   : > { %s5984_s27 = smov %s4904_s28  ;;  %31 = sbr.rel (!%p29_p13) target bundleno = 17 (0x11), region = 199 }
 0xe83   : > { %s5983_s25 = smov %s5979_s12 }
 0xe85   : > { %s5985_s28 = smov %s5981_s14 }
 0xe87   :  { %2669 = vsyncpa [#allocation3], 1 }
 0xe88   :  { %2671 = vsyncpa [#allocation3 + $0x1], 1 }
 0xe89   :  { %2672 = vsyncpa [#allocation6], 1 }
 0xe8a   :  { %2674 = vsyncpa [#allocation6 + $0x1], 1 }
 0xe8b   :  { %2675 = vsyncpa [#allocation9], 1 }
 0xe8c   :  { %2677 = vsyncpa [#allocation9 + $0x1], 1 }
 0xe8d   :  { %2678 = vsyncpa [#allocation12], 1 }
 0xe8e   :  { %2680 = vsyncpa [#allocation12 + $0x1], 1 }
 0xe8f   :  { %2681 = vsyncpa [#allocation4], 1 }
 0xe90   :  { %2683 = vsyncpa [#allocation4 + $0x1], 1 }

</bundles_post_ra>
